<compile_context>
chip_gen: v7x
topology: tpu7x:2x2x1
jax: 0.10.0
libtpu: 0.0.40
codegen_flags: <defaults>
</compile_context>

<pallas_src>
import functools

import jax
import jax.numpy as jnp
from jax import lax
from jax.experimental import pallas as pl
from jax.experimental.pallas import tpu as pltpu


# ----------------------------------------------------------------------------
# Fused kernel: depthwise 3x3x3 (pad=1) + BN1 + ReLU + pointwise 1x1x1 + BN2 + ReLU
# ----------------------------------------------------------------------------
def _fused_block_kernel(x_ref, wt_ref, b1_ref, pw_ref, b2_ref, o_ref, y_ref,
                        *, cin, n_planes, h):
    # x_ref : (1, D*H, W*Cin)   unpadded input for one batch element; row = d*H + h
    # wt_ref: (27, H, W*Cin)    depthwise taps * BN1 scale, tiled over (h, w, c);
    #                           H/W zero-padding borders folded in as zero weights
    # b1_ref: (1, W*Cin)        folded BN1 bias (tiled over w)
    # pw_ref: (W*Cin, W*Cout)   block-diagonal pointwise weight kron(I_W, pw) * BN2 scale (bf16)
    # b2_ref: (1, W*Cout)       folded BN2 bias (tiled over w)
    # o_ref : (1, D*H, W*Cout)
    # y_ref : (D*H, W*Cin) f32  VMEM scratch holding relu(bn1(dwconv(x)))
    wc = x_ref.shape[-1]

    # ---- depthwise 3x3x3 + BN1 + ReLU, one D-plane at a time (tiny vreg working set) ----
    for d in range(n_planes):
        slab_c = x_ref[0, pl.ds(d * h, h), :].astype(jnp.float32)       # (H, WC) center plane
        acc = slab_c * wt_ref[13]                                        # center tap (kd,kh,kw)=(1,1,1)
        for kd in range(3):
            sp = d + kd - 1
            if sp < 0 or sp >= n_planes:
                continue          # plane outside the volume: D zero-padding => zero contribution
            slab = slab_c if kd == 1 else x_ref[0, pl.ds(sp * h, h), :].astype(jnp.float32)
            for kh in range(3):
                dh = kh - 1
                # Shift h via a sublane roll (XLU); rows whose h+dh crosses the H border carry
                # zero weight in wt_ref, so the wrap needs no mask.
                hs = slab if dh == 0 else pltpu.roll(slab, shift=(-dh) % h, axis=0)
                for kw in range(3):
                    if kd == 1 and kh == 1 and kw == 1:
                        continue  # center tap already accumulated
                    dw = kw - 1
                    # Shift w via a lane roll of dw*Cin; wrapped lanes carry zero weight.
                    ws = hs if dw == 0 else pltpu.roll(hs, shift=(-dw * cin) % wc, axis=1)
                    t = (kd * 3 + kh) * 3 + kw
                    acc = acc + ws * wt_ref[t]
        y_ref[pl.ds(d * h, h), :] = jnp.maximum(acc + b1_ref[...], 0.0)

    # ---- pointwise 1x1x1 + BN2 + ReLU: one lane-dense MXU matmul over all D*H rows ----
    y = y_ref[...].astype(pw_ref.dtype)            # bf16 MXU inputs, f32 accumulation
    z = jnp.dot(y, pw_ref[...], preferred_element_type=jnp.float32)
    o_ref[0] = jnp.maximum(z + b2_ref[...], 0.0).astype(o_ref.dtype)


# ----------------------------------------------------------------------------
# Wrapper
# ----------------------------------------------------------------------------
def block_forward(x_ndhwc, dw_w, pw_w, scale1, bias1, scale2, bias2,
                  *, pw_dtype=jnp.bfloat16):
    """Fused MobileNet Block forward.

    x_ndhwc : (N, D, H, W, Cin)  (PyTorch NCDHW inputs transpose with (0, 2, 3, 4, 1))
    dw_w    : (3, 3, 3, Cin)     depthwise taps  (PyTorch conv1.weight (Cin,1,3,3,3) permuted)
    pw_w    : (Cin, Cout)        pointwise weight (PyTorch conv2.weight (Cout,Cin,1,1,1) transposed)
    scale*, bias* : folded eval-mode BatchNorm affine per channel.
    Returns (N, D, H, W, Cout).
    """
    N, D, H, W, Cin = x_ndhwc.shape
    Cout = pw_w.shape[1]
    WC, WCo = W * Cin, W * Cout
    if H % 8 != 0:
        raise NotImplementedError("block_forward requires H % 8 == 0")
    f32 = jnp.float32

    # ---- layout plumbing (pure reshape; no padding pass over HBM) -------------------------
    xr = x_ndhwc.reshape(N, D * H, WC)

    # Compact depthwise tap table (27, H, WC): conv taps * BN1 scale, with the H/W
    # zero-padding borders folded in as zero weights (in-kernel rolls then need no masks).
    t_idx = jnp.arange(27)
    kh_idx = (t_idx // 3) % 3
    kw_idx = t_idx % 3
    hh = jnp.arange(H)
    ww = jnp.arange(W)
    h_ok = jnp.logical_not(((kh_idx[:, None] == 0) & (hh[None, :] == 0))
                           | ((kh_idx[:, None] == 2) & (hh[None, :] == H - 1))).astype(f32)  # (27,H)
    w_ok = jnp.logical_not(((kw_idx[:, None] == 0) & (ww[None, :] == 0))
                           | ((kw_idx[:, None] == 2) & (ww[None, :] == W - 1))).astype(f32)  # (27,W)
    base = dw_w.reshape(27, Cin).astype(f32) * scale1.astype(f32)[None, :]                    # (27,Cin)
    wt = base[:, None, None, :] * h_ok[:, :, None, None] * w_ok[:, None, :, None]            # (27,H,W,Cin)
    wt = wt.reshape(27, H, WC)

    # Pointwise conv on the lane-folded layout == matmul against kron(I_W, pw); BN2 scale is
    # folded into the columns; bf16 weight for native MXU issue (f32 accumulation in-kernel).
    pw_big = jnp.kron(jnp.eye(W, dtype=f32), pw_w.astype(f32)) \
        * jnp.tile(scale2.astype(f32), W)[None, :]                                            # (WC,WCo)
    pw_big = pw_big.astype(pw_dtype)
    pw_itemsize = 2 if pw_dtype == jnp.bfloat16 else 4

    b1 = jnp.tile(bias1.astype(f32), W).reshape(1, WC)
    b2 = jnp.tile(bias2.astype(f32), W).reshape(1, WCo)

    kernel = functools.partial(_fused_block_kernel, cin=Cin, n_planes=D, h=H)

    # Advisory cost + VMEM budget derived from the actual resident set (double-buffered blocks
    # + the y scratch), with generous headroom.
    flops = 2 * 27 * N * D * H * W * Cin + 2 * (N * D * H) * WC * WCo
    bytes_accessed = (4 * (N * D * H * WC + 27 * H * WC + WC + WCo + N * D * H * WCo)
                      + pw_itemsize * WC * WCo)
    resident = (2 * 4 * D * H * WC            # x block (double-buffered across n)
                + 2 * 4 * 27 * H * WC         # tap table
                + 2 * pw_itemsize * WC * WCo  # pointwise weight
                + 2 * 4 * (WC + WCo)          # biases
                + 2 * 4 * D * H * WCo         # output block
                + 4 * D * H * WC)             # y scratch
    vmem_limit = int(min(100 * 1024 * 1024, max(2 * resident, 8 * 1024 * 1024)))

    out = pl.pallas_call(
        kernel,
        out_shape=jax.ShapeDtypeStruct((N, D * H, WCo), x_ndhwc.dtype),
        grid=(N,),
        in_specs=[
            pl.BlockSpec((1, D * H, WC), lambda n: (n, 0, 0)),
            # Grid-invariant blocks below (constant index map) are DMA'd once.
            pl.BlockSpec((27, H, WC), lambda n: (0, 0, 0)),
            pl.BlockSpec((1, WC), lambda n: (0, 0)),
            pl.BlockSpec((WC, WCo), lambda n: (0, 0)),
            pl.BlockSpec((1, WCo), lambda n: (0, 0)),
        ],
        out_specs=pl.BlockSpec((1, D * H, WCo), lambda n: (n, 0, 0)),
        scratch_shapes=[pltpu.VMEM((D * H, WC), jnp.float32)],
        compiler_params=pltpu.CompilerParams(
            dimension_semantics=("parallel",),
            vmem_limit_bytes=vmem_limit),
        cost_estimate=pl.CostEstimate(flops=flops, transcendentals=0,
                                      bytes_accessed=int(bytes_accessed)),
    )(xr, wt, b1, pw_big, b2)

    return out.reshape(N, D, H, W, Cout)


# ----------------------------------------------------------------------------
# Pure-JAX reference (for correctness check)
# ----------------------------------------------------------------------------
def ref_forward(x, dw_w, pw_w, scale1, bias1, scale2, bias2):
    Cin = x.shape[-1]
    rhs1 = dw_w.reshape(3, 3, 3, 1, Cin)  # DHWIO, grouped
    y = lax.conv_general_dilated(
        x.astype(jnp.float32), rhs1.astype(jnp.float32),
        window_strides=(1, 1, 1), padding=((1, 1), (1, 1), (1, 1)),
        dimension_numbers=("NDHWC", "DHWIO", "NDHWC"),
        feature_group_count=Cin)
    y = jnp.maximum(y * scale1 + bias1, 0.0)
    rhs2 = pw_w.reshape(1, 1, 1, Cin, -1)
    z = lax.conv_general_dilated(
        y, rhs2.astype(jnp.float32),
        window_strides=(1, 1, 1), padding=((0, 0), (0, 0), (0, 0)),
        dimension_numbers=("NDHWC", "DHWIO", "NDHWC"))
    return jnp.maximum(z * scale2 + bias2, 0.0)


if __name__ == "__main__":
    key = jax.random.PRNGKey(0)
    # Small shapes; W*Cin = 128 lanes in, W*Cout = 256 lanes out (lane-dense, native vreg width).
    N, Cin, Cout = 2, 8, 16
    D, H, W = 8, 8, 16
    ks = jax.random.split(key, 11)

    # Input (NDHWC); a PyTorch NCDHW tensor would be transposed (0, 2, 3, 4, 1).
    x = jax.random.normal(ks[0], (N, D, H, W, Cin), jnp.float32)

    # Parameters (module shapes: conv1 (Cin,1,3,3,3), conv2 (Cout,Cin,1,1,1)).
    dw_w = 0.2 * jax.random.normal(ks[1], (3, 3, 3, Cin), jnp.float32)
    pw_w = 0.2 * jax.random.normal(ks[2], (Cin, Cout), jnp.float32)

    eps = 1e-5
    gamma1 = 1.0 + 0.1 * jax.random.normal(ks[3], (Cin,), jnp.float32)
    beta1 = 0.1 * jax.random.normal(ks[4], (Cin,), jnp.float32)
    rmean1 = 0.1 * jax.random.normal(ks[5], (Cin,), jnp.float32)
    rvar1 = 1.0 + 0.1 * jnp.abs(jax.random.normal(ks[6], (Cin,), jnp.float32))
    scale1 = gamma1 / jnp.sqrt(rvar1 + eps)
    bias1 = beta1 - rmean1 * scale1

    gamma2 = 1.0 + 0.1 * jax.random.normal(ks[7], (Cout,), jnp.float32)
    beta2 = 0.1 * jax.random.normal(ks[8], (Cout,), jnp.float32)
    rmean2 = 0.1 * jax.random.normal(ks[9], (Cout,), jnp.float32)
    rvar2 = 1.0 + 0.1 * jnp.abs(jax.random.normal(ks[10], (Cout,), jnp.float32))
    scale2 = gamma2 / jnp.sqrt(rvar2 + eps)
    bias2 = beta2 - rmean2 * scale2

    out = block_forward(x, dw_w, pw_w, scale1, bias1, scale2, bias2)
    out = jax.block_until_ready(out)

    ref = ref_forward(x, dw_w, pw_w, scale1, bias1, scale2, bias2)
    err = float(jnp.max(jnp.abs(out - ref)))
    # Tolerance accounts for bf16 MXU inputs on the pointwise matmul (f32 accumulation);
    # the depthwise/BN path is pure f32.
    assert err < 3e-2, f"mismatch vs reference: max abs err = {err}"

    print("KERNEL_OK")
</pallas_src>

<mosaic_0001>
module attributes {stable_mosaic.version = 11 : i64} {
  func.func @_fused_block_kernel(%arg0: i32, %arg1: memref<1x64x128xf32, #tpu.memory_space<vmem>>, %arg2: memref<27x8x128xf32, #tpu.memory_space<vmem>>, %arg3: memref<1x128xf32, #tpu.memory_space<vmem>>, %arg4: memref<128x256xbf16, #tpu.memory_space<vmem>>, %arg5: memref<1x256xf32, #tpu.memory_space<vmem>>, %arg6: memref<1x64x256xf32, #tpu.memory_space<vmem>>, %arg7: memref<64x128xf32, #tpu.memory_space<vmem>>) attributes {dimension_semantics = [#tpu.dimension_semantics<parallel>], iteration_bounds = array<i64: 2>, scalar_prefetch = 0 : i64, scratch_operands = 1 : i64, tpu.core_type = #tpu.core_type<tc>, window_params = [{transform_indices = @transform_0, window_bounds = array<i64: 1, 64, 128>}, {pipeline_mode = #tpu.pipeline_mode<synchronous>, transform_indices = @transform_1, window_bounds = array<i64: 27, 8, 128>}, {pipeline_mode = #tpu.pipeline_mode<synchronous>, transform_indices = @transform_2, window_bounds = array<i64: 1, 128>}, {pipeline_mode = #tpu.pipeline_mode<synchronous>, transform_indices = @transform_3, window_bounds = array<i64: 128, 256>}, {pipeline_mode = #tpu.pipeline_mode<synchronous>, transform_indices = @transform_4, window_bounds = array<i64: 1, 256>}, {transform_indices = @transform_5, window_bounds = array<i64: 1, 64, 256>}]} {
    %c0 = arith.constant 0 : index
    %c0_0 = arith.constant 0 : index
    %c0_1 = arith.constant 0 : index
    %0 = vector.load %arg1[%c0, %c0_0, %c0_1] : memref<1x64x128xf32, #tpu.memory_space<vmem>>, vector<1x8x128xf32>
    %1 = vector.shape_cast %0 : vector<1x8x128xf32> to vector<8x128xf32>
    %c13 = arith.constant 13 : index
    %c0_2 = arith.constant 0 : index
    %c0_3 = arith.constant 0 : index
    %2 = vector.load %arg2[%c13, %c0_2, %c0_3] : memref<27x8x128xf32, #tpu.memory_space<vmem>>, vector<1x8x128xf32>
    %3 = vector.shape_cast %2 : vector<1x8x128xf32> to vector<8x128xf32>
    %4 = arith.mulf %1, %3 : vector<8x128xf32>
    %c1_i32 = arith.constant 1 : i32
    %5 = tpu.dynamic_rotate %1 by %c1_i32 dim 0 : vector<8x128xf32>, i32 -> vector<8x128xf32>
    %c8_i32 = arith.constant 8 : i32
    %6 = tpu.dynamic_rotate %5 by %c8_i32 dim 1 : vector<8x128xf32>, i32 -> vector<8x128xf32>
    %c9 = arith.constant 9 : index
    %c0_4 = arith.constant 0 : index
    %c0_5 = arith.constant 0 : index
    %7 = vector.load %arg2[%c9, %c0_4, %c0_5] : memref<27x8x128xf32, #tpu.memory_space<vmem>>, vector<1x8x128xf32>
    %8 = vector.shape_cast %7 : vector<1x8x128xf32> to vector<8x128xf32>
    %9 = arith.mulf %6, %8 : vector<8x128xf32>
    %10 = arith.addf %4, %9 : vector<8x128xf32>
    %c10 = arith.constant 10 : index
    %c0_6 = arith.constant 0 : index
    %c0_7 = arith.constant 0 : index
    %11 = vector.load %arg2[%c10, %c0_6, %c0_7] : memref<27x8x128xf32, #tpu.memory_space<vmem>>, vector<1x8x128xf32>
    %12 = vector.shape_cast %11 : vector<1x8x128xf32> to vector<8x128xf32>
    %13 = arith.mulf %5, %12 : vector<8x128xf32>
    %14 = arith.addf %10, %13 : vector<8x128xf32>
    %c120_i32 = arith.constant 120 : i32
    %15 = tpu.dynamic_rotate %5 by %c120_i32 dim 1 : vector<8x128xf32>, i32 -> vector<8x128xf32>
    %c11 = arith.constant 11 : index
    %c0_8 = arith.constant 0 : index
    %c0_9 = arith.constant 0 : index
    %16 = vector.load %arg2[%c11, %c0_8, %c0_9] : memref<27x8x128xf32, #tpu.memory_space<vmem>>, vector<1x8x128xf32>
    %17 = vector.shape_cast %16 : vector<1x8x128xf32> to vector<8x128xf32>
    %18 = arith.mulf %15, %17 : vector<8x128xf32>
    %19 = arith.addf %14, %18 : vector<8x128xf32>
    %c8_i32_10 = arith.constant 8 : i32
    %20 = tpu.dynamic_rotate %1 by %c8_i32_10 dim 1 : vector<8x128xf32>, i32 -> vector<8x128xf32>
    %c12 = arith.constant 12 : index
    %c0_11 = arith.constant 0 : index
    %c0_12 = arith.constant 0 : index
    %21 = vector.load %arg2[%c12, %c0_11, %c0_12] : memref<27x8x128xf32, #tpu.memory_space<vmem>>, vector<1x8x128xf32>
    %22 = vector.shape_cast %21 : vector<1x8x128xf32> to vector<8x128xf32>
    %23 = arith.mulf %20, %22 : vector<8x128xf32>
    %24 = arith.addf %19, %23 : vector<8x128xf32>
    %c120_i32_13 = arith.constant 120 : i32
    %25 = tpu.dynamic_rotate %1 by %c120_i32_13 dim 1 : vector<8x128xf32>, i32 -> vector<8x128xf32>
    %c14 = arith.constant 14 : index
    %c0_14 = arith.constant 0 : index
    %c0_15 = arith.constant 0 : index
    %26 = vector.load %arg2[%c14, %c0_14, %c0_15] : memref<27x8x128xf32, #tpu.memory_space<vmem>>, vector<1x8x128xf32>
    %27 = vector.shape_cast %26 : vector<1x8x128xf32> to vector<8x128xf32>
    %28 = arith.mulf %25, %27 : vector<8x128xf32>
    %29 = arith.addf %24, %28 : vector<8x128xf32>
    %c7_i32 = arith.constant 7 : i32
    %30 = tpu.dynamic_rotate %1 by %c7_i32 dim 0 : vector<8x128xf32>, i32 -> vector<8x128xf32>
    %c8_i32_16 = arith.constant 8 : i32
    %31 = tpu.dynamic_rotate %30 by %c8_i32_16 dim 1 : vector<8x128xf32>, i32 -> vector<8x128xf32>
    %c15 = arith.constant 15 : index
    %c0_17 = arith.constant 0 : index
    %c0_18 = arith.constant 0 : index
    %32 = vector.load %arg2[%c15, %c0_17, %c0_18] : memref<27x8x128xf32, #tpu.memory_space<vmem>>, vector<1x8x128xf32>
    %33 = vector.shape_cast %32 : vector<1x8x128xf32> to vector<8x128xf32>
    %34 = arith.mulf %31, %33 : vector<8x128xf32>
    %35 = arith.addf %29, %34 : vector<8x128xf32>
    %c16 = arith.constant 16 : index
    %c0_19 = arith.constant 0 : index
    %c0_20 = arith.constant 0 : index
    %36 = vector.load %arg2[%c16, %c0_19, %c0_20] : memref<27x8x128xf32, #tpu.memory_space<vmem>>, vector<1x8x128xf32>
    %37 = vector.shape_cast %36 : vector<1x8x128xf32> to vector<8x128xf32>
    %38 = arith.mulf %30, %37 : vector<8x128xf32>
    %39 = arith.addf %35, %38 : vector<8x128xf32>
    %c120_i32_21 = arith.constant 120 : i32
    %40 = tpu.dynamic_rotate %30 by %c120_i32_21 dim 1 : vector<8x128xf32>, i32 -> vector<8x128xf32>
    %c17 = arith.constant 17 : index
    %c0_22 = arith.constant 0 : index
    %c0_23 = arith.constant 0 : index
    %41 = vector.load %arg2[%c17, %c0_22, %c0_23] : memref<27x8x128xf32, #tpu.memory_space<vmem>>, vector<1x8x128xf32>
    %42 = vector.shape_cast %41 : vector<1x8x128xf32> to vector<8x128xf32>
    %43 = arith.mulf %40, %42 : vector<8x128xf32>
    %44 = arith.addf %39, %43 : vector<8x128xf32>
    %c0_24 = arith.constant 0 : index
    %c8 = arith.constant 8 : index
    %c0_25 = arith.constant 0 : index
    %45 = vector.load %arg1[%c0_24, %c8, %c0_25] : memref<1x64x128xf32, #tpu.memory_space<vmem>>, vector<1x8x128xf32>
    %46 = vector.shape_cast %45 : vector<1x8x128xf32> to vector<8x128xf32>
    %c1_i32_26 = arith.constant 1 : i32
    %47 = tpu.dynamic_rotate %46 by %c1_i32_26 dim 0 : vector<8x128xf32>, i32 -> vector<8x128xf32>
    %c8_i32_27 = arith.constant 8 : i32
    %48 = tpu.dynamic_rotate %47 by %c8_i32_27 dim 1 : vector<8x128xf32>, i32 -> vector<8x128xf32>
    %c18 = arith.constant 18 : index
    %c0_28 = arith.constant 0 : index
    %c0_29 = arith.constant 0 : index
    %49 = vector.load %arg2[%c18, %c0_28, %c0_29] : memref<27x8x128xf32, #tpu.memory_space<vmem>>, vector<1x8x128xf32>
    %50 = vector.shape_cast %49 : vector<1x8x128xf32> to vector<8x128xf32>
    %51 = arith.mulf %48, %50 : vector<8x128xf32>
    %52 = arith.addf %44, %51 : vector<8x128xf32>
    %c19 = arith.constant 19 : index
    %c0_30 = arith.constant 0 : index
    %c0_31 = arith.constant 0 : index
    %53 = vector.load %arg2[%c19, %c0_30, %c0_31] : memref<27x8x128xf32, #tpu.memory_space<vmem>>, vector<1x8x128xf32>
    %54 = vector.shape_cast %53 : vector<1x8x128xf32> to vector<8x128xf32>
    %55 = arith.mulf %47, %54 : vector<8x128xf32>
    %56 = arith.addf %52, %55 : vector<8x128xf32>
    %c120_i32_32 = arith.constant 120 : i32
    %57 = tpu.dynamic_rotate %47 by %c120_i32_32 dim 1 : vector<8x128xf32>, i32 -> vector<8x128xf32>
    %c20 = arith.constant 20 : index
    %c0_33 = arith.constant 0 : index
    %c0_34 = arith.constant 0 : index
    %58 = vector.load %arg2[%c20, %c0_33, %c0_34] : memref<27x8x128xf32, #tpu.memory_space<vmem>>, vector<1x8x128xf32>
    %59 = vector.shape_cast %58 : vector<1x8x128xf32> to vector<8x128xf32>
    %60 = arith.mulf %57, %59 : vector<8x128xf32>
    %61 = arith.addf %56, %60 : vector<8x128xf32>
    %c8_i32_35 = arith.constant 8 : i32
    %62 = tpu.dynamic_rotate %46 by %c8_i32_35 dim 1 : vector<8x128xf32>, i32 -> vector<8x128xf32>
    %c21 = arith.constant 21 : index
    %c0_36 = arith.constant 0 : index
    %c0_37 = arith.constant 0 : index
    %63 = vector.load %arg2[%c21, %c0_36, %c0_37] : memref<27x8x128xf32, #tpu.memory_space<vmem>>, vector<1x8x128xf32>
    %64 = vector.shape_cast %63 : vector<1x8x128xf32> to vector<8x128xf32>
    %65 = arith.mulf %62, %64 : vector<8x128xf32>
    %66 = arith.addf %61, %65 : vector<8x128xf32>
    %c22 = arith.constant 22 : index
    %c0_38 = arith.constant 0 : index
    %c0_39 = arith.constant 0 : index
    %67 = vector.load %arg2[%c22, %c0_38, %c0_39] : memref<27x8x128xf32, #tpu.memory_space<vmem>>, vector<1x8x128xf32>
    %68 = vector.shape_cast %67 : vector<1x8x128xf32> to vector<8x128xf32>
    %69 = arith.mulf %46, %68 : vector<8x128xf32>
    %70 = arith.addf %66, %69 : vector<8x128xf32>
    %c120_i32_40 = arith.constant 120 : i32
    %71 = tpu.dynamic_rotate %46 by %c120_i32_40 dim 1 : vector<8x128xf32>, i32 -> vector<8x128xf32>
    %c23 = arith.constant 23 : index
    %c0_41 = arith.constant 0 : index
    %c0_42 = arith.constant 0 : index
    %72 = vector.load %arg2[%c23, %c0_41, %c0_42] : memref<27x8x128xf32, #tpu.memory_space<vmem>>, vector<1x8x128xf32>
    %73 = vector.shape_cast %72 : vector<1x8x128xf32> to vector<8x128xf32>
    %74 = arith.mulf %71, %73 : vector<8x128xf32>
    %75 = arith.addf %70, %74 : vector<8x128xf32>
    %c7_i32_43 = arith.constant 7 : i32
    %76 = tpu.dynamic_rotate %46 by %c7_i32_43 dim 0 : vector<8x128xf32>, i32 -> vector<8x128xf32>
    %c8_i32_44 = arith.constant 8 : i32
    %77 = tpu.dynamic_rotate %76 by %c8_i32_44 dim 1 : vector<8x128xf32>, i32 -> vector<8x128xf32>
    %c24 = arith.constant 24 : index
    %c0_45 = arith.constant 0 : index
    %c0_46 = arith.constant 0 : index
    %78 = vector.load %arg2[%c24, %c0_45, %c0_46] : memref<27x8x128xf32, #tpu.memory_space<vmem>>, vector<1x8x128xf32>
    %79 = vector.shape_cast %78 : vector<1x8x128xf32> to vector<8x128xf32>
    %80 = arith.mulf %77, %79 : vector<8x128xf32>
    %81 = arith.addf %75, %80 : vector<8x128xf32>
    %c25 = arith.constant 25 : index
    %c0_47 = arith.constant 0 : index
    %c0_48 = arith.constant 0 : index
    %82 = vector.load %arg2[%c25, %c0_47, %c0_48] : memref<27x8x128xf32, #tpu.memory_space<vmem>>, vector<1x8x128xf32>
    %83 = vector.shape_cast %82 : vector<1x8x128xf32> to vector<8x128xf32>
    %84 = arith.mulf %76, %83 : vector<8x128xf32>
    %85 = arith.addf %81, %84 : vector<8x128xf32>
    %c120_i32_49 = arith.constant 120 : i32
    %86 = tpu.dynamic_rotate %76 by %c120_i32_49 dim 1 : vector<8x128xf32>, i32 -> vector<8x128xf32>
    %c26 = arith.constant 26 : index
    %c0_50 = arith.constant 0 : index
    %c0_51 = arith.constant 0 : index
    %87 = vector.load %arg2[%c26, %c0_50, %c0_51] : memref<27x8x128xf32, #tpu.memory_space<vmem>>, vector<1x8x128xf32>
    %88 = vector.shape_cast %87 : vector<1x8x128xf32> to vector<8x128xf32>
    %89 = arith.mulf %86, %88 : vector<8x128xf32>
    %90 = arith.addf %85, %89 : vector<8x128xf32>
    %c0_52 = arith.constant 0 : index
    %c0_53 = arith.constant 0 : index
    %91 = vector.load %arg3[%c0_52, %c0_53] : memref<1x128xf32, #tpu.memory_space<vmem>>, vector<1x128xf32>
    %92 = vector.broadcast %91 : vector<1x128xf32> to vector<8x128xf32>
    %93 = arith.addf %90, %92 : vector<8x128xf32>
    %cst = arith.constant 0.000000e+00 : f32
    %94 = vector.broadcast %cst : f32 to vector<8x128xf32>
    %95 = arith.maximumf %93, %94 : vector<8x128xf32>
    %c0_54 = arith.constant 0 : index
    %c0_55 = arith.constant 0 : index
    %96 = vector.load %arg7[%c0_54, %c0_55] : memref<64x128xf32, #tpu.memory_space<vmem>>, vector<8x128xf32>
    tpu.vector_store %arg7[%c0_54, %c0_55], %95 {strides = array<i32>} : memref<64x128xf32, #tpu.memory_space<vmem>>, vector<8x128xf32>,
    %c0_56 = arith.constant 0 : index
    %c8_57 = arith.constant 8 : index
    %c0_58 = arith.constant 0 : index
    %97 = vector.load %arg1[%c0_56, %c8_57, %c0_58] : memref<1x64x128xf32, #tpu.memory_space<vmem>>, vector<1x8x128xf32>
    %98 = vector.shape_cast %97 : vector<1x8x128xf32> to vector<8x128xf32>
    %c13_59 = arith.constant 13 : index
    %c0_60 = arith.constant 0 : index
    %c0_61 = arith.constant 0 : index
    %99 = vector.load %arg2[%c13_59, %c0_60, %c0_61] : memref<27x8x128xf32, #tpu.memory_space<vmem>>, vector<1x8x128xf32>
    %100 = vector.shape_cast %99 : vector<1x8x128xf32> to vector<8x128xf32>
    %101 = arith.mulf %98, %100 : vector<8x128xf32>
    %c0_62 = arith.constant 0 : index
    %c0_63 = arith.constant 0 : index
    %c0_64 = arith.constant 0 : index
    %102 = vector.load %arg1[%c0_62, %c0_63, %c0_64] : memref<1x64x128xf32, #tpu.memory_space<vmem>>, vector<1x8x128xf32>
    %103 = vector.shape_cast %102 : vector<1x8x128xf32> to vector<8x128xf32>
    %c1_i32_65 = arith.constant 1 : i32
    %104 = tpu.dynamic_rotate %103 by %c1_i32_65 dim 0 : vector<8x128xf32>, i32 -> vector<8x128xf32>
    %c8_i32_66 = arith.constant 8 : i32
    %105 = tpu.dynamic_rotate %104 by %c8_i32_66 dim 1 : vector<8x128xf32>, i32 -> vector<8x128xf32>
    %c0_67 = arith.constant 0 : index
    %c0_68 = arith.constant 0 : index
    %c0_69 = arith.constant 0 : index
    %106 = vector.load %arg2[%c0_67, %c0_68, %c0_69] : memref<27x8x128xf32, #tpu.memory_space<vmem>>, vector<1x8x128xf32>
    %107 = vector.shape_cast %106 : vector<1x8x128xf32> to vector<8x128xf32>
    %108 = arith.mulf %105, %107 : vector<8x128xf32>
    %109 = arith.addf %101, %108 : vector<8x128xf32>
    %c1 = arith.constant 1 : index
    %c0_70 = arith.constant 0 : index
    %c0_71 = arith.constant 0 : index
    %110 = vector.load %arg2[%c1, %c0_70, %c0_71] : memref<27x8x128xf32, #tpu.memory_space<vmem>>, vector<1x8x128xf32>
    %111 = vector.shape_cast %110 : vector<1x8x128xf32> to vector<8x128xf32>
    %112 = arith.mulf %104, %111 : vector<8x128xf32>
    %113 = arith.addf %109, %112 : vector<8x128xf32>
    %c120_i32_72 = arith.constant 120 : i32
    %114 = tpu.dynamic_rotate %104 by %c120_i32_72 dim 1 : vector<8x128xf32>, i32 -> vector<8x128xf32>
    %c2 = arith.constant 2 : index
    %c0_73 = arith.constant 0 : index
    %c0_74 = arith.constant 0 : index
    %115 = vector.load %arg2[%c2, %c0_73, %c0_74] : memref<27x8x128xf32, #tpu.memory_space<vmem>>, vector<1x8x128xf32>
    %116 = vector.shape_cast %115 : vector<1x8x128xf32> to vector<8x128xf32>
    %117 = arith.mulf %114, %116 : vector<8x128xf32>
    %118 = arith.addf %113, %117 : vector<8x128xf32>
    %c8_i32_75 = arith.constant 8 : i32
    %119 = tpu.dynamic_rotate %103 by %c8_i32_75 dim 1 : vector<8x128xf32>, i32 -> vector<8x128xf32>
    %c3 = arith.constant 3 : index
    %c0_76 = arith.constant 0 : index
    %c0_77 = arith.constant 0 : index
    %120 = vector.load %arg2[%c3, %c0_76, %c0_77] : memref<27x8x128xf32, #tpu.memory_space<vmem>>, vector<1x8x128xf32>
    %121 = vector.shape_cast %120 : vector<1x8x128xf32> to vector<8x128xf32>
    %122 = arith.mulf %119, %121 : vector<8x128xf32>
    %123 = arith.addf %118, %122 : vector<8x128xf32>
    %c4 = arith.constant 4 : index
    %c0_78 = arith.constant 0 : index
    %c0_79 = arith.constant 0 : index
    %124 = vector.load %arg2[%c4, %c0_78, %c0_79] : memref<27x8x128xf32, #tpu.memory_space<vmem>>, vector<1x8x128xf32>
    %125 = vector.shape_cast %124 : vector<1x8x128xf32> to vector<8x128xf32>
    %126 = arith.mulf %103, %125 : vector<8x128xf32>
    %127 = arith.addf %123, %126 : vector<8x128xf32>
    %c120_i32_80 = arith.constant 120 : i32
    %128 = tpu.dynamic_rotate %103 by %c120_i32_80 dim 1 : vector<8x128xf32>, i32 -> vector<8x128xf32>
    %c5 = arith.constant 5 : index
    %c0_81 = arith.constant 0 : index
    %c0_82 = arith.constant 0 : index
    %129 = vector.load %arg2[%c5, %c0_81, %c0_82] : memref<27x8x128xf32, #tpu.memory_space<vmem>>, vector<1x8x128xf32>
    %130 = vector.shape_cast %129 : vector<1x8x128xf32> to vector<8x128xf32>
    %131 = arith.mulf %128, %130 : vector<8x128xf32>
    %132 = arith.addf %127, %131 : vector<8x128xf32>
    %c7_i32_83 = arith.constant 7 : i32
    %133 = tpu.dynamic_rotate %103 by %c7_i32_83 dim 0 : vector<8x128xf32>, i32 -> vector<8x128xf32>
    %c8_i32_84 = arith.constant 8 : i32
    %134 = tpu.dynamic_rotate %133 by %c8_i32_84 dim 1 : vector<8x128xf32>, i32 -> vector<8x128xf32>
    %c6 = arith.constant 6 : index
    %c0_85 = arith.constant 0 : index
    %c0_86 = arith.constant 0 : index
    %135 = vector.load %arg2[%c6, %c0_85, %c0_86] : memref<27x8x128xf32, #tpu.memory_space<vmem>>, vector<1x8x128xf32>
    %136 = vector.shape_cast %135 : vector<1x8x128xf32> to vector<8x128xf32>
    %137 = arith.mulf %134, %136 : vector<8x128xf32>
    %138 = arith.addf %132, %137 : vector<8x128xf32>
    %c7 = arith.constant 7 : index
    %c0_87 = arith.constant 0 : index
    %c0_88 = arith.constant 0 : index
    %139 = vector.load %arg2[%c7, %c0_87, %c0_88] : memref<27x8x128xf32, #tpu.memory_space<vmem>>, vector<1x8x128xf32>
    %140 = vector.shape_cast %139 : vector<1x8x128xf32> to vector<8x128xf32>
    %141 = arith.mulf %133, %140 : vector<8x128xf32>
    %142 = arith.addf %138, %141 : vector<8x128xf32>
    %c120_i32_89 = arith.constant 120 : i32
    %143 = tpu.dynamic_rotate %133 by %c120_i32_89 dim 1 : vector<8x128xf32>, i32 -> vector<8x128xf32>
    %c8_90 = arith.constant 8 : index
    %c0_91 = arith.constant 0 : index
    %c0_92 = arith.constant 0 : index
    %144 = vector.load %arg2[%c8_90, %c0_91, %c0_92] : memref<27x8x128xf32, #tpu.memory_space<vmem>>, vector<1x8x128xf32>
    %145 = vector.shape_cast %144 : vector<1x8x128xf32> to vector<8x128xf32>
    %146 = arith.mulf %143, %145 : vector<8x128xf32>
    %147 = arith.addf %142, %146 : vector<8x128xf32>
    %c1_i32_93 = arith.constant 1 : i32
    %148 = tpu.dynamic_rotate %98 by %c1_i32_93 dim 0 : vector<8x128xf32>, i32 -> vector<8x128xf32>
    %c8_i32_94 = arith.constant 8 : i32
    %149 = tpu.dynamic_rotate %148 by %c8_i32_94 dim 1 : vector<8x128xf32>, i32 -> vector<8x128xf32>
    %c9_95 = arith.constant 9 : index
    %c0_96 = arith.constant 0 : index
    %c0_97 = arith.constant 0 : index
    %150 = vector.load %arg2[%c9_95, %c0_96, %c0_97] : memref<27x8x128xf32, #tpu.memory_space<vmem>>, vector<1x8x128xf32>
    %151 = vector.shape_cast %150 : vector<1x8x128xf32> to vector<8x128xf32>
    %152 = arith.mulf %149, %151 : vector<8x128xf32>
    %153 = arith.addf %147, %152 : vector<8x128xf32>
    %c10_98 = arith.constant 10 : index
    %c0_99 = arith.constant 0 : index
    %c0_100 = arith.constant 0 : index
    %154 = vector.load %arg2[%c10_98, %c0_99, %c0_100] : memref<27x8x128xf32, #tpu.memory_space<vmem>>, vector<1x8x128xf32>
    %155 = vector.shape_cast %154 : vector<1x8x128xf32> to vector<8x128xf32>
    %156 = arith.mulf %148, %155 : vector<8x128xf32>
    %157 = arith.addf %153, %156 : vector<8x128xf32>
    %c120_i32_101 = arith.constant 120 : i32
    %158 = tpu.dynamic_rotate %148 by %c120_i32_101 dim 1 : vector<8x128xf32>, i32 -> vector<8x128xf32>
    %c11_102 = arith.constant 11 : index
    %c0_103 = arith.constant 0 : index
    %c0_104 = arith.constant 0 : index
    %159 = vector.load %arg2[%c11_102, %c0_103, %c0_104] : memref<27x8x128xf32, #tpu.memory_space<vmem>>, vector<1x8x128xf32>
    %160 = vector.shape_cast %159 : vector<1x8x128xf32> to vector<8x128xf32>
    %161 = arith.mulf %158, %160 : vector<8x128xf32>
    %162 = arith.addf %157, %161 : vector<8x128xf32>
    %c8_i32_105 = arith.constant 8 : i32
    %163 = tpu.dynamic_rotate %98 by %c8_i32_105 dim 1 : vector<8x128xf32>, i32 -> vector<8x128xf32>
    %c12_106 = arith.constant 12 : index
    %c0_107 = arith.constant 0 : index
    %c0_108 = arith.constant 0 : index
    %164 = vector.load %arg2[%c12_106, %c0_107, %c0_108] : memref<27x8x128xf32, #tpu.memory_space<vmem>>, vector<1x8x128xf32>
    %165 = vector.shape_cast %164 : vector<1x8x128xf32> to vector<8x128xf32>
    %166 = arith.mulf %163, %165 : vector<8x128xf32>
    %167 = arith.addf %162, %166 : vector<8x128xf32>
    %c120_i32_109 = arith.constant 120 : i32
    %168 = tpu.dynamic_rotate %98 by %c120_i32_109 dim 1 : vector<8x128xf32>, i32 -> vector<8x128xf32>
    %c14_110 = arith.constant 14 : index
    %c0_111 = arith.constant 0 : index
    %c0_112 = arith.constant 0 : index
    %169 = vector.load %arg2[%c14_110, %c0_111, %c0_112] : memref<27x8x128xf32, #tpu.memory_space<vmem>>, vector<1x8x128xf32>
    %170 = vector.shape_cast %169 : vector<1x8x128xf32> to vector<8x128xf32>
    %171 = arith.mulf %168, %170 : vector<8x128xf32>
    %172 = arith.addf %167, %171 : vector<8x128xf32>
    %c7_i32_113 = arith.constant 7 : i32
    %173 = tpu.dynamic_rotate %98 by %c7_i32_113 dim 0 : vector<8x128xf32>, i32 -> vector<8x128xf32>
    %c8_i32_114 = arith.constant 8 : i32
    %174 = tpu.dynamic_rotate %173 by %c8_i32_114 dim 1 : vector<8x128xf32>, i32 -> vector<8x128xf32>
    %c15_115 = arith.constant 15 : index
    %c0_116 = arith.constant 0 : index
    %c0_117 = arith.constant 0 : index
    %175 = vector.load %arg2[%c15_115, %c0_116, %c0_117] : memref<27x8x128xf32, #tpu.memory_space<vmem>>, vector<1x8x128xf32>
    %176 = vector.shape_cast %175 : vector<1x8x128xf32> to vector<8x128xf32>
    %177 = arith.mulf %174, %176 : vector<8x128xf32>
    %178 = arith.addf %172, %177 : vector<8x128xf32>
    %c16_118 = arith.constant 16 : index
    %c0_119 = arith.constant 0 : index
    %c0_120 = arith.constant 0 : index
    %179 = vector.load %arg2[%c16_118, %c0_119, %c0_120] : memref<27x8x128xf32, #tpu.memory_space<vmem>>, vector<1x8x128xf32>
    %180 = vector.shape_cast %179 : vector<1x8x128xf32> to vector<8x128xf32>
    %181 = arith.mulf %173, %180 : vector<8x128xf32>
    %182 = arith.addf %178, %181 : vector<8x128xf32>
    %c120_i32_121 = arith.constant 120 : i32
    %183 = tpu.dynamic_rotate %173 by %c120_i32_121 dim 1 : vector<8x128xf32>, i32 -> vector<8x128xf32>
    %c17_122 = arith.constant 17 : index
    %c0_123 = arith.constant 0 : index
    %c0_124 = arith.constant 0 : index
    %184 = vector.load %arg2[%c17_122, %c0_123, %c0_124] : memref<27x8x128xf32, #tpu.memory_space<vmem>>, vector<1x8x128xf32>
    %185 = vector.shape_cast %184 : vector<1x8x128xf32> to vector<8x128xf32>
    %186 = arith.mulf %183, %185 : vector<8x128xf32>
    %187 = arith.addf %182, %186 : vector<8x128xf32>
    %c0_125 = arith.constant 0 : index
    %c16_126 = arith.constant 16 : index
    %c0_127 = arith.constant 0 : index
    %188 = vector.load %arg1[%c0_125, %c16_126, %c0_127] : memref<1x64x128xf32, #tpu.memory_space<vmem>>, vector<1x8x128xf32>
    %189 = vector.shape_cast %188 : vector<1x8x128xf32> to vector<8x128xf32>
    %c1_i32_128 = arith.constant 1 : i32
    %190 = tpu.dynamic_rotate %189 by %c1_i32_128 dim 0 : vector<8x128xf32>, i32 -> vector<8x128xf32>
    %c8_i32_129 = arith.constant 8 : i32
    %191 = tpu.dynamic_rotate %190 by %c8_i32_129 dim 1 : vector<8x128xf32>, i32 -> vector<8x128xf32>
    %c18_130 = arith.constant 18 : index
    %c0_131 = arith.constant 0 : index
    %c0_132 = arith.constant 0 : index
    %192 = vector.load %arg2[%c18_130, %c0_131, %c0_132] : memref<27x8x128xf32, #tpu.memory_space<vmem>>, vector<1x8x128xf32>
    %193 = vector.shape_cast %192 : vector<1x8x128xf32> to vector<8x128xf32>
    %194 = arith.mulf %191, %193 : vector<8x128xf32>
    %195 = arith.addf %187, %194 : vector<8x128xf32>
    %c19_133 = arith.constant 19 : index
    %c0_134 = arith.constant 0 : index
    %c0_135 = arith.constant 0 : index
    %196 = vector.load %arg2[%c19_133, %c0_134, %c0_135] : memref<27x8x128xf32, #tpu.memory_space<vmem>>, vector<1x8x128xf32>
    %197 = vector.shape_cast %196 : vector<1x8x128xf32> to vector<8x128xf32>
    %198 = arith.mulf %190, %197 : vector<8x128xf32>
    %199 = arith.addf %195, %198 : vector<8x128xf32>
    %c120_i32_136 = arith.constant 120 : i32
    %200 = tpu.dynamic_rotate %190 by %c120_i32_136 dim 1 : vector<8x128xf32>, i32 -> vector<8x128xf32>
    %c20_137 = arith.constant 20 : index
    %c0_138 = arith.constant 0 : index
    %c0_139 = arith.constant 0 : index
    %201 = vector.load %arg2[%c20_137, %c0_138, %c0_139] : memref<27x8x128xf32, #tpu.memory_space<vmem>>, vector<1x8x128xf32>
    %202 = vector.shape_cast %201 : vector<1x8x128xf32> to vector<8x128xf32>
    %203 = arith.mulf %200, %202 : vector<8x128xf32>
    %204 = arith.addf %199, %203 : vector<8x128xf32>
    %c8_i32_140 = arith.constant 8 : i32
    %205 = tpu.dynamic_rotate %189 by %c8_i32_140 dim 1 : vector<8x128xf32>, i32 -> vector<8x128xf32>
    %c21_141 = arith.constant 21 : index
    %c0_142 = arith.constant 0 : index
    %c0_143 = arith.constant 0 : index
    %206 = vector.load %arg2[%c21_141, %c0_142, %c0_143] : memref<27x8x128xf32, #tpu.memory_space<vmem>>, vector<1x8x128xf32>
    %207 = vector.shape_cast %206 : vector<1x8x128xf32> to vector<8x128xf32>
    %208 = arith.mulf %205, %207 : vector<8x128xf32>
    %209 = arith.addf %204, %208 : vector<8x128xf32>
    %c22_144 = arith.constant 22 : index
    %c0_145 = arith.constant 0 : index
    %c0_146 = arith.constant 0 : index
    %210 = vector.load %arg2[%c22_144, %c0_145, %c0_146] : memref<27x8x128xf32, #tpu.memory_space<vmem>>, vector<1x8x128xf32>
    %211 = vector.shape_cast %210 : vector<1x8x128xf32> to vector<8x128xf32>
    %212 = arith.mulf %189, %211 : vector<8x128xf32>
    %213 = arith.addf %209, %212 : vector<8x128xf32>
    %c120_i32_147 = arith.constant 120 : i32
    %214 = tpu.dynamic_rotate %189 by %c120_i32_147 dim 1 : vector<8x128xf32>, i32 -> vector<8x128xf32>
    %c23_148 = arith.constant 23 : index
    %c0_149 = arith.constant 0 : index
    %c0_150 = arith.constant 0 : index
    %215 = vector.load %arg2[%c23_148, %c0_149, %c0_150] : memref<27x8x128xf32, #tpu.memory_space<vmem>>, vector<1x8x128xf32>
    %216 = vector.shape_cast %215 : vector<1x8x128xf32> to vector<8x128xf32>
    %217 = arith.mulf %214, %216 : vector<8x128xf32>
    %218 = arith.addf %213, %217 : vector<8x128xf32>
    %c7_i32_151 = arith.constant 7 : i32
    %219 = tpu.dynamic_rotate %189 by %c7_i32_151 dim 0 : vector<8x128xf32>, i32 -> vector<8x128xf32>
    %c8_i32_152 = arith.constant 8 : i32
    %220 = tpu.dynamic_rotate %219 by %c8_i32_152 dim 1 : vector<8x128xf32>, i32 -> vector<8x128xf32>
    %c24_153 = arith.constant 24 : index
    %c0_154 = arith.constant 0 : index
    %c0_155 = arith.constant 0 : index
    %221 = vector.load %arg2[%c24_153, %c0_154, %c0_155] : memref<27x8x128xf32, #tpu.memory_space<vmem>>, vector<1x8x128xf32>
    %222 = vector.shape_cast %221 : vector<1x8x128xf32> to vector<8x128xf32>
    %223 = arith.mulf %220, %222 : vector<8x128xf32>
    %224 = arith.addf %218, %223 : vector<8x128xf32>
    %c25_156 = arith.constant 25 : index
    %c0_157 = arith.constant 0 : index
    %c0_158 = arith.constant 0 : index
    %225 = vector.load %arg2[%c25_156, %c0_157, %c0_158] : memref<27x8x128xf32, #tpu.memory_space<vmem>>, vector<1x8x128xf32>
    %226 = vector.shape_cast %225 : vector<1x8x128xf32> to vector<8x128xf32>
    %227 = arith.mulf %219, %226 : vector<8x128xf32>
    %228 = arith.addf %224, %227 : vector<8x128xf32>
    %c120_i32_159 = arith.constant 120 : i32
    %229 = tpu.dynamic_rotate %219 by %c120_i32_159 dim 1 : vector<8x128xf32>, i32 -> vector<8x128xf32>
    %c26_160 = arith.constant 26 : index
    %c0_161 = arith.constant 0 : index
    %c0_162 = arith.constant 0 : index
    %230 = vector.load %arg2[%c26_160, %c0_161, %c0_162] : memref<27x8x128xf32, #tpu.memory_space<vmem>>, vector<1x8x128xf32>
    %231 = vector.shape_cast %230 : vector<1x8x128xf32> to vector<8x128xf32>
    %232 = arith.mulf %229, %231 : vector<8x128xf32>
    %233 = arith.addf %228, %232 : vector<8x128xf32>
    %c0_163 = arith.constant 0 : index
    %c0_164 = arith.constant 0 : index
    %234 = vector.load %arg3[%c0_163, %c0_164] : memref<1x128xf32, #tpu.memory_space<vmem>>, vector<1x128xf32>
    %235 = vector.broadcast %234 : vector<1x128xf32> to vector<8x128xf32>
    %236 = arith.addf %233, %235 : vector<8x128xf32>
    %cst_165 = arith.constant 0.000000e+00 : f32
    %237 = vector.broadcast %cst_165 : f32 to vector<8x128xf32>
    %238 = arith.maximumf %236, %237 : vector<8x128xf32>
    %c8_166 = arith.constant 8 : index
    %c0_167 = arith.constant 0 : index
    %239 = vector.load %arg7[%c8_166, %c0_167] : memref<64x128xf32, #tpu.memory_space<vmem>>, vector<8x128xf32>
    tpu.vector_store %arg7[%c8_166, %c0_167], %238 {strides = array<i32>} : memref<64x128xf32, #tpu.memory_space<vmem>>, vector<8x128xf32>,
    %c0_168 = arith.constant 0 : index
    %c16_169 = arith.constant 16 : index
    %c0_170 = arith.constant 0 : index
    %240 = vector.load %arg1[%c0_168, %c16_169, %c0_170] : memref<1x64x128xf32, #tpu.memory_space<vmem>>, vector<1x8x128xf32>
    %241 = vector.shape_cast %240 : vector<1x8x128xf32> to vector<8x128xf32>
    %c13_171 = arith.constant 13 : index
    %c0_172 = arith.constant 0 : index
    %c0_173 = arith.constant 0 : index
    %242 = vector.load %arg2[%c13_171, %c0_172, %c0_173] : memref<27x8x128xf32, #tpu.memory_space<vmem>>, vector<1x8x128xf32>
    %243 = vector.shape_cast %242 : vector<1x8x128xf32> to vector<8x128xf32>
    %244 = arith.mulf %241, %243 : vector<8x128xf32>
    %c0_174 = arith.constant 0 : index
    %c8_175 = arith.constant 8 : index
    %c0_176 = arith.constant 0 : index
    %245 = vector.load %arg1[%c0_174, %c8_175, %c0_176] : memref<1x64x128xf32, #tpu.memory_space<vmem>>, vector<1x8x128xf32>
    %246 = vector.shape_cast %245 : vector<1x8x128xf32> to vector<8x128xf32>
    %c1_i32_177 = arith.constant 1 : i32
    %247 = tpu.dynamic_rotate %246 by %c1_i32_177 dim 0 : vector<8x128xf32>, i32 -> vector<8x128xf32>
    %c8_i32_178 = arith.constant 8 : i32
    %248 = tpu.dynamic_rotate %247 by %c8_i32_178 dim 1 : vector<8x128xf32>, i32 -> vector<8x128xf32>
    %c0_179 = arith.constant 0 : index
    %c0_180 = arith.constant 0 : index
    %c0_181 = arith.constant 0 : index
    %249 = vector.load %arg2[%c0_179, %c0_180, %c0_181] : memref<27x8x128xf32, #tpu.memory_space<vmem>>, vector<1x8x128xf32>
    %250 = vector.shape_cast %249 : vector<1x8x128xf32> to vector<8x128xf32>
    %251 = arith.mulf %248, %250 : vector<8x128xf32>
    %252 = arith.addf %244, %251 : vector<8x128xf32>
    %c1_182 = arith.constant 1 : index
    %c0_183 = arith.constant 0 : index
    %c0_184 = arith.constant 0 : index
    %253 = vector.load %arg2[%c1_182, %c0_183, %c0_184] : memref<27x8x128xf32, #tpu.memory_space<vmem>>, vector<1x8x128xf32>
    %254 = vector.shape_cast %253 : vector<1x8x128xf32> to vector<8x128xf32>
    %255 = arith.mulf %247, %254 : vector<8x128xf32>
    %256 = arith.addf %252, %255 : vector<8x128xf32>
    %c120_i32_185 = arith.constant 120 : i32
    %257 = tpu.dynamic_rotate %247 by %c120_i32_185 dim 1 : vector<8x128xf32>, i32 -> vector<8x128xf32>
    %c2_186 = arith.constant 2 : index
    %c0_187 = arith.constant 0 : index
    %c0_188 = arith.constant 0 : index
    %258 = vector.load %arg2[%c2_186, %c0_187, %c0_188] : memref<27x8x128xf32, #tpu.memory_space<vmem>>, vector<1x8x128xf32>
    %259 = vector.shape_cast %258 : vector<1x8x128xf32> to vector<8x128xf32>
    %260 = arith.mulf %257, %259 : vector<8x128xf32>
    %261 = arith.addf %256, %260 : vector<8x128xf32>
    %c8_i32_189 = arith.constant 8 : i32
    %262 = tpu.dynamic_rotate %246 by %c8_i32_189 dim 1 : vector<8x128xf32>, i32 -> vector<8x128xf32>
    %c3_190 = arith.constant 3 : index
    %c0_191 = arith.constant 0 : index
    %c0_192 = arith.constant 0 : index
    %263 = vector.load %arg2[%c3_190, %c0_191, %c0_192] : memref<27x8x128xf32, #tpu.memory_space<vmem>>, vector<1x8x128xf32>
    %264 = vector.shape_cast %263 : vector<1x8x128xf32> to vector<8x128xf32>
    %265 = arith.mulf %262, %264 : vector<8x128xf32>
    %266 = arith.addf %261, %265 : vector<8x128xf32>
    %c4_193 = arith.constant 4 : index
    %c0_194 = arith.constant 0 : index
    %c0_195 = arith.constant 0 : index
    %267 = vector.load %arg2[%c4_193, %c0_194, %c0_195] : memref<27x8x128xf32, #tpu.memory_space<vmem>>, vector<1x8x128xf32>
    %268 = vector.shape_cast %267 : vector<1x8x128xf32> to vector<8x128xf32>
    %269 = arith.mulf %246, %268 : vector<8x128xf32>
    %270 = arith.addf %266, %269 : vector<8x128xf32>
    %c120_i32_196 = arith.constant 120 : i32
    %271 = tpu.dynamic_rotate %246 by %c120_i32_196 dim 1 : vector<8x128xf32>, i32 -> vector<8x128xf32>
    %c5_197 = arith.constant 5 : index
    %c0_198 = arith.constant 0 : index
    %c0_199 = arith.constant 0 : index
    %272 = vector.load %arg2[%c5_197, %c0_198, %c0_199] : memref<27x8x128xf32, #tpu.memory_space<vmem>>, vector<1x8x128xf32>
    %273 = vector.shape_cast %272 : vector<1x8x128xf32> to vector<8x128xf32>
    %274 = arith.mulf %271, %273 : vector<8x128xf32>
    %275 = arith.addf %270, %274 : vector<8x128xf32>
    %c7_i32_200 = arith.constant 7 : i32
    %276 = tpu.dynamic_rotate %246 by %c7_i32_200 dim 0 : vector<8x128xf32>, i32 -> vector<8x128xf32>
    %c8_i32_201 = arith.constant 8 : i32
    %277 = tpu.dynamic_rotate %276 by %c8_i32_201 dim 1 : vector<8x128xf32>, i32 -> vector<8x128xf32>
    %c6_202 = arith.constant 6 : index
    %c0_203 = arith.constant 0 : index
    %c0_204 = arith.constant 0 : index
    %278 = vector.load %arg2[%c6_202, %c0_203, %c0_204] : memref<27x8x128xf32, #tpu.memory_space<vmem>>, vector<1x8x128xf32>
    %279 = vector.shape_cast %278 : vector<1x8x128xf32> to vector<8x128xf32>
    %280 = arith.mulf %277, %279 : vector<8x128xf32>
    %281 = arith.addf %275, %280 : vector<8x128xf32>
    %c7_205 = arith.constant 7 : index
    %c0_206 = arith.constant 0 : index
    %c0_207 = arith.constant 0 : index
    %282 = vector.load %arg2[%c7_205, %c0_206, %c0_207] : memref<27x8x128xf32, #tpu.memory_space<vmem>>, vector<1x8x128xf32>
    %283 = vector.shape_cast %282 : vector<1x8x128xf32> to vector<8x128xf32>
    %284 = arith.mulf %276, %283 : vector<8x128xf32>
    %285 = arith.addf %281, %284 : vector<8x128xf32>
    %c120_i32_208 = arith.constant 120 : i32
    %286 = tpu.dynamic_rotate %276 by %c120_i32_208 dim 1 : vector<8x128xf32>, i32 -> vector<8x128xf32>
    %c8_209 = arith.constant 8 : index
    %c0_210 = arith.constant 0 : index
    %c0_211 = arith.constant 0 : index
    %287 = vector.load %arg2[%c8_209, %c0_210, %c0_211] : memref<27x8x128xf32, #tpu.memory_space<vmem>>, vector<1x8x128xf32>
    %288 = vector.shape_cast %287 : vector<1x8x128xf32> to vector<8x128xf32>
    %289 = arith.mulf %286, %288 : vector<8x128xf32>
    %290 = arith.addf %285, %289 : vector<8x128xf32>
    %c1_i32_212 = arith.constant 1 : i32
    %291 = tpu.dynamic_rotate %241 by %c1_i32_212 dim 0 : vector<8x128xf32>, i32 -> vector<8x128xf32>
    %c8_i32_213 = arith.constant 8 : i32
    %292 = tpu.dynamic_rotate %291 by %c8_i32_213 dim 1 : vector<8x128xf32>, i32 -> vector<8x128xf32>
    %c9_214 = arith.constant 9 : index
    %c0_215 = arith.constant 0 : index
    %c0_216 = arith.constant 0 : index
    %293 = vector.load %arg2[%c9_214, %c0_215, %c0_216] : memref<27x8x128xf32, #tpu.memory_space<vmem>>, vector<1x8x128xf32>
    %294 = vector.shape_cast %293 : vector<1x8x128xf32> to vector<8x128xf32>
    %295 = arith.mulf %292, %294 : vector<8x128xf32>
    %296 = arith.addf %290, %295 : vector<8x128xf32>
    %c10_217 = arith.constant 10 : index
    %c0_218 = arith.constant 0 : index
    %c0_219 = arith.constant 0 : index
    %297 = vector.load %arg2[%c10_217, %c0_218, %c0_219] : memref<27x8x128xf32, #tpu.memory_space<vmem>>, vector<1x8x128xf32>
    %298 = vector.shape_cast %297 : vector<1x8x128xf32> to vector<8x128xf32>
    %299 = arith.mulf %291, %298 : vector<8x128xf32>
    %300 = arith.addf %296, %299 : vector<8x128xf32>
    %c120_i32_220 = arith.constant 120 : i32
    %301 = tpu.dynamic_rotate %291 by %c120_i32_220 dim 1 : vector<8x128xf32>, i32 -> vector<8x128xf32>
    %c11_221 = arith.constant 11 : index
    %c0_222 = arith.constant 0 : index
    %c0_223 = arith.constant 0 : index
    %302 = vector.load %arg2[%c11_221, %c0_222, %c0_223] : memref<27x8x128xf32, #tpu.memory_space<vmem>>, vector<1x8x128xf32>
    %303 = vector.shape_cast %302 : vector<1x8x128xf32> to vector<8x128xf32>
    %304 = arith.mulf %301, %303 : vector<8x128xf32>
    %305 = arith.addf %300, %304 : vector<8x128xf32>
    %c8_i32_224 = arith.constant 8 : i32
    %306 = tpu.dynamic_rotate %241 by %c8_i32_224 dim 1 : vector<8x128xf32>, i32 -> vector<8x128xf32>
    %c12_225 = arith.constant 12 : index
    %c0_226 = arith.constant 0 : index
    %c0_227 = arith.constant 0 : index
    %307 = vector.load %arg2[%c12_225, %c0_226, %c0_227] : memref<27x8x128xf32, #tpu.memory_space<vmem>>, vector<1x8x128xf32>
    %308 = vector.shape_cast %307 : vector<1x8x128xf32> to vector<8x128xf32>
    %309 = arith.mulf %306, %308 : vector<8x128xf32>
    %310 = arith.addf %305, %309 : vector<8x128xf32>
    %c120_i32_228 = arith.constant 120 : i32
    %311 = tpu.dynamic_rotate %241 by %c120_i32_228 dim 1 : vector<8x128xf32>, i32 -> vector<8x128xf32>
    %c14_229 = arith.constant 14 : index
    %c0_230 = arith.constant 0 : index
    %c0_231 = arith.constant 0 : index
    %312 = vector.load %arg2[%c14_229, %c0_230, %c0_231] : memref<27x8x128xf32, #tpu.memory_space<vmem>>, vector<1x8x128xf32>
    %313 = vector.shape_cast %312 : vector<1x8x128xf32> to vector<8x128xf32>
    %314 = arith.mulf %311, %313 : vector<8x128xf32>
    %315 = arith.addf %310, %314 : vector<8x128xf32>
    %c7_i32_232 = arith.constant 7 : i32
    %316 = tpu.dynamic_rotate %241 by %c7_i32_232 dim 0 : vector<8x128xf32>, i32 -> vector<8x128xf32>
    %c8_i32_233 = arith.constant 8 : i32
    %317 = tpu.dynamic_rotate %316 by %c8_i32_233 dim 1 : vector<8x128xf32>, i32 -> vector<8x128xf32>
    %c15_234 = arith.constant 15 : index
    %c0_235 = arith.constant 0 : index
    %c0_236 = arith.constant 0 : index
    %318 = vector.load %arg2[%c15_234, %c0_235, %c0_236] : memref<27x8x128xf32, #tpu.memory_space<vmem>>, vector<1x8x128xf32>
    %319 = vector.shape_cast %318 : vector<1x8x128xf32> to vector<8x128xf32>
    %320 = arith.mulf %317, %319 : vector<8x128xf32>
    %321 = arith.addf %315, %320 : vector<8x128xf32>
    %c16_237 = arith.constant 16 : index
    %c0_238 = arith.constant 0 : index
    %c0_239 = arith.constant 0 : index
    %322 = vector.load %arg2[%c16_237, %c0_238, %c0_239] : memref<27x8x128xf32, #tpu.memory_space<vmem>>, vector<1x8x128xf32>
    %323 = vector.shape_cast %322 : vector<1x8x128xf32> to vector<8x128xf32>
    %324 = arith.mulf %316, %323 : vector<8x128xf32>
    %325 = arith.addf %321, %324 : vector<8x128xf32>
    %c120_i32_240 = arith.constant 120 : i32
    %326 = tpu.dynamic_rotate %316 by %c120_i32_240 dim 1 : vector<8x128xf32>, i32 -> vector<8x128xf32>
    %c17_241 = arith.constant 17 : index
    %c0_242 = arith.constant 0 : index
    %c0_243 = arith.constant 0 : index
    %327 = vector.load %arg2[%c17_241, %c0_242, %c0_243] : memref<27x8x128xf32, #tpu.memory_space<vmem>>, vector<1x8x128xf32>
    %328 = vector.shape_cast %327 : vector<1x8x128xf32> to vector<8x128xf32>
    %329 = arith.mulf %326, %328 : vector<8x128xf32>
    %330 = arith.addf %325, %329 : vector<8x128xf32>
    %c0_244 = arith.constant 0 : index
    %c24_245 = arith.constant 24 : index
    %c0_246 = arith.constant 0 : index
    %331 = vector.load %arg1[%c0_244, %c24_245, %c0_246] : memref<1x64x128xf32, #tpu.memory_space<vmem>>, vector<1x8x128xf32>
    %332 = vector.shape_cast %331 : vector<1x8x128xf32> to vector<8x128xf32>
    %c1_i32_247 = arith.constant 1 : i32
    %333 = tpu.dynamic_rotate %332 by %c1_i32_247 dim 0 : vector<8x128xf32>, i32 -> vector<8x128xf32>
    %c8_i32_248 = arith.constant 8 : i32
    %334 = tpu.dynamic_rotate %333 by %c8_i32_248 dim 1 : vector<8x128xf32>, i32 -> vector<8x128xf32>
    %c18_249 = arith.constant 18 : index
    %c0_250 = arith.constant 0 : index
    %c0_251 = arith.constant 0 : index
    %335 = vector.load %arg2[%c18_249, %c0_250, %c0_251] : memref<27x8x128xf32, #tpu.memory_space<vmem>>, vector<1x8x128xf32>
    %336 = vector.shape_cast %335 : vector<1x8x128xf32> to vector<8x128xf32>
    %337 = arith.mulf %334, %336 : vector<8x128xf32>
    %338 = arith.addf %330, %337 : vector<8x128xf32>
    %c19_252 = arith.constant 19 : index
    %c0_253 = arith.constant 0 : index
    %c0_254 = arith.constant 0 : index
    %339 = vector.load %arg2[%c19_252, %c0_253, %c0_254] : memref<27x8x128xf32, #tpu.memory_space<vmem>>, vector<1x8x128xf32>
    %340 = vector.shape_cast %339 : vector<1x8x128xf32> to vector<8x128xf32>
    %341 = arith.mulf %333, %340 : vector<8x128xf32>
    %342 = arith.addf %338, %341 : vector<8x128xf32>
    %c120_i32_255 = arith.constant 120 : i32
    %343 = tpu.dynamic_rotate %333 by %c120_i32_255 dim 1 : vector<8x128xf32>, i32 -> vector<8x128xf32>
    %c20_256 = arith.constant 20 : index
    %c0_257 = arith.constant 0 : index
    %c0_258 = arith.constant 0 : index
    %344 = vector.load %arg2[%c20_256, %c0_257, %c0_258] : memref<27x8x128xf32, #tpu.memory_space<vmem>>, vector<1x8x128xf32>
    %345 = vector.shape_cast %344 : vector<1x8x128xf32> to vector<8x128xf32>
    %346 = arith.mulf %343, %345 : vector<8x128xf32>
    %347 = arith.addf %342, %346 : vector<8x128xf32>
    %c8_i32_259 = arith.constant 8 : i32
    %348 = tpu.dynamic_rotate %332 by %c8_i32_259 dim 1 : vector<8x128xf32>, i32 -> vector<8x128xf32>
    %c21_260 = arith.constant 21 : index
    %c0_261 = arith.constant 0 : index
    %c0_262 = arith.constant 0 : index
    %349 = vector.load %arg2[%c21_260, %c0_261, %c0_262] : memref<27x8x128xf32, #tpu.memory_space<vmem>>, vector<1x8x128xf32>
    %350 = vector.shape_cast %349 : vector<1x8x128xf32> to vector<8x128xf32>
    %351 = arith.mulf %348, %350 : vector<8x128xf32>
    %352 = arith.addf %347, %351 : vector<8x128xf32>
    %c22_263 = arith.constant 22 : index
    %c0_264 = arith.constant 0 : index
    %c0_265 = arith.constant 0 : index
    %353 = vector.load %arg2[%c22_263, %c0_264, %c0_265] : memref<27x8x128xf32, #tpu.memory_space<vmem>>, vector<1x8x128xf32>
    %354 = vector.shape_cast %353 : vector<1x8x128xf32> to vector<8x128xf32>
    %355 = arith.mulf %332, %354 : vector<8x128xf32>
    %356 = arith.addf %352, %355 : vector<8x128xf32>
    %c120_i32_266 = arith.constant 120 : i32
    %357 = tpu.dynamic_rotate %332 by %c120_i32_266 dim 1 : vector<8x128xf32>, i32 -> vector<8x128xf32>
    %c23_267 = arith.constant 23 : index
    %c0_268 = arith.constant 0 : index
    %c0_269 = arith.constant 0 : index
    %358 = vector.load %arg2[%c23_267, %c0_268, %c0_269] : memref<27x8x128xf32, #tpu.memory_space<vmem>>, vector<1x8x128xf32>
    %359 = vector.shape_cast %358 : vector<1x8x128xf32> to vector<8x128xf32>
    %360 = arith.mulf %357, %359 : vector<8x128xf32>
    %361 = arith.addf %356, %360 : vector<8x128xf32>
    %c7_i32_270 = arith.constant 7 : i32
    %362 = tpu.dynamic_rotate %332 by %c7_i32_270 dim 0 : vector<8x128xf32>, i32 -> vector<8x128xf32>
    %c8_i32_271 = arith.constant 8 : i32
    %363 = tpu.dynamic_rotate %362 by %c8_i32_271 dim 1 : vector<8x128xf32>, i32 -> vector<8x128xf32>
    %c24_272 = arith.constant 24 : index
    %c0_273 = arith.constant 0 : index
    %c0_274 = arith.constant 0 : index
    %364 = vector.load %arg2[%c24_272, %c0_273, %c0_274] : memref<27x8x128xf32, #tpu.memory_space<vmem>>, vector<1x8x128xf32>
    %365 = vector.shape_cast %364 : vector<1x8x128xf32> to vector<8x128xf32>
    %366 = arith.mulf %363, %365 : vector<8x128xf32>
    %367 = arith.addf %361, %366 : vector<8x128xf32>
    %c25_275 = arith.constant 25 : index
    %c0_276 = arith.constant 0 : index
    %c0_277 = arith.constant 0 : index
    %368 = vector.load %arg2[%c25_275, %c0_276, %c0_277] : memref<27x8x128xf32, #tpu.memory_space<vmem>>, vector<1x8x128xf32>
    %369 = vector.shape_cast %368 : vector<1x8x128xf32> to vector<8x128xf32>
    %370 = arith.mulf %362, %369 : vector<8x128xf32>
    %371 = arith.addf %367, %370 : vector<8x128xf32>
    %c120_i32_278 = arith.constant 120 : i32
    %372 = tpu.dynamic_rotate %362 by %c120_i32_278 dim 1 : vector<8x128xf32>, i32 -> vector<8x128xf32>
    %c26_279 = arith.constant 26 : index
    %c0_280 = arith.constant 0 : index
    %c0_281 = arith.constant 0 : index
    %373 = vector.load %arg2[%c26_279, %c0_280, %c0_281] : memref<27x8x128xf32, #tpu.memory_space<vmem>>, vector<1x8x128xf32>
    %374 = vector.shape_cast %373 : vector<1x8x128xf32> to vector<8x128xf32>
    %375 = arith.mulf %372, %374 : vector<8x128xf32>
    %376 = arith.addf %371, %375 : vector<8x128xf32>
    %c0_282 = arith.constant 0 : index
    %c0_283 = arith.constant 0 : index
    %377 = vector.load %arg3[%c0_282, %c0_283] : memref<1x128xf32, #tpu.memory_space<vmem>>, vector<1x128xf32>
    %378 = vector.broadcast %377 : vector<1x128xf32> to vector<8x128xf32>
    %379 = arith.addf %376, %378 : vector<8x128xf32>
    %cst_284 = arith.constant 0.000000e+00 : f32
    %380 = vector.broadcast %cst_284 : f32 to vector<8x128xf32>
    %381 = arith.maximumf %379, %380 : vector<8x128xf32>
    %c16_285 = arith.constant 16 : index
    %c0_286 = arith.constant 0 : index
    %382 = vector.load %arg7[%c16_285, %c0_286] : memref<64x128xf32, #tpu.memory_space<vmem>>, vector<8x128xf32>
    tpu.vector_store %arg7[%c16_285, %c0_286], %381 {strides = array<i32>} : memref<64x128xf32, #tpu.memory_space<vmem>>, vector<8x128xf32>,
    %c0_287 = arith.constant 0 : index
    %c24_288 = arith.constant 24 : index
    %c0_289 = arith.constant 0 : index
    %383 = vector.load %arg1[%c0_287, %c24_288, %c0_289] : memref<1x64x128xf32, #tpu.memory_space<vmem>>, vector<1x8x128xf32>
    %384 = vector.shape_cast %383 : vector<1x8x128xf32> to vector<8x128xf32>
    %c13_290 = arith.constant 13 : index
    %c0_291 = arith.constant 0 : index
    %c0_292 = arith.constant 0 : index
    %385 = vector.load %arg2[%c13_290, %c0_291, %c0_292] : memref<27x8x128xf32, #tpu.memory_space<vmem>>, vector<1x8x128xf32>
    %386 = vector.shape_cast %385 : vector<1x8x128xf32> to vector<8x128xf32>
    %387 = arith.mulf %384, %386 : vector<8x128xf32>
    %c0_293 = arith.constant 0 : index
    %c16_294 = arith.constant 16 : index
    %c0_295 = arith.constant 0 : index
    %388 = vector.load %arg1[%c0_293, %c16_294, %c0_295] : memref<1x64x128xf32, #tpu.memory_space<vmem>>, vector<1x8x128xf32>
    %389 = vector.shape_cast %388 : vector<1x8x128xf32> to vector<8x128xf32>
    %c1_i32_296 = arith.constant 1 : i32
    %390 = tpu.dynamic_rotate %389 by %c1_i32_296 dim 0 : vector<8x128xf32>, i32 -> vector<8x128xf32>
    %c8_i32_297 = arith.constant 8 : i32
    %391 = tpu.dynamic_rotate %390 by %c8_i32_297 dim 1 : vector<8x128xf32>, i32 -> vector<8x128xf32>
    %c0_298 = arith.constant 0 : index
    %c0_299 = arith.constant 0 : index
    %c0_300 = arith.constant 0 : index
    %392 = vector.load %arg2[%c0_298, %c0_299, %c0_300] : memref<27x8x128xf32, #tpu.memory_space<vmem>>, vector<1x8x128xf32>
    %393 = vector.shape_cast %392 : vector<1x8x128xf32> to vector<8x128xf32>
    %394 = arith.mulf %391, %393 : vector<8x128xf32>
    %395 = arith.addf %387, %394 : vector<8x128xf32>
    %c1_301 = arith.constant 1 : index
    %c0_302 = arith.constant 0 : index
    %c0_303 = arith.constant 0 : index
    %396 = vector.load %arg2[%c1_301, %c0_302, %c0_303] : memref<27x8x128xf32, #tpu.memory_space<vmem>>, vector<1x8x128xf32>
    %397 = vector.shape_cast %396 : vector<1x8x128xf32> to vector<8x128xf32>
    %398 = arith.mulf %390, %397 : vector<8x128xf32>
    %399 = arith.addf %395, %398 : vector<8x128xf32>
    %c120_i32_304 = arith.constant 120 : i32
    %400 = tpu.dynamic_rotate %390 by %c120_i32_304 dim 1 : vector<8x128xf32>, i32 -> vector<8x128xf32>
    %c2_305 = arith.constant 2 : index
    %c0_306 = arith.constant 0 : index
    %c0_307 = arith.constant 0 : index
    %401 = vector.load %arg2[%c2_305, %c0_306, %c0_307] : memref<27x8x128xf32, #tpu.memory_space<vmem>>, vector<1x8x128xf32>
    %402 = vector.shape_cast %401 : vector<1x8x128xf32> to vector<8x128xf32>
    %403 = arith.mulf %400, %402 : vector<8x128xf32>
    %404 = arith.addf %399, %403 : vector<8x128xf32>
    %c8_i32_308 = arith.constant 8 : i32
    %405 = tpu.dynamic_rotate %389 by %c8_i32_308 dim 1 : vector<8x128xf32>, i32 -> vector<8x128xf32>
    %c3_309 = arith.constant 3 : index
    %c0_310 = arith.constant 0 : index
    %c0_311 = arith.constant 0 : index
    %406 = vector.load %arg2[%c3_309, %c0_310, %c0_311] : memref<27x8x128xf32, #tpu.memory_space<vmem>>, vector<1x8x128xf32>
    %407 = vector.shape_cast %406 : vector<1x8x128xf32> to vector<8x128xf32>
    %408 = arith.mulf %405, %407 : vector<8x128xf32>
    %409 = arith.addf %404, %408 : vector<8x128xf32>
    %c4_312 = arith.constant 4 : index
    %c0_313 = arith.constant 0 : index
    %c0_314 = arith.constant 0 : index
    %410 = vector.load %arg2[%c4_312, %c0_313, %c0_314] : memref<27x8x128xf32, #tpu.memory_space<vmem>>, vector<1x8x128xf32>
    %411 = vector.shape_cast %410 : vector<1x8x128xf32> to vector<8x128xf32>
    %412 = arith.mulf %389, %411 : vector<8x128xf32>
    %413 = arith.addf %409, %412 : vector<8x128xf32>
    %c120_i32_315 = arith.constant 120 : i32
    %414 = tpu.dynamic_rotate %389 by %c120_i32_315 dim 1 : vector<8x128xf32>, i32 -> vector<8x128xf32>
    %c5_316 = arith.constant 5 : index
    %c0_317 = arith.constant 0 : index
    %c0_318 = arith.constant 0 : index
    %415 = vector.load %arg2[%c5_316, %c0_317, %c0_318] : memref<27x8x128xf32, #tpu.memory_space<vmem>>, vector<1x8x128xf32>
    %416 = vector.shape_cast %415 : vector<1x8x128xf32> to vector<8x128xf32>
    %417 = arith.mulf %414, %416 : vector<8x128xf32>
    %418 = arith.addf %413, %417 : vector<8x128xf32>
    %c7_i32_319 = arith.constant 7 : i32
    %419 = tpu.dynamic_rotate %389 by %c7_i32_319 dim 0 : vector<8x128xf32>, i32 -> vector<8x128xf32>
    %c8_i32_320 = arith.constant 8 : i32
    %420 = tpu.dynamic_rotate %419 by %c8_i32_320 dim 1 : vector<8x128xf32>, i32 -> vector<8x128xf32>
    %c6_321 = arith.constant 6 : index
    %c0_322 = arith.constant 0 : index
    %c0_323 = arith.constant 0 : index
    %421 = vector.load %arg2[%c6_321, %c0_322, %c0_323] : memref<27x8x128xf32, #tpu.memory_space<vmem>>, vector<1x8x128xf32>
    %422 = vector.shape_cast %421 : vector<1x8x128xf32> to vector<8x128xf32>
    %423 = arith.mulf %420, %422 : vector<8x128xf32>
    %424 = arith.addf %418, %423 : vector<8x128xf32>
    %c7_324 = arith.constant 7 : index
    %c0_325 = arith.constant 0 : index
    %c0_326 = arith.constant 0 : index
    %425 = vector.load %arg2[%c7_324, %c0_325, %c0_326] : memref<27x8x128xf32, #tpu.memory_space<vmem>>, vector<1x8x128xf32>
    %426 = vector.shape_cast %425 : vector<1x8x128xf32> to vector<8x128xf32>
    %427 = arith.mulf %419, %426 : vector<8x128xf32>
    %428 = arith.addf %424, %427 : vector<8x128xf32>
    %c120_i32_327 = arith.constant 120 : i32
    %429 = tpu.dynamic_rotate %419 by %c120_i32_327 dim 1 : vector<8x128xf32>, i32 -> vector<8x128xf32>
    %c8_328 = arith.constant 8 : index
    %c0_329 = arith.constant 0 : index
    %c0_330 = arith.constant 0 : index
    %430 = vector.load %arg2[%c8_328, %c0_329, %c0_330] : memref<27x8x128xf32, #tpu.memory_space<vmem>>, vector<1x8x128xf32>
    %431 = vector.shape_cast %430 : vector<1x8x128xf32> to vector<8x128xf32>
    %432 = arith.mulf %429, %431 : vector<8x128xf32>
    %433 = arith.addf %428, %432 : vector<8x128xf32>
    %c1_i32_331 = arith.constant 1 : i32
    %434 = tpu.dynamic_rotate %384 by %c1_i32_331 dim 0 : vector<8x128xf32>, i32 -> vector<8x128xf32>
    %c8_i32_332 = arith.constant 8 : i32
    %435 = tpu.dynamic_rotate %434 by %c8_i32_332 dim 1 : vector<8x128xf32>, i32 -> vector<8x128xf32>
    %c9_333 = arith.constant 9 : index
    %c0_334 = arith.constant 0 : index
    %c0_335 = arith.constant 0 : index
    %436 = vector.load %arg2[%c9_333, %c0_334, %c0_335] : memref<27x8x128xf32, #tpu.memory_space<vmem>>, vector<1x8x128xf32>
    %437 = vector.shape_cast %436 : vector<1x8x128xf32> to vector<8x128xf32>
    %438 = arith.mulf %435, %437 : vector<8x128xf32>
    %439 = arith.addf %433, %438 : vector<8x128xf32>
    %c10_336 = arith.constant 10 : index
    %c0_337 = arith.constant 0 : index
    %c0_338 = arith.constant 0 : index
    %440 = vector.load %arg2[%c10_336, %c0_337, %c0_338] : memref<27x8x128xf32, #tpu.memory_space<vmem>>, vector<1x8x128xf32>
    %441 = vector.shape_cast %440 : vector<1x8x128xf32> to vector<8x128xf32>
    %442 = arith.mulf %434, %441 : vector<8x128xf32>
    %443 = arith.addf %439, %442 : vector<8x128xf32>
    %c120_i32_339 = arith.constant 120 : i32
    %444 = tpu.dynamic_rotate %434 by %c120_i32_339 dim 1 : vector<8x128xf32>, i32 -> vector<8x128xf32>
    %c11_340 = arith.constant 11 : index
    %c0_341 = arith.constant 0 : index
    %c0_342 = arith.constant 0 : index
    %445 = vector.load %arg2[%c11_340, %c0_341, %c0_342] : memref<27x8x128xf32, #tpu.memory_space<vmem>>, vector<1x8x128xf32>
    %446 = vector.shape_cast %445 : vector<1x8x128xf32> to vector<8x128xf32>
    %447 = arith.mulf %444, %446 : vector<8x128xf32>
    %448 = arith.addf %443, %447 : vector<8x128xf32>
    %c8_i32_343 = arith.constant 8 : i32
    %449 = tpu.dynamic_rotate %384 by %c8_i32_343 dim 1 : vector<8x128xf32>, i32 -> vector<8x128xf32>
    %c12_344 = arith.constant 12 : index
    %c0_345 = arith.constant 0 : index
    %c0_346 = arith.constant 0 : index
    %450 = vector.load %arg2[%c12_344, %c0_345, %c0_346] : memref<27x8x128xf32, #tpu.memory_space<vmem>>, vector<1x8x128xf32>
    %451 = vector.shape_cast %450 : vector<1x8x128xf32> to vector<8x128xf32>
    %452 = arith.mulf %449, %451 : vector<8x128xf32>
    %453 = arith.addf %448, %452 : vector<8x128xf32>
    %c120_i32_347 = arith.constant 120 : i32
    %454 = tpu.dynamic_rotate %384 by %c120_i32_347 dim 1 : vector<8x128xf32>, i32 -> vector<8x128xf32>
    %c14_348 = arith.constant 14 : index
    %c0_349 = arith.constant 0 : index
    %c0_350 = arith.constant 0 : index
    %455 = vector.load %arg2[%c14_348, %c0_349, %c0_350] : memref<27x8x128xf32, #tpu.memory_space<vmem>>, vector<1x8x128xf32>
    %456 = vector.shape_cast %455 : vector<1x8x128xf32> to vector<8x128xf32>
    %457 = arith.mulf %454, %456 : vector<8x128xf32>
    %458 = arith.addf %453, %457 : vector<8x128xf32>
    %c7_i32_351 = arith.constant 7 : i32
    %459 = tpu.dynamic_rotate %384 by %c7_i32_351 dim 0 : vector<8x128xf32>, i32 -> vector<8x128xf32>
    %c8_i32_352 = arith.constant 8 : i32
    %460 = tpu.dynamic_rotate %459 by %c8_i32_352 dim 1 : vector<8x128xf32>, i32 -> vector<8x128xf32>
    %c15_353 = arith.constant 15 : index
    %c0_354 = arith.constant 0 : index
    %c0_355 = arith.constant 0 : index
    %461 = vector.load %arg2[%c15_353, %c0_354, %c0_355] : memref<27x8x128xf32, #tpu.memory_space<vmem>>, vector<1x8x128xf32>
    %462 = vector.shape_cast %461 : vector<1x8x128xf32> to vector<8x128xf32>
    %463 = arith.mulf %460, %462 : vector<8x128xf32>
    %464 = arith.addf %458, %463 : vector<8x128xf32>
    %c16_356 = arith.constant 16 : index
    %c0_357 = arith.constant 0 : index
    %c0_358 = arith.constant 0 : index
    %465 = vector.load %arg2[%c16_356, %c0_357, %c0_358] : memref<27x8x128xf32, #tpu.memory_space<vmem>>, vector<1x8x128xf32>
    %466 = vector.shape_cast %465 : vector<1x8x128xf32> to vector<8x128xf32>
    %467 = arith.mulf %459, %466 : vector<8x128xf32>
    %468 = arith.addf %464, %467 : vector<8x128xf32>
    %c120_i32_359 = arith.constant 120 : i32
    %469 = tpu.dynamic_rotate %459 by %c120_i32_359 dim 1 : vector<8x128xf32>, i32 -> vector<8x128xf32>
    %c17_360 = arith.constant 17 : index
    %c0_361 = arith.constant 0 : index
    %c0_362 = arith.constant 0 : index
    %470 = vector.load %arg2[%c17_360, %c0_361, %c0_362] : memref<27x8x128xf32, #tpu.memory_space<vmem>>, vector<1x8x128xf32>
    %471 = vector.shape_cast %470 : vector<1x8x128xf32> to vector<8x128xf32>
    %472 = arith.mulf %469, %471 : vector<8x128xf32>
    %473 = arith.addf %468, %472 : vector<8x128xf32>
    %c0_363 = arith.constant 0 : index
    %c32 = arith.constant 32 : index
    %c0_364 = arith.constant 0 : index
    %474 = vector.load %arg1[%c0_363, %c32, %c0_364] : memref<1x64x128xf32, #tpu.memory_space<vmem>>, vector<1x8x128xf32>
    %475 = vector.shape_cast %474 : vector<1x8x128xf32> to vector<8x128xf32>
    %c1_i32_365 = arith.constant 1 : i32
    %476 = tpu.dynamic_rotate %475 by %c1_i32_365 dim 0 : vector<8x128xf32>, i32 -> vector<8x128xf32>
    %c8_i32_366 = arith.constant 8 : i32
    %477 = tpu.dynamic_rotate %476 by %c8_i32_366 dim 1 : vector<8x128xf32>, i32 -> vector<8x128xf32>
    %c18_367 = arith.constant 18 : index
    %c0_368 = arith.constant 0 : index
    %c0_369 = arith.constant 0 : index
    %478 = vector.load %arg2[%c18_367, %c0_368, %c0_369] : memref<27x8x128xf32, #tpu.memory_space<vmem>>, vector<1x8x128xf32>
    %479 = vector.shape_cast %478 : vector<1x8x128xf32> to vector<8x128xf32>
    %480 = arith.mulf %477, %479 : vector<8x128xf32>
    %481 = arith.addf %473, %480 : vector<8x128xf32>
    %c19_370 = arith.constant 19 : index
    %c0_371 = arith.constant 0 : index
    %c0_372 = arith.constant 0 : index
    %482 = vector.load %arg2[%c19_370, %c0_371, %c0_372] : memref<27x8x128xf32, #tpu.memory_space<vmem>>, vector<1x8x128xf32>
    %483 = vector.shape_cast %482 : vector<1x8x128xf32> to vector<8x128xf32>
    %484 = arith.mulf %476, %483 : vector<8x128xf32>
    %485 = arith.addf %481, %484 : vector<8x128xf32>
    %c120_i32_373 = arith.constant 120 : i32
    %486 = tpu.dynamic_rotate %476 by %c120_i32_373 dim 1 : vector<8x128xf32>, i32 -> vector<8x128xf32>
    %c20_374 = arith.constant 20 : index
    %c0_375 = arith.constant 0 : index
    %c0_376 = arith.constant 0 : index
    %487 = vector.load %arg2[%c20_374, %c0_375, %c0_376] : memref<27x8x128xf32, #tpu.memory_space<vmem>>, vector<1x8x128xf32>
    %488 = vector.shape_cast %487 : vector<1x8x128xf32> to vector<8x128xf32>
    %489 = arith.mulf %486, %488 : vector<8x128xf32>
    %490 = arith.addf %485, %489 : vector<8x128xf32>
    %c8_i32_377 = arith.constant 8 : i32
    %491 = tpu.dynamic_rotate %475 by %c8_i32_377 dim 1 : vector<8x128xf32>, i32 -> vector<8x128xf32>
    %c21_378 = arith.constant 21 : index
    %c0_379 = arith.constant 0 : index
    %c0_380 = arith.constant 0 : index
    %492 = vector.load %arg2[%c21_378, %c0_379, %c0_380] : memref<27x8x128xf32, #tpu.memory_space<vmem>>, vector<1x8x128xf32>
    %493 = vector.shape_cast %492 : vector<1x8x128xf32> to vector<8x128xf32>
    %494 = arith.mulf %491, %493 : vector<8x128xf32>
    %495 = arith.addf %490, %494 : vector<8x128xf32>
    %c22_381 = arith.constant 22 : index
    %c0_382 = arith.constant 0 : index
    %c0_383 = arith.constant 0 : index
    %496 = vector.load %arg2[%c22_381, %c0_382, %c0_383] : memref<27x8x128xf32, #tpu.memory_space<vmem>>, vector<1x8x128xf32>
    %497 = vector.shape_cast %496 : vector<1x8x128xf32> to vector<8x128xf32>
    %498 = arith.mulf %475, %497 : vector<8x128xf32>
    %499 = arith.addf %495, %498 : vector<8x128xf32>
    %c120_i32_384 = arith.constant 120 : i32
    %500 = tpu.dynamic_rotate %475 by %c120_i32_384 dim 1 : vector<8x128xf32>, i32 -> vector<8x128xf32>
    %c23_385 = arith.constant 23 : index
    %c0_386 = arith.constant 0 : index
    %c0_387 = arith.constant 0 : index
    %501 = vector.load %arg2[%c23_385, %c0_386, %c0_387] : memref<27x8x128xf32, #tpu.memory_space<vmem>>, vector<1x8x128xf32>
    %502 = vector.shape_cast %501 : vector<1x8x128xf32> to vector<8x128xf32>
    %503 = arith.mulf %500, %502 : vector<8x128xf32>
    %504 = arith.addf %499, %503 : vector<8x128xf32>
    %c7_i32_388 = arith.constant 7 : i32
    %505 = tpu.dynamic_rotate %475 by %c7_i32_388 dim 0 : vector<8x128xf32>, i32 -> vector<8x128xf32>
    %c8_i32_389 = arith.constant 8 : i32
    %506 = tpu.dynamic_rotate %505 by %c8_i32_389 dim 1 : vector<8x128xf32>, i32 -> vector<8x128xf32>
    %c24_390 = arith.constant 24 : index
    %c0_391 = arith.constant 0 : index
    %c0_392 = arith.constant 0 : index
    %507 = vector.load %arg2[%c24_390, %c0_391, %c0_392] : memref<27x8x128xf32, #tpu.memory_space<vmem>>, vector<1x8x128xf32>
    %508 = vector.shape_cast %507 : vector<1x8x128xf32> to vector<8x128xf32>
    %509 = arith.mulf %506, %508 : vector<8x128xf32>
    %510 = arith.addf %504, %509 : vector<8x128xf32>
    %c25_393 = arith.constant 25 : index
    %c0_394 = arith.constant 0 : index
    %c0_395 = arith.constant 0 : index
    %511 = vector.load %arg2[%c25_393, %c0_394, %c0_395] : memref<27x8x128xf32, #tpu.memory_space<vmem>>, vector<1x8x128xf32>
    %512 = vector.shape_cast %511 : vector<1x8x128xf32> to vector<8x128xf32>
    %513 = arith.mulf %505, %512 : vector<8x128xf32>
    %514 = arith.addf %510, %513 : vector<8x128xf32>
    %c120_i32_396 = arith.constant 120 : i32
    %515 = tpu.dynamic_rotate %505 by %c120_i32_396 dim 1 : vector<8x128xf32>, i32 -> vector<8x128xf32>
    %c26_397 = arith.constant 26 : index
    %c0_398 = arith.constant 0 : index
    %c0_399 = arith.constant 0 : index
    %516 = vector.load %arg2[%c26_397, %c0_398, %c0_399] : memref<27x8x128xf32, #tpu.memory_space<vmem>>, vector<1x8x128xf32>
    %517 = vector.shape_cast %516 : vector<1x8x128xf32> to vector<8x128xf32>
    %518 = arith.mulf %515, %517 : vector<8x128xf32>
    %519 = arith.addf %514, %518 : vector<8x128xf32>
    %c0_400 = arith.constant 0 : index
    %c0_401 = arith.constant 0 : index
    %520 = vector.load %arg3[%c0_400, %c0_401] : memref<1x128xf32, #tpu.memory_space<vmem>>, vector<1x128xf32>
    %521 = vector.broadcast %520 : vector<1x128xf32> to vector<8x128xf32>
    %522 = arith.addf %519, %521 : vector<8x128xf32>
    %cst_402 = arith.constant 0.000000e+00 : f32
    %523 = vector.broadcast %cst_402 : f32 to vector<8x128xf32>
    %524 = arith.maximumf %522, %523 : vector<8x128xf32>
    %c24_403 = arith.constant 24 : index
    %c0_404 = arith.constant 0 : index
    %525 = vector.load %arg7[%c24_403, %c0_404] : memref<64x128xf32, #tpu.memory_space<vmem>>, vector<8x128xf32>
    tpu.vector_store %arg7[%c24_403, %c0_404], %524 {strides = array<i32>} : memref<64x128xf32, #tpu.memory_space<vmem>>, vector<8x128xf32>,
    %c0_405 = arith.constant 0 : index
    %c32_406 = arith.constant 32 : index
    %c0_407 = arith.constant 0 : index
    %526 = vector.load %arg1[%c0_405, %c32_406, %c0_407] : memref<1x64x128xf32, #tpu.memory_space<vmem>>, vector<1x8x128xf32>
    %527 = vector.shape_cast %526 : vector<1x8x128xf32> to vector<8x128xf32>
    %c13_408 = arith.constant 13 : index
    %c0_409 = arith.constant 0 : index
    %c0_410 = arith.constant 0 : index
    %528 = vector.load %arg2[%c13_408, %c0_409, %c0_410] : memref<27x8x128xf32, #tpu.memory_space<vmem>>, vector<1x8x128xf32>
    %529 = vector.shape_cast %528 : vector<1x8x128xf32> to vector<8x128xf32>
    %530 = arith.mulf %527, %529 : vector<8x128xf32>
    %c0_411 = arith.constant 0 : index
    %c24_412 = arith.constant 24 : index
    %c0_413 = arith.constant 0 : index
    %531 = vector.load %arg1[%c0_411, %c24_412, %c0_413] : memref<1x64x128xf32, #tpu.memory_space<vmem>>, vector<1x8x128xf32>
    %532 = vector.shape_cast %531 : vector<1x8x128xf32> to vector<8x128xf32>
    %c1_i32_414 = arith.constant 1 : i32
    %533 = tpu.dynamic_rotate %532 by %c1_i32_414 dim 0 : vector<8x128xf32>, i32 -> vector<8x128xf32>
    %c8_i32_415 = arith.constant 8 : i32
    %534 = tpu.dynamic_rotate %533 by %c8_i32_415 dim 1 : vector<8x128xf32>, i32 -> vector<8x128xf32>
    %c0_416 = arith.constant 0 : index
    %c0_417 = arith.constant 0 : index
    %c0_418 = arith.constant 0 : index
    %535 = vector.load %arg2[%c0_416, %c0_417, %c0_418] : memref<27x8x128xf32, #tpu.memory_space<vmem>>, vector<1x8x128xf32>
    %536 = vector.shape_cast %535 : vector<1x8x128xf32> to vector<8x128xf32>
    %537 = arith.mulf %534, %536 : vector<8x128xf32>
    %538 = arith.addf %530, %537 : vector<8x128xf32>
    %c1_419 = arith.constant 1 : index
    %c0_420 = arith.constant 0 : index
    %c0_421 = arith.constant 0 : index
    %539 = vector.load %arg2[%c1_419, %c0_420, %c0_421] : memref<27x8x128xf32, #tpu.memory_space<vmem>>, vector<1x8x128xf32>
    %540 = vector.shape_cast %539 : vector<1x8x128xf32> to vector<8x128xf32>
    %541 = arith.mulf %533, %540 : vector<8x128xf32>
    %542 = arith.addf %538, %541 : vector<8x128xf32>
    %c120_i32_422 = arith.constant 120 : i32
    %543 = tpu.dynamic_rotate %533 by %c120_i32_422 dim 1 : vector<8x128xf32>, i32 -> vector<8x128xf32>
    %c2_423 = arith.constant 2 : index
    %c0_424 = arith.constant 0 : index
    %c0_425 = arith.constant 0 : index
    %544 = vector.load %arg2[%c2_423, %c0_424, %c0_425] : memref<27x8x128xf32, #tpu.memory_space<vmem>>, vector<1x8x128xf32>
    %545 = vector.shape_cast %544 : vector<1x8x128xf32> to vector<8x128xf32>
    %546 = arith.mulf %543, %545 : vector<8x128xf32>
    %547 = arith.addf %542, %546 : vector<8x128xf32>
    %c8_i32_426 = arith.constant 8 : i32
    %548 = tpu.dynamic_rotate %532 by %c8_i32_426 dim 1 : vector<8x128xf32>, i32 -> vector<8x128xf32>
    %c3_427 = arith.constant 3 : index
    %c0_428 = arith.constant 0 : index
    %c0_429 = arith.constant 0 : index
    %549 = vector.load %arg2[%c3_427, %c0_428, %c0_429] : memref<27x8x128xf32, #tpu.memory_space<vmem>>, vector<1x8x128xf32>
    %550 = vector.shape_cast %549 : vector<1x8x128xf32> to vector<8x128xf32>
    %551 = arith.mulf %548, %550 : vector<8x128xf32>
    %552 = arith.addf %547, %551 : vector<8x128xf32>
    %c4_430 = arith.constant 4 : index
    %c0_431 = arith.constant 0 : index
    %c0_432 = arith.constant 0 : index
    %553 = vector.load %arg2[%c4_430, %c0_431, %c0_432] : memref<27x8x128xf32, #tpu.memory_space<vmem>>, vector<1x8x128xf32>
    %554 = vector.shape_cast %553 : vector<1x8x128xf32> to vector<8x128xf32>
    %555 = arith.mulf %532, %554 : vector<8x128xf32>
    %556 = arith.addf %552, %555 : vector<8x128xf32>
    %c120_i32_433 = arith.constant 120 : i32
    %557 = tpu.dynamic_rotate %532 by %c120_i32_433 dim 1 : vector<8x128xf32>, i32 -> vector<8x128xf32>
    %c5_434 = arith.constant 5 : index
    %c0_435 = arith.constant 0 : index
    %c0_436 = arith.constant 0 : index
    %558 = vector.load %arg2[%c5_434, %c0_435, %c0_436] : memref<27x8x128xf32, #tpu.memory_space<vmem>>, vector<1x8x128xf32>
    %559 = vector.shape_cast %558 : vector<1x8x128xf32> to vector<8x128xf32>
    %560 = arith.mulf %557, %559 : vector<8x128xf32>
    %561 = arith.addf %556, %560 : vector<8x128xf32>
    %c7_i32_437 = arith.constant 7 : i32
    %562 = tpu.dynamic_rotate %532 by %c7_i32_437 dim 0 : vector<8x128xf32>, i32 -> vector<8x128xf32>
    %c8_i32_438 = arith.constant 8 : i32
    %563 = tpu.dynamic_rotate %562 by %c8_i32_438 dim 1 : vector<8x128xf32>, i32 -> vector<8x128xf32>
    %c6_439 = arith.constant 6 : index
    %c0_440 = arith.constant 0 : index
    %c0_441 = arith.constant 0 : index
    %564 = vector.load %arg2[%c6_439, %c0_440, %c0_441] : memref<27x8x128xf32, #tpu.memory_space<vmem>>, vector<1x8x128xf32>
    %565 = vector.shape_cast %564 : vector<1x8x128xf32> to vector<8x128xf32>
    %566 = arith.mulf %563, %565 : vector<8x128xf32>
    %567 = arith.addf %561, %566 : vector<8x128xf32>
    %c7_442 = arith.constant 7 : index
    %c0_443 = arith.constant 0 : index
    %c0_444 = arith.constant 0 : index
    %568 = vector.load %arg2[%c7_442, %c0_443, %c0_444] : memref<27x8x128xf32, #tpu.memory_space<vmem>>, vector<1x8x128xf32>
    %569 = vector.shape_cast %568 : vector<1x8x128xf32> to vector<8x128xf32>
    %570 = arith.mulf %562, %569 : vector<8x128xf32>
    %571 = arith.addf %567, %570 : vector<8x128xf32>
    %c120_i32_445 = arith.constant 120 : i32
    %572 = tpu.dynamic_rotate %562 by %c120_i32_445 dim 1 : vector<8x128xf32>, i32 -> vector<8x128xf32>
    %c8_446 = arith.constant 8 : index
    %c0_447 = arith.constant 0 : index
    %c0_448 = arith.constant 0 : index
    %573 = vector.load %arg2[%c8_446, %c0_447, %c0_448] : memref<27x8x128xf32, #tpu.memory_space<vmem>>, vector<1x8x128xf32>
    %574 = vector.shape_cast %573 : vector<1x8x128xf32> to vector<8x128xf32>
    %575 = arith.mulf %572, %574 : vector<8x128xf32>
    %576 = arith.addf %571, %575 : vector<8x128xf32>
    %c1_i32_449 = arith.constant 1 : i32
    %577 = tpu.dynamic_rotate %527 by %c1_i32_449 dim 0 : vector<8x128xf32>, i32 -> vector<8x128xf32>
    %c8_i32_450 = arith.constant 8 : i32
    %578 = tpu.dynamic_rotate %577 by %c8_i32_450 dim 1 : vector<8x128xf32>, i32 -> vector<8x128xf32>
    %c9_451 = arith.constant 9 : index
    %c0_452 = arith.constant 0 : index
    %c0_453 = arith.constant 0 : index
    %579 = vector.load %arg2[%c9_451, %c0_452, %c0_453] : memref<27x8x128xf32, #tpu.memory_space<vmem>>, vector<1x8x128xf32>
    %580 = vector.shape_cast %579 : vector<1x8x128xf32> to vector<8x128xf32>
    %581 = arith.mulf %578, %580 : vector<8x128xf32>
    %582 = arith.addf %576, %581 : vector<8x128xf32>
    %c10_454 = arith.constant 10 : index
    %c0_455 = arith.constant 0 : index
    %c0_456 = arith.constant 0 : index
    %583 = vector.load %arg2[%c10_454, %c0_455, %c0_456] : memref<27x8x128xf32, #tpu.memory_space<vmem>>, vector<1x8x128xf32>
    %584 = vector.shape_cast %583 : vector<1x8x128xf32> to vector<8x128xf32>
    %585 = arith.mulf %577, %584 : vector<8x128xf32>
    %586 = arith.addf %582, %585 : vector<8x128xf32>
    %c120_i32_457 = arith.constant 120 : i32
    %587 = tpu.dynamic_rotate %577 by %c120_i32_457 dim 1 : vector<8x128xf32>, i32 -> vector<8x128xf32>
    %c11_458 = arith.constant 11 : index
    %c0_459 = arith.constant 0 : index
    %c0_460 = arith.constant 0 : index
    %588 = vector.load %arg2[%c11_458, %c0_459, %c0_460] : memref<27x8x128xf32, #tpu.memory_space<vmem>>, vector<1x8x128xf32>
    %589 = vector.shape_cast %588 : vector<1x8x128xf32> to vector<8x128xf32>
    %590 = arith.mulf %587, %589 : vector<8x128xf32>
    %591 = arith.addf %586, %590 : vector<8x128xf32>
    %c8_i32_461 = arith.constant 8 : i32
    %592 = tpu.dynamic_rotate %527 by %c8_i32_461 dim 1 : vector<8x128xf32>, i32 -> vector<8x128xf32>
    %c12_462 = arith.constant 12 : index
    %c0_463 = arith.constant 0 : index
    %c0_464 = arith.constant 0 : index
    %593 = vector.load %arg2[%c12_462, %c0_463, %c0_464] : memref<27x8x128xf32, #tpu.memory_space<vmem>>, vector<1x8x128xf32>
    %594 = vector.shape_cast %593 : vector<1x8x128xf32> to vector<8x128xf32>
    %595 = arith.mulf %592, %594 : vector<8x128xf32>
    %596 = arith.addf %591, %595 : vector<8x128xf32>
    %c120_i32_465 = arith.constant 120 : i32
    %597 = tpu.dynamic_rotate %527 by %c120_i32_465 dim 1 : vector<8x128xf32>, i32 -> vector<8x128xf32>
    %c14_466 = arith.constant 14 : index
    %c0_467 = arith.constant 0 : index
    %c0_468 = arith.constant 0 : index
    %598 = vector.load %arg2[%c14_466, %c0_467, %c0_468] : memref<27x8x128xf32, #tpu.memory_space<vmem>>, vector<1x8x128xf32>
    %599 = vector.shape_cast %598 : vector<1x8x128xf32> to vector<8x128xf32>
    %600 = arith.mulf %597, %599 : vector<8x128xf32>
    %601 = arith.addf %596, %600 : vector<8x128xf32>
    %c7_i32_469 = arith.constant 7 : i32
    %602 = tpu.dynamic_rotate %527 by %c7_i32_469 dim 0 : vector<8x128xf32>, i32 -> vector<8x128xf32>
    %c8_i32_470 = arith.constant 8 : i32
    %603 = tpu.dynamic_rotate %602 by %c8_i32_470 dim 1 : vector<8x128xf32>, i32 -> vector<8x128xf32>
    %c15_471 = arith.constant 15 : index
    %c0_472 = arith.constant 0 : index
    %c0_473 = arith.constant 0 : index
    %604 = vector.load %arg2[%c15_471, %c0_472, %c0_473] : memref<27x8x128xf32, #tpu.memory_space<vmem>>, vector<1x8x128xf32>
    %605 = vector.shape_cast %604 : vector<1x8x128xf32> to vector<8x128xf32>
    %606 = arith.mulf %603, %605 : vector<8x128xf32>
    %607 = arith.addf %601, %606 : vector<8x128xf32>
    %c16_474 = arith.constant 16 : index
    %c0_475 = arith.constant 0 : index
    %c0_476 = arith.constant 0 : index
    %608 = vector.load %arg2[%c16_474, %c0_475, %c0_476] : memref<27x8x128xf32, #tpu.memory_space<vmem>>, vector<1x8x128xf32>
    %609 = vector.shape_cast %608 : vector<1x8x128xf32> to vector<8x128xf32>
    %610 = arith.mulf %602, %609 : vector<8x128xf32>
    %611 = arith.addf %607, %610 : vector<8x128xf32>
    %c120_i32_477 = arith.constant 120 : i32
    %612 = tpu.dynamic_rotate %602 by %c120_i32_477 dim 1 : vector<8x128xf32>, i32 -> vector<8x128xf32>
    %c17_478 = arith.constant 17 : index
    %c0_479 = arith.constant 0 : index
    %c0_480 = arith.constant 0 : index
    %613 = vector.load %arg2[%c17_478, %c0_479, %c0_480] : memref<27x8x128xf32, #tpu.memory_space<vmem>>, vector<1x8x128xf32>
    %614 = vector.shape_cast %613 : vector<1x8x128xf32> to vector<8x128xf32>
    %615 = arith.mulf %612, %614 : vector<8x128xf32>
    %616 = arith.addf %611, %615 : vector<8x128xf32>
    %c0_481 = arith.constant 0 : index
    %c40 = arith.constant 40 : index
    %c0_482 = arith.constant 0 : index
    %617 = vector.load %arg1[%c0_481, %c40, %c0_482] : memref<1x64x128xf32, #tpu.memory_space<vmem>>, vector<1x8x128xf32>
    %618 = vector.shape_cast %617 : vector<1x8x128xf32> to vector<8x128xf32>
    %c1_i32_483 = arith.constant 1 : i32
    %619 = tpu.dynamic_rotate %618 by %c1_i32_483 dim 0 : vector<8x128xf32>, i32 -> vector<8x128xf32>
    %c8_i32_484 = arith.constant 8 : i32
    %620 = tpu.dynamic_rotate %619 by %c8_i32_484 dim 1 : vector<8x128xf32>, i32 -> vector<8x128xf32>
    %c18_485 = arith.constant 18 : index
    %c0_486 = arith.constant 0 : index
    %c0_487 = arith.constant 0 : index
    %621 = vector.load %arg2[%c18_485, %c0_486, %c0_487] : memref<27x8x128xf32, #tpu.memory_space<vmem>>, vector<1x8x128xf32>
    %622 = vector.shape_cast %621 : vector<1x8x128xf32> to vector<8x128xf32>
    %623 = arith.mulf %620, %622 : vector<8x128xf32>
    %624 = arith.addf %616, %623 : vector<8x128xf32>
    %c19_488 = arith.constant 19 : index
    %c0_489 = arith.constant 0 : index
    %c0_490 = arith.constant 0 : index
    %625 = vector.load %arg2[%c19_488, %c0_489, %c0_490] : memref<27x8x128xf32, #tpu.memory_space<vmem>>, vector<1x8x128xf32>
    %626 = vector.shape_cast %625 : vector<1x8x128xf32> to vector<8x128xf32>
    %627 = arith.mulf %619, %626 : vector<8x128xf32>
    %628 = arith.addf %624, %627 : vector<8x128xf32>
    %c120_i32_491 = arith.constant 120 : i32
    %629 = tpu.dynamic_rotate %619 by %c120_i32_491 dim 1 : vector<8x128xf32>, i32 -> vector<8x128xf32>
    %c20_492 = arith.constant 20 : index
    %c0_493 = arith.constant 0 : index
    %c0_494 = arith.constant 0 : index
    %630 = vector.load %arg2[%c20_492, %c0_493, %c0_494] : memref<27x8x128xf32, #tpu.memory_space<vmem>>, vector<1x8x128xf32>
    %631 = vector.shape_cast %630 : vector<1x8x128xf32> to vector<8x128xf32>
    %632 = arith.mulf %629, %631 : vector<8x128xf32>
    %633 = arith.addf %628, %632 : vector<8x128xf32>
    %c8_i32_495 = arith.constant 8 : i32
    %634 = tpu.dynamic_rotate %618 by %c8_i32_495 dim 1 : vector<8x128xf32>, i32 -> vector<8x128xf32>
    %c21_496 = arith.constant 21 : index
    %c0_497 = arith.constant 0 : index
    %c0_498 = arith.constant 0 : index
    %635 = vector.load %arg2[%c21_496, %c0_497, %c0_498] : memref<27x8x128xf32, #tpu.memory_space<vmem>>, vector<1x8x128xf32>
    %636 = vector.shape_cast %635 : vector<1x8x128xf32> to vector<8x128xf32>
    %637 = arith.mulf %634, %636 : vector<8x128xf32>
    %638 = arith.addf %633, %637 : vector<8x128xf32>
    %c22_499 = arith.constant 22 : index
    %c0_500 = arith.constant 0 : index
    %c0_501 = arith.constant 0 : index
    %639 = vector.load %arg2[%c22_499, %c0_500, %c0_501] : memref<27x8x128xf32, #tpu.memory_space<vmem>>, vector<1x8x128xf32>
    %640 = vector.shape_cast %639 : vector<1x8x128xf32> to vector<8x128xf32>
    %641 = arith.mulf %618, %640 : vector<8x128xf32>
    %642 = arith.addf %638, %641 : vector<8x128xf32>
    %c120_i32_502 = arith.constant 120 : i32
    %643 = tpu.dynamic_rotate %618 by %c120_i32_502 dim 1 : vector<8x128xf32>, i32 -> vector<8x128xf32>
    %c23_503 = arith.constant 23 : index
    %c0_504 = arith.constant 0 : index
    %c0_505 = arith.constant 0 : index
    %644 = vector.load %arg2[%c23_503, %c0_504, %c0_505] : memref<27x8x128xf32, #tpu.memory_space<vmem>>, vector<1x8x128xf32>
    %645 = vector.shape_cast %644 : vector<1x8x128xf32> to vector<8x128xf32>
    %646 = arith.mulf %643, %645 : vector<8x128xf32>
    %647 = arith.addf %642, %646 : vector<8x128xf32>
    %c7_i32_506 = arith.constant 7 : i32
    %648 = tpu.dynamic_rotate %618 by %c7_i32_506 dim 0 : vector<8x128xf32>, i32 -> vector<8x128xf32>
    %c8_i32_507 = arith.constant 8 : i32
    %649 = tpu.dynamic_rotate %648 by %c8_i32_507 dim 1 : vector<8x128xf32>, i32 -> vector<8x128xf32>
    %c24_508 = arith.constant 24 : index
    %c0_509 = arith.constant 0 : index
    %c0_510 = arith.constant 0 : index
    %650 = vector.load %arg2[%c24_508, %c0_509, %c0_510] : memref<27x8x128xf32, #tpu.memory_space<vmem>>, vector<1x8x128xf32>
    %651 = vector.shape_cast %650 : vector<1x8x128xf32> to vector<8x128xf32>
    %652 = arith.mulf %649, %651 : vector<8x128xf32>
    %653 = arith.addf %647, %652 : vector<8x128xf32>
    %c25_511 = arith.constant 25 : index
    %c0_512 = arith.constant 0 : index
    %c0_513 = arith.constant 0 : index
    %654 = vector.load %arg2[%c25_511, %c0_512, %c0_513] : memref<27x8x128xf32, #tpu.memory_space<vmem>>, vector<1x8x128xf32>
    %655 = vector.shape_cast %654 : vector<1x8x128xf32> to vector<8x128xf32>
    %656 = arith.mulf %648, %655 : vector<8x128xf32>
    %657 = arith.addf %653, %656 : vector<8x128xf32>
    %c120_i32_514 = arith.constant 120 : i32
    %658 = tpu.dynamic_rotate %648 by %c120_i32_514 dim 1 : vector<8x128xf32>, i32 -> vector<8x128xf32>
    %c26_515 = arith.constant 26 : index
    %c0_516 = arith.constant 0 : index
    %c0_517 = arith.constant 0 : index
    %659 = vector.load %arg2[%c26_515, %c0_516, %c0_517] : memref<27x8x128xf32, #tpu.memory_space<vmem>>, vector<1x8x128xf32>
    %660 = vector.shape_cast %659 : vector<1x8x128xf32> to vector<8x128xf32>
    %661 = arith.mulf %658, %660 : vector<8x128xf32>
    %662 = arith.addf %657, %661 : vector<8x128xf32>
    %c0_518 = arith.constant 0 : index
    %c0_519 = arith.constant 0 : index
    %663 = vector.load %arg3[%c0_518, %c0_519] : memref<1x128xf32, #tpu.memory_space<vmem>>, vector<1x128xf32>
    %664 = vector.broadcast %663 : vector<1x128xf32> to vector<8x128xf32>
    %665 = arith.addf %662, %664 : vector<8x128xf32>
    %cst_520 = arith.constant 0.000000e+00 : f32
    %666 = vector.broadcast %cst_520 : f32 to vector<8x128xf32>
    %667 = arith.maximumf %665, %666 : vector<8x128xf32>
    %c32_521 = arith.constant 32 : index
    %c0_522 = arith.constant 0 : index
    %668 = vector.load %arg7[%c32_521, %c0_522] : memref<64x128xf32, #tpu.memory_space<vmem>>, vector<8x128xf32>
    tpu.vector_store %arg7[%c32_521, %c0_522], %667 {strides = array<i32>} : memref<64x128xf32, #tpu.memory_space<vmem>>, vector<8x128xf32>,
    %c0_523 = arith.constant 0 : index
    %c40_524 = arith.constant 40 : index
    %c0_525 = arith.constant 0 : index
    %669 = vector.load %arg1[%c0_523, %c40_524, %c0_525] : memref<1x64x128xf32, #tpu.memory_space<vmem>>, vector<1x8x128xf32>
    %670 = vector.shape_cast %669 : vector<1x8x128xf32> to vector<8x128xf32>
    %c13_526 = arith.constant 13 : index
    %c0_527 = arith.constant 0 : index
    %c0_528 = arith.constant 0 : index
    %671 = vector.load %arg2[%c13_526, %c0_527, %c0_528] : memref<27x8x128xf32, #tpu.memory_space<vmem>>, vector<1x8x128xf32>
    %672 = vector.shape_cast %671 : vector<1x8x128xf32> to vector<8x128xf32>
    %673 = arith.mulf %670, %672 : vector<8x128xf32>
    %c0_529 = arith.constant 0 : index
    %c32_530 = arith.constant 32 : index
    %c0_531 = arith.constant 0 : index
    %674 = vector.load %arg1[%c0_529, %c32_530, %c0_531] : memref<1x64x128xf32, #tpu.memory_space<vmem>>, vector<1x8x128xf32>
    %675 = vector.shape_cast %674 : vector<1x8x128xf32> to vector<8x128xf32>
    %c1_i32_532 = arith.constant 1 : i32
    %676 = tpu.dynamic_rotate %675 by %c1_i32_532 dim 0 : vector<8x128xf32>, i32 -> vector<8x128xf32>
    %c8_i32_533 = arith.constant 8 : i32
    %677 = tpu.dynamic_rotate %676 by %c8_i32_533 dim 1 : vector<8x128xf32>, i32 -> vector<8x128xf32>
    %c0_534 = arith.constant 0 : index
    %c0_535 = arith.constant 0 : index
    %c0_536 = arith.constant 0 : index
    %678 = vector.load %arg2[%c0_534, %c0_535, %c0_536] : memref<27x8x128xf32, #tpu.memory_space<vmem>>, vector<1x8x128xf32>
    %679 = vector.shape_cast %678 : vector<1x8x128xf32> to vector<8x128xf32>
    %680 = arith.mulf %677, %679 : vector<8x128xf32>
    %681 = arith.addf %673, %680 : vector<8x128xf32>
    %c1_537 = arith.constant 1 : index
    %c0_538 = arith.constant 0 : index
    %c0_539 = arith.constant 0 : index
    %682 = vector.load %arg2[%c1_537, %c0_538, %c0_539] : memref<27x8x128xf32, #tpu.memory_space<vmem>>, vector<1x8x128xf32>
    %683 = vector.shape_cast %682 : vector<1x8x128xf32> to vector<8x128xf32>
    %684 = arith.mulf %676, %683 : vector<8x128xf32>
    %685 = arith.addf %681, %684 : vector<8x128xf32>
    %c120_i32_540 = arith.constant 120 : i32
    %686 = tpu.dynamic_rotate %676 by %c120_i32_540 dim 1 : vector<8x128xf32>, i32 -> vector<8x128xf32>
    %c2_541 = arith.constant 2 : index
    %c0_542 = arith.constant 0 : index
    %c0_543 = arith.constant 0 : index
    %687 = vector.load %arg2[%c2_541, %c0_542, %c0_543] : memref<27x8x128xf32, #tpu.memory_space<vmem>>, vector<1x8x128xf32>
    %688 = vector.shape_cast %687 : vector<1x8x128xf32> to vector<8x128xf32>
    %689 = arith.mulf %686, %688 : vector<8x128xf32>
    %690 = arith.addf %685, %689 : vector<8x128xf32>
    %c8_i32_544 = arith.constant 8 : i32
    %691 = tpu.dynamic_rotate %675 by %c8_i32_544 dim 1 : vector<8x128xf32>, i32 -> vector<8x128xf32>
    %c3_545 = arith.constant 3 : index
    %c0_546 = arith.constant 0 : index
    %c0_547 = arith.constant 0 : index
    %692 = vector.load %arg2[%c3_545, %c0_546, %c0_547] : memref<27x8x128xf32, #tpu.memory_space<vmem>>, vector<1x8x128xf32>
    %693 = vector.shape_cast %692 : vector<1x8x128xf32> to vector<8x128xf32>
    %694 = arith.mulf %691, %693 : vector<8x128xf32>
    %695 = arith.addf %690, %694 : vector<8x128xf32>
    %c4_548 = arith.constant 4 : index
    %c0_549 = arith.constant 0 : index
    %c0_550 = arith.constant 0 : index
    %696 = vector.load %arg2[%c4_548, %c0_549, %c0_550] : memref<27x8x128xf32, #tpu.memory_space<vmem>>, vector<1x8x128xf32>
    %697 = vector.shape_cast %696 : vector<1x8x128xf32> to vector<8x128xf32>
    %698 = arith.mulf %675, %697 : vector<8x128xf32>
    %699 = arith.addf %695, %698 : vector<8x128xf32>
    %c120_i32_551 = arith.constant 120 : i32
    %700 = tpu.dynamic_rotate %675 by %c120_i32_551 dim 1 : vector<8x128xf32>, i32 -> vector<8x128xf32>
    %c5_552 = arith.constant 5 : index
    %c0_553 = arith.constant 0 : index
    %c0_554 = arith.constant 0 : index
    %701 = vector.load %arg2[%c5_552, %c0_553, %c0_554] : memref<27x8x128xf32, #tpu.memory_space<vmem>>, vector<1x8x128xf32>
    %702 = vector.shape_cast %701 : vector<1x8x128xf32> to vector<8x128xf32>
    %703 = arith.mulf %700, %702 : vector<8x128xf32>
    %704 = arith.addf %699, %703 : vector<8x128xf32>
    %c7_i32_555 = arith.constant 7 : i32
    %705 = tpu.dynamic_rotate %675 by %c7_i32_555 dim 0 : vector<8x128xf32>, i32 -> vector<8x128xf32>
    %c8_i32_556 = arith.constant 8 : i32
    %706 = tpu.dynamic_rotate %705 by %c8_i32_556 dim 1 : vector<8x128xf32>, i32 -> vector<8x128xf32>
    %c6_557 = arith.constant 6 : index
    %c0_558 = arith.constant 0 : index
    %c0_559 = arith.constant 0 : index
    %707 = vector.load %arg2[%c6_557, %c0_558, %c0_559] : memref<27x8x128xf32, #tpu.memory_space<vmem>>, vector<1x8x128xf32>
    %708 = vector.shape_cast %707 : vector<1x8x128xf32> to vector<8x128xf32>
    %709 = arith.mulf %706, %708 : vector<8x128xf32>
    %710 = arith.addf %704, %709 : vector<8x128xf32>
    %c7_560 = arith.constant 7 : index
    %c0_561 = arith.constant 0 : index
    %c0_562 = arith.constant 0 : index
    %711 = vector.load %arg2[%c7_560, %c0_561, %c0_562] : memref<27x8x128xf32, #tpu.memory_space<vmem>>, vector<1x8x128xf32>
    %712 = vector.shape_cast %711 : vector<1x8x128xf32> to vector<8x128xf32>
    %713 = arith.mulf %705, %712 : vector<8x128xf32>
    %714 = arith.addf %710, %713 : vector<8x128xf32>
    %c120_i32_563 = arith.constant 120 : i32
    %715 = tpu.dynamic_rotate %705 by %c120_i32_563 dim 1 : vector<8x128xf32>, i32 -> vector<8x128xf32>
    %c8_564 = arith.constant 8 : index
    %c0_565 = arith.constant 0 : index
    %c0_566 = arith.constant 0 : index
    %716 = vector.load %arg2[%c8_564, %c0_565, %c0_566] : memref<27x8x128xf32, #tpu.memory_space<vmem>>, vector<1x8x128xf32>
    %717 = vector.shape_cast %716 : vector<1x8x128xf32> to vector<8x128xf32>
    %718 = arith.mulf %715, %717 : vector<8x128xf32>
    %719 = arith.addf %714, %718 : vector<8x128xf32>
    %c1_i32_567 = arith.constant 1 : i32
    %720 = tpu.dynamic_rotate %670 by %c1_i32_567 dim 0 : vector<8x128xf32>, i32 -> vector<8x128xf32>
    %c8_i32_568 = arith.constant 8 : i32
    %721 = tpu.dynamic_rotate %720 by %c8_i32_568 dim 1 : vector<8x128xf32>, i32 -> vector<8x128xf32>
    %c9_569 = arith.constant 9 : index
    %c0_570 = arith.constant 0 : index
    %c0_571 = arith.constant 0 : index
    %722 = vector.load %arg2[%c9_569, %c0_570, %c0_571] : memref<27x8x128xf32, #tpu.memory_space<vmem>>, vector<1x8x128xf32>
    %723 = vector.shape_cast %722 : vector<1x8x128xf32> to vector<8x128xf32>
    %724 = arith.mulf %721, %723 : vector<8x128xf32>
    %725 = arith.addf %719, %724 : vector<8x128xf32>
    %c10_572 = arith.constant 10 : index
    %c0_573 = arith.constant 0 : index
    %c0_574 = arith.constant 0 : index
    %726 = vector.load %arg2[%c10_572, %c0_573, %c0_574] : memref<27x8x128xf32, #tpu.memory_space<vmem>>, vector<1x8x128xf32>
    %727 = vector.shape_cast %726 : vector<1x8x128xf32> to vector<8x128xf32>
    %728 = arith.mulf %720, %727 : vector<8x128xf32>
    %729 = arith.addf %725, %728 : vector<8x128xf32>
    %c120_i32_575 = arith.constant 120 : i32
    %730 = tpu.dynamic_rotate %720 by %c120_i32_575 dim 1 : vector<8x128xf32>, i32 -> vector<8x128xf32>
    %c11_576 = arith.constant 11 : index
    %c0_577 = arith.constant 0 : index
    %c0_578 = arith.constant 0 : index
    %731 = vector.load %arg2[%c11_576, %c0_577, %c0_578] : memref<27x8x128xf32, #tpu.memory_space<vmem>>, vector<1x8x128xf32>
    %732 = vector.shape_cast %731 : vector<1x8x128xf32> to vector<8x128xf32>
    %733 = arith.mulf %730, %732 : vector<8x128xf32>
    %734 = arith.addf %729, %733 : vector<8x128xf32>
    %c8_i32_579 = arith.constant 8 : i32
    %735 = tpu.dynamic_rotate %670 by %c8_i32_579 dim 1 : vector<8x128xf32>, i32 -> vector<8x128xf32>
    %c12_580 = arith.constant 12 : index
    %c0_581 = arith.constant 0 : index
    %c0_582 = arith.constant 0 : index
    %736 = vector.load %arg2[%c12_580, %c0_581, %c0_582] : memref<27x8x128xf32, #tpu.memory_space<vmem>>, vector<1x8x128xf32>
    %737 = vector.shape_cast %736 : vector<1x8x128xf32> to vector<8x128xf32>
    %738 = arith.mulf %735, %737 : vector<8x128xf32>
    %739 = arith.addf %734, %738 : vector<8x128xf32>
    %c120_i32_583 = arith.constant 120 : i32
    %740 = tpu.dynamic_rotate %670 by %c120_i32_583 dim 1 : vector<8x128xf32>, i32 -> vector<8x128xf32>
    %c14_584 = arith.constant 14 : index
    %c0_585 = arith.constant 0 : index
    %c0_586 = arith.constant 0 : index
    %741 = vector.load %arg2[%c14_584, %c0_585, %c0_586] : memref<27x8x128xf32, #tpu.memory_space<vmem>>, vector<1x8x128xf32>
    %742 = vector.shape_cast %741 : vector<1x8x128xf32> to vector<8x128xf32>
    %743 = arith.mulf %740, %742 : vector<8x128xf32>
    %744 = arith.addf %739, %743 : vector<8x128xf32>
    %c7_i32_587 = arith.constant 7 : i32
    %745 = tpu.dynamic_rotate %670 by %c7_i32_587 dim 0 : vector<8x128xf32>, i32 -> vector<8x128xf32>
    %c8_i32_588 = arith.constant 8 : i32
    %746 = tpu.dynamic_rotate %745 by %c8_i32_588 dim 1 : vector<8x128xf32>, i32 -> vector<8x128xf32>
    %c15_589 = arith.constant 15 : index
    %c0_590 = arith.constant 0 : index
    %c0_591 = arith.constant 0 : index
    %747 = vector.load %arg2[%c15_589, %c0_590, %c0_591] : memref<27x8x128xf32, #tpu.memory_space<vmem>>, vector<1x8x128xf32>
    %748 = vector.shape_cast %747 : vector<1x8x128xf32> to vector<8x128xf32>
    %749 = arith.mulf %746, %748 : vector<8x128xf32>
    %750 = arith.addf %744, %749 : vector<8x128xf32>
    %c16_592 = arith.constant 16 : index
    %c0_593 = arith.constant 0 : index
    %c0_594 = arith.constant 0 : index
    %751 = vector.load %arg2[%c16_592, %c0_593, %c0_594] : memref<27x8x128xf32, #tpu.memory_space<vmem>>, vector<1x8x128xf32>
    %752 = vector.shape_cast %751 : vector<1x8x128xf32> to vector<8x128xf32>
    %753 = arith.mulf %745, %752 : vector<8x128xf32>
    %754 = arith.addf %750, %753 : vector<8x128xf32>
    %c120_i32_595 = arith.constant 120 : i32
    %755 = tpu.dynamic_rotate %745 by %c120_i32_595 dim 1 : vector<8x128xf32>, i32 -> vector<8x128xf32>
    %c17_596 = arith.constant 17 : index
    %c0_597 = arith.constant 0 : index
    %c0_598 = arith.constant 0 : index
    %756 = vector.load %arg2[%c17_596, %c0_597, %c0_598] : memref<27x8x128xf32, #tpu.memory_space<vmem>>, vector<1x8x128xf32>
    %757 = vector.shape_cast %756 : vector<1x8x128xf32> to vector<8x128xf32>
    %758 = arith.mulf %755, %757 : vector<8x128xf32>
    %759 = arith.addf %754, %758 : vector<8x128xf32>
    %c0_599 = arith.constant 0 : index
    %c48 = arith.constant 48 : index
    %c0_600 = arith.constant 0 : index
    %760 = vector.load %arg1[%c0_599, %c48, %c0_600] : memref<1x64x128xf32, #tpu.memory_space<vmem>>, vector<1x8x128xf32>
    %761 = vector.shape_cast %760 : vector<1x8x128xf32> to vector<8x128xf32>
    %c1_i32_601 = arith.constant 1 : i32
    %762 = tpu.dynamic_rotate %761 by %c1_i32_601 dim 0 : vector<8x128xf32>, i32 -> vector<8x128xf32>
    %c8_i32_602 = arith.constant 8 : i32
    %763 = tpu.dynamic_rotate %762 by %c8_i32_602 dim 1 : vector<8x128xf32>, i32 -> vector<8x128xf32>
    %c18_603 = arith.constant 18 : index
    %c0_604 = arith.constant 0 : index
    %c0_605 = arith.constant 0 : index
    %764 = vector.load %arg2[%c18_603, %c0_604, %c0_605] : memref<27x8x128xf32, #tpu.memory_space<vmem>>, vector<1x8x128xf32>
    %765 = vector.shape_cast %764 : vector<1x8x128xf32> to vector<8x128xf32>
    %766 = arith.mulf %763, %765 : vector<8x128xf32>
    %767 = arith.addf %759, %766 : vector<8x128xf32>
    %c19_606 = arith.constant 19 : index
    %c0_607 = arith.constant 0 : index
    %c0_608 = arith.constant 0 : index
    %768 = vector.load %arg2[%c19_606, %c0_607, %c0_608] : memref<27x8x128xf32, #tpu.memory_space<vmem>>, vector<1x8x128xf32>
    %769 = vector.shape_cast %768 : vector<1x8x128xf32> to vector<8x128xf32>
    %770 = arith.mulf %762, %769 : vector<8x128xf32>
    %771 = arith.addf %767, %770 : vector<8x128xf32>
    %c120_i32_609 = arith.constant 120 : i32
    %772 = tpu.dynamic_rotate %762 by %c120_i32_609 dim 1 : vector<8x128xf32>, i32 -> vector<8x128xf32>
    %c20_610 = arith.constant 20 : index
    %c0_611 = arith.constant 0 : index
    %c0_612 = arith.constant 0 : index
    %773 = vector.load %arg2[%c20_610, %c0_611, %c0_612] : memref<27x8x128xf32, #tpu.memory_space<vmem>>, vector<1x8x128xf32>
    %774 = vector.shape_cast %773 : vector<1x8x128xf32> to vector<8x128xf32>
    %775 = arith.mulf %772, %774 : vector<8x128xf32>
    %776 = arith.addf %771, %775 : vector<8x128xf32>
    %c8_i32_613 = arith.constant 8 : i32
    %777 = tpu.dynamic_rotate %761 by %c8_i32_613 dim 1 : vector<8x128xf32>, i32 -> vector<8x128xf32>
    %c21_614 = arith.constant 21 : index
    %c0_615 = arith.constant 0 : index
    %c0_616 = arith.constant 0 : index
    %778 = vector.load %arg2[%c21_614, %c0_615, %c0_616] : memref<27x8x128xf32, #tpu.memory_space<vmem>>, vector<1x8x128xf32>
    %779 = vector.shape_cast %778 : vector<1x8x128xf32> to vector<8x128xf32>
    %780 = arith.mulf %777, %779 : vector<8x128xf32>
    %781 = arith.addf %776, %780 : vector<8x128xf32>
    %c22_617 = arith.constant 22 : index
    %c0_618 = arith.constant 0 : index
    %c0_619 = arith.constant 0 : index
    %782 = vector.load %arg2[%c22_617, %c0_618, %c0_619] : memref<27x8x128xf32, #tpu.memory_space<vmem>>, vector<1x8x128xf32>
    %783 = vector.shape_cast %782 : vector<1x8x128xf32> to vector<8x128xf32>
    %784 = arith.mulf %761, %783 : vector<8x128xf32>
    %785 = arith.addf %781, %784 : vector<8x128xf32>
    %c120_i32_620 = arith.constant 120 : i32
    %786 = tpu.dynamic_rotate %761 by %c120_i32_620 dim 1 : vector<8x128xf32>, i32 -> vector<8x128xf32>
    %c23_621 = arith.constant 23 : index
    %c0_622 = arith.constant 0 : index
    %c0_623 = arith.constant 0 : index
    %787 = vector.load %arg2[%c23_621, %c0_622, %c0_623] : memref<27x8x128xf32, #tpu.memory_space<vmem>>, vector<1x8x128xf32>
    %788 = vector.shape_cast %787 : vector<1x8x128xf32> to vector<8x128xf32>
    %789 = arith.mulf %786, %788 : vector<8x128xf32>
    %790 = arith.addf %785, %789 : vector<8x128xf32>
    %c7_i32_624 = arith.constant 7 : i32
    %791 = tpu.dynamic_rotate %761 by %c7_i32_624 dim 0 : vector<8x128xf32>, i32 -> vector<8x128xf32>
    %c8_i32_625 = arith.constant 8 : i32
    %792 = tpu.dynamic_rotate %791 by %c8_i32_625 dim 1 : vector<8x128xf32>, i32 -> vector<8x128xf32>
    %c24_626 = arith.constant 24 : index
    %c0_627 = arith.constant 0 : index
    %c0_628 = arith.constant 0 : index
    %793 = vector.load %arg2[%c24_626, %c0_627, %c0_628] : memref<27x8x128xf32, #tpu.memory_space<vmem>>, vector<1x8x128xf32>
    %794 = vector.shape_cast %793 : vector<1x8x128xf32> to vector<8x128xf32>
    %795 = arith.mulf %792, %794 : vector<8x128xf32>
    %796 = arith.addf %790, %795 : vector<8x128xf32>
    %c25_629 = arith.constant 25 : index
    %c0_630 = arith.constant 0 : index
    %c0_631 = arith.constant 0 : index
    %797 = vector.load %arg2[%c25_629, %c0_630, %c0_631] : memref<27x8x128xf32, #tpu.memory_space<vmem>>, vector<1x8x128xf32>
    %798 = vector.shape_cast %797 : vector<1x8x128xf32> to vector<8x128xf32>
    %799 = arith.mulf %791, %798 : vector<8x128xf32>
    %800 = arith.addf %796, %799 : vector<8x128xf32>
    %c120_i32_632 = arith.constant 120 : i32
    %801 = tpu.dynamic_rotate %791 by %c120_i32_632 dim 1 : vector<8x128xf32>, i32 -> vector<8x128xf32>
    %c26_633 = arith.constant 26 : index
    %c0_634 = arith.constant 0 : index
    %c0_635 = arith.constant 0 : index
    %802 = vector.load %arg2[%c26_633, %c0_634, %c0_635] : memref<27x8x128xf32, #tpu.memory_space<vmem>>, vector<1x8x128xf32>
    %803 = vector.shape_cast %802 : vector<1x8x128xf32> to vector<8x128xf32>
    %804 = arith.mulf %801, %803 : vector<8x128xf32>
    %805 = arith.addf %800, %804 : vector<8x128xf32>
    %c0_636 = arith.constant 0 : index
    %c0_637 = arith.constant 0 : index
    %806 = vector.load %arg3[%c0_636, %c0_637] : memref<1x128xf32, #tpu.memory_space<vmem>>, vector<1x128xf32>
    %807 = vector.broadcast %806 : vector<1x128xf32> to vector<8x128xf32>
    %808 = arith.addf %805, %807 : vector<8x128xf32>
    %cst_638 = arith.constant 0.000000e+00 : f32
    %809 = vector.broadcast %cst_638 : f32 to vector<8x128xf32>
    %810 = arith.maximumf %808, %809 : vector<8x128xf32>
    %c40_639 = arith.constant 40 : index
    %c0_640 = arith.constant 0 : index
    %811 = vector.load %arg7[%c40_639, %c0_640] : memref<64x128xf32, #tpu.memory_space<vmem>>, vector<8x128xf32>
    tpu.vector_store %arg7[%c40_639, %c0_640], %810 {strides = array<i32>} : memref<64x128xf32, #tpu.memory_space<vmem>>, vector<8x128xf32>,
    %c0_641 = arith.constant 0 : index
    %c48_642 = arith.constant 48 : index
    %c0_643 = arith.constant 0 : index
    %812 = vector.load %arg1[%c0_641, %c48_642, %c0_643] : memref<1x64x128xf32, #tpu.memory_space<vmem>>, vector<1x8x128xf32>
    %813 = vector.shape_cast %812 : vector<1x8x128xf32> to vector<8x128xf32>
    %c13_644 = arith.constant 13 : index
    %c0_645 = arith.constant 0 : index
    %c0_646 = arith.constant 0 : index
    %814 = vector.load %arg2[%c13_644, %c0_645, %c0_646] : memref<27x8x128xf32, #tpu.memory_space<vmem>>, vector<1x8x128xf32>
    %815 = vector.shape_cast %814 : vector<1x8x128xf32> to vector<8x128xf32>
    %816 = arith.mulf %813, %815 : vector<8x128xf32>
    %c0_647 = arith.constant 0 : index
    %c40_648 = arith.constant 40 : index
    %c0_649 = arith.constant 0 : index
    %817 = vector.load %arg1[%c0_647, %c40_648, %c0_649] : memref<1x64x128xf32, #tpu.memory_space<vmem>>, vector<1x8x128xf32>
    %818 = vector.shape_cast %817 : vector<1x8x128xf32> to vector<8x128xf32>
    %c1_i32_650 = arith.constant 1 : i32
    %819 = tpu.dynamic_rotate %818 by %c1_i32_650 dim 0 : vector<8x128xf32>, i32 -> vector<8x128xf32>
    %c8_i32_651 = arith.constant 8 : i32
    %820 = tpu.dynamic_rotate %819 by %c8_i32_651 dim 1 : vector<8x128xf32>, i32 -> vector<8x128xf32>
    %c0_652 = arith.constant 0 : index
    %c0_653 = arith.constant 0 : index
    %c0_654 = arith.constant 0 : index
    %821 = vector.load %arg2[%c0_652, %c0_653, %c0_654] : memref<27x8x128xf32, #tpu.memory_space<vmem>>, vector<1x8x128xf32>
    %822 = vector.shape_cast %821 : vector<1x8x128xf32> to vector<8x128xf32>
    %823 = arith.mulf %820, %822 : vector<8x128xf32>
    %824 = arith.addf %816, %823 : vector<8x128xf32>
    %c1_655 = arith.constant 1 : index
    %c0_656 = arith.constant 0 : index
    %c0_657 = arith.constant 0 : index
    %825 = vector.load %arg2[%c1_655, %c0_656, %c0_657] : memref<27x8x128xf32, #tpu.memory_space<vmem>>, vector<1x8x128xf32>
    %826 = vector.shape_cast %825 : vector<1x8x128xf32> to vector<8x128xf32>
    %827 = arith.mulf %819, %826 : vector<8x128xf32>
    %828 = arith.addf %824, %827 : vector<8x128xf32>
    %c120_i32_658 = arith.constant 120 : i32
    %829 = tpu.dynamic_rotate %819 by %c120_i32_658 dim 1 : vector<8x128xf32>, i32 -> vector<8x128xf32>
    %c2_659 = arith.constant 2 : index
    %c0_660 = arith.constant 0 : index
    %c0_661 = arith.constant 0 : index
    %830 = vector.load %arg2[%c2_659, %c0_660, %c0_661] : memref<27x8x128xf32, #tpu.memory_space<vmem>>, vector<1x8x128xf32>
    %831 = vector.shape_cast %830 : vector<1x8x128xf32> to vector<8x128xf32>
    %832 = arith.mulf %829, %831 : vector<8x128xf32>
    %833 = arith.addf %828, %832 : vector<8x128xf32>
    %c8_i32_662 = arith.constant 8 : i32
    %834 = tpu.dynamic_rotate %818 by %c8_i32_662 dim 1 : vector<8x128xf32>, i32 -> vector<8x128xf32>
    %c3_663 = arith.constant 3 : index
    %c0_664 = arith.constant 0 : index
    %c0_665 = arith.constant 0 : index
    %835 = vector.load %arg2[%c3_663, %c0_664, %c0_665] : memref<27x8x128xf32, #tpu.memory_space<vmem>>, vector<1x8x128xf32>
    %836 = vector.shape_cast %835 : vector<1x8x128xf32> to vector<8x128xf32>
    %837 = arith.mulf %834, %836 : vector<8x128xf32>
    %838 = arith.addf %833, %837 : vector<8x128xf32>
    %c4_666 = arith.constant 4 : index
    %c0_667 = arith.constant 0 : index
    %c0_668 = arith.constant 0 : index
    %839 = vector.load %arg2[%c4_666, %c0_667, %c0_668] : memref<27x8x128xf32, #tpu.memory_space<vmem>>, vector<1x8x128xf32>
    %840 = vector.shape_cast %839 : vector<1x8x128xf32> to vector<8x128xf32>
    %841 = arith.mulf %818, %840 : vector<8x128xf32>
    %842 = arith.addf %838, %841 : vector<8x128xf32>
    %c120_i32_669 = arith.constant 120 : i32
    %843 = tpu.dynamic_rotate %818 by %c120_i32_669 dim 1 : vector<8x128xf32>, i32 -> vector<8x128xf32>
    %c5_670 = arith.constant 5 : index
    %c0_671 = arith.constant 0 : index
    %c0_672 = arith.constant 0 : index
    %844 = vector.load %arg2[%c5_670, %c0_671, %c0_672] : memref<27x8x128xf32, #tpu.memory_space<vmem>>, vector<1x8x128xf32>
    %845 = vector.shape_cast %844 : vector<1x8x128xf32> to vector<8x128xf32>
    %846 = arith.mulf %843, %845 : vector<8x128xf32>
    %847 = arith.addf %842, %846 : vector<8x128xf32>
    %c7_i32_673 = arith.constant 7 : i32
    %848 = tpu.dynamic_rotate %818 by %c7_i32_673 dim 0 : vector<8x128xf32>, i32 -> vector<8x128xf32>
    %c8_i32_674 = arith.constant 8 : i32
    %849 = tpu.dynamic_rotate %848 by %c8_i32_674 dim 1 : vector<8x128xf32>, i32 -> vector<8x128xf32>
    %c6_675 = arith.constant 6 : index
    %c0_676 = arith.constant 0 : index
    %c0_677 = arith.constant 0 : index
    %850 = vector.load %arg2[%c6_675, %c0_676, %c0_677] : memref<27x8x128xf32, #tpu.memory_space<vmem>>, vector<1x8x128xf32>
    %851 = vector.shape_cast %850 : vector<1x8x128xf32> to vector<8x128xf32>
    %852 = arith.mulf %849, %851 : vector<8x128xf32>
    %853 = arith.addf %847, %852 : vector<8x128xf32>
    %c7_678 = arith.constant 7 : index
    %c0_679 = arith.constant 0 : index
    %c0_680 = arith.constant 0 : index
    %854 = vector.load %arg2[%c7_678, %c0_679, %c0_680] : memref<27x8x128xf32, #tpu.memory_space<vmem>>, vector<1x8x128xf32>
    %855 = vector.shape_cast %854 : vector<1x8x128xf32> to vector<8x128xf32>
    %856 = arith.mulf %848, %855 : vector<8x128xf32>
    %857 = arith.addf %853, %856 : vector<8x128xf32>
    %c120_i32_681 = arith.constant 120 : i32
    %858 = tpu.dynamic_rotate %848 by %c120_i32_681 dim 1 : vector<8x128xf32>, i32 -> vector<8x128xf32>
    %c8_682 = arith.constant 8 : index
    %c0_683 = arith.constant 0 : index
    %c0_684 = arith.constant 0 : index
    %859 = vector.load %arg2[%c8_682, %c0_683, %c0_684] : memref<27x8x128xf32, #tpu.memory_space<vmem>>, vector<1x8x128xf32>
    %860 = vector.shape_cast %859 : vector<1x8x128xf32> to vector<8x128xf32>
    %861 = arith.mulf %858, %860 : vector<8x128xf32>
    %862 = arith.addf %857, %861 : vector<8x128xf32>
    %c1_i32_685 = arith.constant 1 : i32
    %863 = tpu.dynamic_rotate %813 by %c1_i32_685 dim 0 : vector<8x128xf32>, i32 -> vector<8x128xf32>
    %c8_i32_686 = arith.constant 8 : i32
    %864 = tpu.dynamic_rotate %863 by %c8_i32_686 dim 1 : vector<8x128xf32>, i32 -> vector<8x128xf32>
    %c9_687 = arith.constant 9 : index
    %c0_688 = arith.constant 0 : index
    %c0_689 = arith.constant 0 : index
    %865 = vector.load %arg2[%c9_687, %c0_688, %c0_689] : memref<27x8x128xf32, #tpu.memory_space<vmem>>, vector<1x8x128xf32>
    %866 = vector.shape_cast %865 : vector<1x8x128xf32> to vector<8x128xf32>
    %867 = arith.mulf %864, %866 : vector<8x128xf32>
    %868 = arith.addf %862, %867 : vector<8x128xf32>
    %c10_690 = arith.constant 10 : index
    %c0_691 = arith.constant 0 : index
    %c0_692 = arith.constant 0 : index
    %869 = vector.load %arg2[%c10_690, %c0_691, %c0_692] : memref<27x8x128xf32, #tpu.memory_space<vmem>>, vector<1x8x128xf32>
    %870 = vector.shape_cast %869 : vector<1x8x128xf32> to vector<8x128xf32>
    %871 = arith.mulf %863, %870 : vector<8x128xf32>
    %872 = arith.addf %868, %871 : vector<8x128xf32>
    %c120_i32_693 = arith.constant 120 : i32
    %873 = tpu.dynamic_rotate %863 by %c120_i32_693 dim 1 : vector<8x128xf32>, i32 -> vector<8x128xf32>
    %c11_694 = arith.constant 11 : index
    %c0_695 = arith.constant 0 : index
    %c0_696 = arith.constant 0 : index
    %874 = vector.load %arg2[%c11_694, %c0_695, %c0_696] : memref<27x8x128xf32, #tpu.memory_space<vmem>>, vector<1x8x128xf32>
    %875 = vector.shape_cast %874 : vector<1x8x128xf32> to vector<8x128xf32>
    %876 = arith.mulf %873, %875 : vector<8x128xf32>
    %877 = arith.addf %872, %876 : vector<8x128xf32>
    %c8_i32_697 = arith.constant 8 : i32
    %878 = tpu.dynamic_rotate %813 by %c8_i32_697 dim 1 : vector<8x128xf32>, i32 -> vector<8x128xf32>
    %c12_698 = arith.constant 12 : index
    %c0_699 = arith.constant 0 : index
    %c0_700 = arith.constant 0 : index
    %879 = vector.load %arg2[%c12_698, %c0_699, %c0_700] : memref<27x8x128xf32, #tpu.memory_space<vmem>>, vector<1x8x128xf32>
    %880 = vector.shape_cast %879 : vector<1x8x128xf32> to vector<8x128xf32>
    %881 = arith.mulf %878, %880 : vector<8x128xf32>
    %882 = arith.addf %877, %881 : vector<8x128xf32>
    %c120_i32_701 = arith.constant 120 : i32
    %883 = tpu.dynamic_rotate %813 by %c120_i32_701 dim 1 : vector<8x128xf32>, i32 -> vector<8x128xf32>
    %c14_702 = arith.constant 14 : index
    %c0_703 = arith.constant 0 : index
    %c0_704 = arith.constant 0 : index
    %884 = vector.load %arg2[%c14_702, %c0_703, %c0_704] : memref<27x8x128xf32, #tpu.memory_space<vmem>>, vector<1x8x128xf32>
    %885 = vector.shape_cast %884 : vector<1x8x128xf32> to vector<8x128xf32>
    %886 = arith.mulf %883, %885 : vector<8x128xf32>
    %887 = arith.addf %882, %886 : vector<8x128xf32>
    %c7_i32_705 = arith.constant 7 : i32
    %888 = tpu.dynamic_rotate %813 by %c7_i32_705 dim 0 : vector<8x128xf32>, i32 -> vector<8x128xf32>
    %c8_i32_706 = arith.constant 8 : i32
    %889 = tpu.dynamic_rotate %888 by %c8_i32_706 dim 1 : vector<8x128xf32>, i32 -> vector<8x128xf32>
    %c15_707 = arith.constant 15 : index
    %c0_708 = arith.constant 0 : index
    %c0_709 = arith.constant 0 : index
    %890 = vector.load %arg2[%c15_707, %c0_708, %c0_709] : memref<27x8x128xf32, #tpu.memory_space<vmem>>, vector<1x8x128xf32>
    %891 = vector.shape_cast %890 : vector<1x8x128xf32> to vector<8x128xf32>
    %892 = arith.mulf %889, %891 : vector<8x128xf32>
    %893 = arith.addf %887, %892 : vector<8x128xf32>
    %c16_710 = arith.constant 16 : index
    %c0_711 = arith.constant 0 : index
    %c0_712 = arith.constant 0 : index
    %894 = vector.load %arg2[%c16_710, %c0_711, %c0_712] : memref<27x8x128xf32, #tpu.memory_space<vmem>>, vector<1x8x128xf32>
    %895 = vector.shape_cast %894 : vector<1x8x128xf32> to vector<8x128xf32>
    %896 = arith.mulf %888, %895 : vector<8x128xf32>
    %897 = arith.addf %893, %896 : vector<8x128xf32>
    %c120_i32_713 = arith.constant 120 : i32
    %898 = tpu.dynamic_rotate %888 by %c120_i32_713 dim 1 : vector<8x128xf32>, i32 -> vector<8x128xf32>
    %c17_714 = arith.constant 17 : index
    %c0_715 = arith.constant 0 : index
    %c0_716 = arith.constant 0 : index
    %899 = vector.load %arg2[%c17_714, %c0_715, %c0_716] : memref<27x8x128xf32, #tpu.memory_space<vmem>>, vector<1x8x128xf32>
    %900 = vector.shape_cast %899 : vector<1x8x128xf32> to vector<8x128xf32>
    %901 = arith.mulf %898, %900 : vector<8x128xf32>
    %902 = arith.addf %897, %901 : vector<8x128xf32>
    %c0_717 = arith.constant 0 : index
    %c56 = arith.constant 56 : index
    %c0_718 = arith.constant 0 : index
    %903 = vector.load %arg1[%c0_717, %c56, %c0_718] : memref<1x64x128xf32, #tpu.memory_space<vmem>>, vector<1x8x128xf32>
    %904 = vector.shape_cast %903 : vector<1x8x128xf32> to vector<8x128xf32>
    %c1_i32_719 = arith.constant 1 : i32
    %905 = tpu.dynamic_rotate %904 by %c1_i32_719 dim 0 : vector<8x128xf32>, i32 -> vector<8x128xf32>
    %c8_i32_720 = arith.constant 8 : i32
    %906 = tpu.dynamic_rotate %905 by %c8_i32_720 dim 1 : vector<8x128xf32>, i32 -> vector<8x128xf32>
    %c18_721 = arith.constant 18 : index
    %c0_722 = arith.constant 0 : index
    %c0_723 = arith.constant 0 : index
    %907 = vector.load %arg2[%c18_721, %c0_722, %c0_723] : memref<27x8x128xf32, #tpu.memory_space<vmem>>, vector<1x8x128xf32>
    %908 = vector.shape_cast %907 : vector<1x8x128xf32> to vector<8x128xf32>
    %909 = arith.mulf %906, %908 : vector<8x128xf32>
    %910 = arith.addf %902, %909 : vector<8x128xf32>
    %c19_724 = arith.constant 19 : index
    %c0_725 = arith.constant 0 : index
    %c0_726 = arith.constant 0 : index
    %911 = vector.load %arg2[%c19_724, %c0_725, %c0_726] : memref<27x8x128xf32, #tpu.memory_space<vmem>>, vector<1x8x128xf32>
    %912 = vector.shape_cast %911 : vector<1x8x128xf32> to vector<8x128xf32>
    %913 = arith.mulf %905, %912 : vector<8x128xf32>
    %914 = arith.addf %910, %913 : vector<8x128xf32>
    %c120_i32_727 = arith.constant 120 : i32
    %915 = tpu.dynamic_rotate %905 by %c120_i32_727 dim 1 : vector<8x128xf32>, i32 -> vector<8x128xf32>
    %c20_728 = arith.constant 20 : index
    %c0_729 = arith.constant 0 : index
    %c0_730 = arith.constant 0 : index
    %916 = vector.load %arg2[%c20_728, %c0_729, %c0_730] : memref<27x8x128xf32, #tpu.memory_space<vmem>>, vector<1x8x128xf32>
    %917 = vector.shape_cast %916 : vector<1x8x128xf32> to vector<8x128xf32>
    %918 = arith.mulf %915, %917 : vector<8x128xf32>
    %919 = arith.addf %914, %918 : vector<8x128xf32>
    %c8_i32_731 = arith.constant 8 : i32
    %920 = tpu.dynamic_rotate %904 by %c8_i32_731 dim 1 : vector<8x128xf32>, i32 -> vector<8x128xf32>
    %c21_732 = arith.constant 21 : index
    %c0_733 = arith.constant 0 : index
    %c0_734 = arith.constant 0 : index
    %921 = vector.load %arg2[%c21_732, %c0_733, %c0_734] : memref<27x8x128xf32, #tpu.memory_space<vmem>>, vector<1x8x128xf32>
    %922 = vector.shape_cast %921 : vector<1x8x128xf32> to vector<8x128xf32>
    %923 = arith.mulf %920, %922 : vector<8x128xf32>
    %924 = arith.addf %919, %923 : vector<8x128xf32>
    %c22_735 = arith.constant 22 : index
    %c0_736 = arith.constant 0 : index
    %c0_737 = arith.constant 0 : index
    %925 = vector.load %arg2[%c22_735, %c0_736, %c0_737] : memref<27x8x128xf32, #tpu.memory_space<vmem>>, vector<1x8x128xf32>
    %926 = vector.shape_cast %925 : vector<1x8x128xf32> to vector<8x128xf32>
    %927 = arith.mulf %904, %926 : vector<8x128xf32>
    %928 = arith.addf %924, %927 : vector<8x128xf32>
    %c120_i32_738 = arith.constant 120 : i32
    %929 = tpu.dynamic_rotate %904 by %c120_i32_738 dim 1 : vector<8x128xf32>, i32 -> vector<8x128xf32>
    %c23_739 = arith.constant 23 : index
    %c0_740 = arith.constant 0 : index
    %c0_741 = arith.constant 0 : index
    %930 = vector.load %arg2[%c23_739, %c0_740, %c0_741] : memref<27x8x128xf32, #tpu.memory_space<vmem>>, vector<1x8x128xf32>
    %931 = vector.shape_cast %930 : vector<1x8x128xf32> to vector<8x128xf32>
    %932 = arith.mulf %929, %931 : vector<8x128xf32>
    %933 = arith.addf %928, %932 : vector<8x128xf32>
    %c7_i32_742 = arith.constant 7 : i32
    %934 = tpu.dynamic_rotate %904 by %c7_i32_742 dim 0 : vector<8x128xf32>, i32 -> vector<8x128xf32>
    %c8_i32_743 = arith.constant 8 : i32
    %935 = tpu.dynamic_rotate %934 by %c8_i32_743 dim 1 : vector<8x128xf32>, i32 -> vector<8x128xf32>
    %c24_744 = arith.constant 24 : index
    %c0_745 = arith.constant 0 : index
    %c0_746 = arith.constant 0 : index
    %936 = vector.load %arg2[%c24_744, %c0_745, %c0_746] : memref<27x8x128xf32, #tpu.memory_space<vmem>>, vector<1x8x128xf32>
    %937 = vector.shape_cast %936 : vector<1x8x128xf32> to vector<8x128xf32>
    %938 = arith.mulf %935, %937 : vector<8x128xf32>
    %939 = arith.addf %933, %938 : vector<8x128xf32>
    %c25_747 = arith.constant 25 : index
    %c0_748 = arith.constant 0 : index
    %c0_749 = arith.constant 0 : index
    %940 = vector.load %arg2[%c25_747, %c0_748, %c0_749] : memref<27x8x128xf32, #tpu.memory_space<vmem>>, vector<1x8x128xf32>
    %941 = vector.shape_cast %940 : vector<1x8x128xf32> to vector<8x128xf32>
    %942 = arith.mulf %934, %941 : vector<8x128xf32>
    %943 = arith.addf %939, %942 : vector<8x128xf32>
    %c120_i32_750 = arith.constant 120 : i32
    %944 = tpu.dynamic_rotate %934 by %c120_i32_750 dim 1 : vector<8x128xf32>, i32 -> vector<8x128xf32>
    %c26_751 = arith.constant 26 : index
    %c0_752 = arith.constant 0 : index
    %c0_753 = arith.constant 0 : index
    %945 = vector.load %arg2[%c26_751, %c0_752, %c0_753] : memref<27x8x128xf32, #tpu.memory_space<vmem>>, vector<1x8x128xf32>
    %946 = vector.shape_cast %945 : vector<1x8x128xf32> to vector<8x128xf32>
    %947 = arith.mulf %944, %946 : vector<8x128xf32>
    %948 = arith.addf %943, %947 : vector<8x128xf32>
    %c0_754 = arith.constant 0 : index
    %c0_755 = arith.constant 0 : index
    %949 = vector.load %arg3[%c0_754, %c0_755] : memref<1x128xf32, #tpu.memory_space<vmem>>, vector<1x128xf32>
    %950 = vector.broadcast %949 : vector<1x128xf32> to vector<8x128xf32>
    %951 = arith.addf %948, %950 : vector<8x128xf32>
    %cst_756 = arith.constant 0.000000e+00 : f32
    %952 = vector.broadcast %cst_756 : f32 to vector<8x128xf32>
    %953 = arith.maximumf %951, %952 : vector<8x128xf32>
    %c48_757 = arith.constant 48 : index
    %c0_758 = arith.constant 0 : index
    %954 = vector.load %arg7[%c48_757, %c0_758] : memref<64x128xf32, #tpu.memory_space<vmem>>, vector<8x128xf32>
    tpu.vector_store %arg7[%c48_757, %c0_758], %953 {strides = array<i32>} : memref<64x128xf32, #tpu.memory_space<vmem>>, vector<8x128xf32>,
    %c0_759 = arith.constant 0 : index
    %c56_760 = arith.constant 56 : index
    %c0_761 = arith.constant 0 : index
    %955 = vector.load %arg1[%c0_759, %c56_760, %c0_761] : memref<1x64x128xf32, #tpu.memory_space<vmem>>, vector<1x8x128xf32>
    %956 = vector.shape_cast %955 : vector<1x8x128xf32> to vector<8x128xf32>
    %c13_762 = arith.constant 13 : index
    %c0_763 = arith.constant 0 : index
    %c0_764 = arith.constant 0 : index
    %957 = vector.load %arg2[%c13_762, %c0_763, %c0_764] : memref<27x8x128xf32, #tpu.memory_space<vmem>>, vector<1x8x128xf32>
    %958 = vector.shape_cast %957 : vector<1x8x128xf32> to vector<8x128xf32>
    %959 = arith.mulf %956, %958 : vector<8x128xf32>
    %c0_765 = arith.constant 0 : index
    %c48_766 = arith.constant 48 : index
    %c0_767 = arith.constant 0 : index
    %960 = vector.load %arg1[%c0_765, %c48_766, %c0_767] : memref<1x64x128xf32, #tpu.memory_space<vmem>>, vector<1x8x128xf32>
    %961 = vector.shape_cast %960 : vector<1x8x128xf32> to vector<8x128xf32>
    %c1_i32_768 = arith.constant 1 : i32
    %962 = tpu.dynamic_rotate %961 by %c1_i32_768 dim 0 : vector<8x128xf32>, i32 -> vector<8x128xf32>
    %c8_i32_769 = arith.constant 8 : i32
    %963 = tpu.dynamic_rotate %962 by %c8_i32_769 dim 1 : vector<8x128xf32>, i32 -> vector<8x128xf32>
    %c0_770 = arith.constant 0 : index
    %c0_771 = arith.constant 0 : index
    %c0_772 = arith.constant 0 : index
    %964 = vector.load %arg2[%c0_770, %c0_771, %c0_772] : memref<27x8x128xf32, #tpu.memory_space<vmem>>, vector<1x8x128xf32>
    %965 = vector.shape_cast %964 : vector<1x8x128xf32> to vector<8x128xf32>
    %966 = arith.mulf %963, %965 : vector<8x128xf32>
    %967 = arith.addf %959, %966 : vector<8x128xf32>
    %c1_773 = arith.constant 1 : index
    %c0_774 = arith.constant 0 : index
    %c0_775 = arith.constant 0 : index
    %968 = vector.load %arg2[%c1_773, %c0_774, %c0_775] : memref<27x8x128xf32, #tpu.memory_space<vmem>>, vector<1x8x128xf32>
    %969 = vector.shape_cast %968 : vector<1x8x128xf32> to vector<8x128xf32>
    %970 = arith.mulf %962, %969 : vector<8x128xf32>
    %971 = arith.addf %967, %970 : vector<8x128xf32>
    %c120_i32_776 = arith.constant 120 : i32
    %972 = tpu.dynamic_rotate %962 by %c120_i32_776 dim 1 : vector<8x128xf32>, i32 -> vector<8x128xf32>
    %c2_777 = arith.constant 2 : index
    %c0_778 = arith.constant 0 : index
    %c0_779 = arith.constant 0 : index
    %973 = vector.load %arg2[%c2_777, %c0_778, %c0_779] : memref<27x8x128xf32, #tpu.memory_space<vmem>>, vector<1x8x128xf32>
    %974 = vector.shape_cast %973 : vector<1x8x128xf32> to vector<8x128xf32>
    %975 = arith.mulf %972, %974 : vector<8x128xf32>
    %976 = arith.addf %971, %975 : vector<8x128xf32>
    %c8_i32_780 = arith.constant 8 : i32
    %977 = tpu.dynamic_rotate %961 by %c8_i32_780 dim 1 : vector<8x128xf32>, i32 -> vector<8x128xf32>
    %c3_781 = arith.constant 3 : index
    %c0_782 = arith.constant 0 : index
    %c0_783 = arith.constant 0 : index
    %978 = vector.load %arg2[%c3_781, %c0_782, %c0_783] : memref<27x8x128xf32, #tpu.memory_space<vmem>>, vector<1x8x128xf32>
    %979 = vector.shape_cast %978 : vector<1x8x128xf32> to vector<8x128xf32>
    %980 = arith.mulf %977, %979 : vector<8x128xf32>
    %981 = arith.addf %976, %980 : vector<8x128xf32>
    %c4_784 = arith.constant 4 : index
    %c0_785 = arith.constant 0 : index
    %c0_786 = arith.constant 0 : index
    %982 = vector.load %arg2[%c4_784, %c0_785, %c0_786] : memref<27x8x128xf32, #tpu.memory_space<vmem>>, vector<1x8x128xf32>
    %983 = vector.shape_cast %982 : vector<1x8x128xf32> to vector<8x128xf32>
    %984 = arith.mulf %961, %983 : vector<8x128xf32>
    %985 = arith.addf %981, %984 : vector<8x128xf32>
    %c120_i32_787 = arith.constant 120 : i32
    %986 = tpu.dynamic_rotate %961 by %c120_i32_787 dim 1 : vector<8x128xf32>, i32 -> vector<8x128xf32>
    %c5_788 = arith.constant 5 : index
    %c0_789 = arith.constant 0 : index
    %c0_790 = arith.constant 0 : index
    %987 = vector.load %arg2[%c5_788, %c0_789, %c0_790] : memref<27x8x128xf32, #tpu.memory_space<vmem>>, vector<1x8x128xf32>
    %988 = vector.shape_cast %987 : vector<1x8x128xf32> to vector<8x128xf32>
    %989 = arith.mulf %986, %988 : vector<8x128xf32>
    %990 = arith.addf %985, %989 : vector<8x128xf32>
    %c7_i32_791 = arith.constant 7 : i32
    %991 = tpu.dynamic_rotate %961 by %c7_i32_791 dim 0 : vector<8x128xf32>, i32 -> vector<8x128xf32>
    %c8_i32_792 = arith.constant 8 : i32
    %992 = tpu.dynamic_rotate %991 by %c8_i32_792 dim 1 : vector<8x128xf32>, i32 -> vector<8x128xf32>
    %c6_793 = arith.constant 6 : index
    %c0_794 = arith.constant 0 : index
    %c0_795 = arith.constant 0 : index
    %993 = vector.load %arg2[%c6_793, %c0_794, %c0_795] : memref<27x8x128xf32, #tpu.memory_space<vmem>>, vector<1x8x128xf32>
    %994 = vector.shape_cast %993 : vector<1x8x128xf32> to vector<8x128xf32>
    %995 = arith.mulf %992, %994 : vector<8x128xf32>
    %996 = arith.addf %990, %995 : vector<8x128xf32>
    %c7_796 = arith.constant 7 : index
    %c0_797 = arith.constant 0 : index
    %c0_798 = arith.constant 0 : index
    %997 = vector.load %arg2[%c7_796, %c0_797, %c0_798] : memref<27x8x128xf32, #tpu.memory_space<vmem>>, vector<1x8x128xf32>
    %998 = vector.shape_cast %997 : vector<1x8x128xf32> to vector<8x128xf32>
    %999 = arith.mulf %991, %998 : vector<8x128xf32>
    %1000 = arith.addf %996, %999 : vector<8x128xf32>
    %c120_i32_799 = arith.constant 120 : i32
    %1001 = tpu.dynamic_rotate %991 by %c120_i32_799 dim 1 : vector<8x128xf32>, i32 -> vector<8x128xf32>
    %c8_800 = arith.constant 8 : index
    %c0_801 = arith.constant 0 : index
    %c0_802 = arith.constant 0 : index
    %1002 = vector.load %arg2[%c8_800, %c0_801, %c0_802] : memref<27x8x128xf32, #tpu.memory_space<vmem>>, vector<1x8x128xf32>
    %1003 = vector.shape_cast %1002 : vector<1x8x128xf32> to vector<8x128xf32>
    %1004 = arith.mulf %1001, %1003 : vector<8x128xf32>
    %1005 = arith.addf %1000, %1004 : vector<8x128xf32>
    %c1_i32_803 = arith.constant 1 : i32
    %1006 = tpu.dynamic_rotate %956 by %c1_i32_803 dim 0 : vector<8x128xf32>, i32 -> vector<8x128xf32>
    %c8_i32_804 = arith.constant 8 : i32
    %1007 = tpu.dynamic_rotate %1006 by %c8_i32_804 dim 1 : vector<8x128xf32>, i32 -> vector<8x128xf32>
    %c9_805 = arith.constant 9 : index
    %c0_806 = arith.constant 0 : index
    %c0_807 = arith.constant 0 : index
    %1008 = vector.load %arg2[%c9_805, %c0_806, %c0_807] : memref<27x8x128xf32, #tpu.memory_space<vmem>>, vector<1x8x128xf32>
    %1009 = vector.shape_cast %1008 : vector<1x8x128xf32> to vector<8x128xf32>
    %1010 = arith.mulf %1007, %1009 : vector<8x128xf32>
    %1011 = arith.addf %1005, %1010 : vector<8x128xf32>
    %c10_808 = arith.constant 10 : index
    %c0_809 = arith.constant 0 : index
    %c0_810 = arith.constant 0 : index
    %1012 = vector.load %arg2[%c10_808, %c0_809, %c0_810] : memref<27x8x128xf32, #tpu.memory_space<vmem>>, vector<1x8x128xf32>
    %1013 = vector.shape_cast %1012 : vector<1x8x128xf32> to vector<8x128xf32>
    %1014 = arith.mulf %1006, %1013 : vector<8x128xf32>
    %1015 = arith.addf %1011, %1014 : vector<8x128xf32>
    %c120_i32_811 = arith.constant 120 : i32
    %1016 = tpu.dynamic_rotate %1006 by %c120_i32_811 dim 1 : vector<8x128xf32>, i32 -> vector<8x128xf32>
    %c11_812 = arith.constant 11 : index
    %c0_813 = arith.constant 0 : index
    %c0_814 = arith.constant 0 : index
    %1017 = vector.load %arg2[%c11_812, %c0_813, %c0_814] : memref<27x8x128xf32, #tpu.memory_space<vmem>>, vector<1x8x128xf32>
    %1018 = vector.shape_cast %1017 : vector<1x8x128xf32> to vector<8x128xf32>
    %1019 = arith.mulf %1016, %1018 : vector<8x128xf32>
    %1020 = arith.addf %1015, %1019 : vector<8x128xf32>
    %c8_i32_815 = arith.constant 8 : i32
    %1021 = tpu.dynamic_rotate %956 by %c8_i32_815 dim 1 : vector<8x128xf32>, i32 -> vector<8x128xf32>
    %c12_816 = arith.constant 12 : index
    %c0_817 = arith.constant 0 : index
    %c0_818 = arith.constant 0 : index
    %1022 = vector.load %arg2[%c12_816, %c0_817, %c0_818] : memref<27x8x128xf32, #tpu.memory_space<vmem>>, vector<1x8x128xf32>
    %1023 = vector.shape_cast %1022 : vector<1x8x128xf32> to vector<8x128xf32>
    %1024 = arith.mulf %1021, %1023 : vector<8x128xf32>
    %1025 = arith.addf %1020, %1024 : vector<8x128xf32>
    %c120_i32_819 = arith.constant 120 : i32
    %1026 = tpu.dynamic_rotate %956 by %c120_i32_819 dim 1 : vector<8x128xf32>, i32 -> vector<8x128xf32>
    %c14_820 = arith.constant 14 : index
    %c0_821 = arith.constant 0 : index
    %c0_822 = arith.constant 0 : index
    %1027 = vector.load %arg2[%c14_820, %c0_821, %c0_822] : memref<27x8x128xf32, #tpu.memory_space<vmem>>, vector<1x8x128xf32>
    %1028 = vector.shape_cast %1027 : vector<1x8x128xf32> to vector<8x128xf32>
    %1029 = arith.mulf %1026, %1028 : vector<8x128xf32>
    %1030 = arith.addf %1025, %1029 : vector<8x128xf32>
    %c7_i32_823 = arith.constant 7 : i32
    %1031 = tpu.dynamic_rotate %956 by %c7_i32_823 dim 0 : vector<8x128xf32>, i32 -> vector<8x128xf32>
    %c8_i32_824 = arith.constant 8 : i32
    %1032 = tpu.dynamic_rotate %1031 by %c8_i32_824 dim 1 : vector<8x128xf32>, i32 -> vector<8x128xf32>
    %c15_825 = arith.constant 15 : index
    %c0_826 = arith.constant 0 : index
    %c0_827 = arith.constant 0 : index
    %1033 = vector.load %arg2[%c15_825, %c0_826, %c0_827] : memref<27x8x128xf32, #tpu.memory_space<vmem>>, vector<1x8x128xf32>
    %1034 = vector.shape_cast %1033 : vector<1x8x128xf32> to vector<8x128xf32>
    %1035 = arith.mulf %1032, %1034 : vector<8x128xf32>
    %1036 = arith.addf %1030, %1035 : vector<8x128xf32>
    %c16_828 = arith.constant 16 : index
    %c0_829 = arith.constant 0 : index
    %c0_830 = arith.constant 0 : index
    %1037 = vector.load %arg2[%c16_828, %c0_829, %c0_830] : memref<27x8x128xf32, #tpu.memory_space<vmem>>, vector<1x8x128xf32>
    %1038 = vector.shape_cast %1037 : vector<1x8x128xf32> to vector<8x128xf32>
    %1039 = arith.mulf %1031, %1038 : vector<8x128xf32>
    %1040 = arith.addf %1036, %1039 : vector<8x128xf32>
    %c120_i32_831 = arith.constant 120 : i32
    %1041 = tpu.dynamic_rotate %1031 by %c120_i32_831 dim 1 : vector<8x128xf32>, i32 -> vector<8x128xf32>
    %c17_832 = arith.constant 17 : index
    %c0_833 = arith.constant 0 : index
    %c0_834 = arith.constant 0 : index
    %1042 = vector.load %arg2[%c17_832, %c0_833, %c0_834] : memref<27x8x128xf32, #tpu.memory_space<vmem>>, vector<1x8x128xf32>
    %1043 = vector.shape_cast %1042 : vector<1x8x128xf32> to vector<8x128xf32>
    %1044 = arith.mulf %1041, %1043 : vector<8x128xf32>
    %1045 = arith.addf %1040, %1044 : vector<8x128xf32>
    %c0_835 = arith.constant 0 : index
    %c0_836 = arith.constant 0 : index
    %1046 = vector.load %arg3[%c0_835, %c0_836] : memref<1x128xf32, #tpu.memory_space<vmem>>, vector<1x128xf32>
    %1047 = vector.broadcast %1046 : vector<1x128xf32> to vector<8x128xf32>
    %1048 = arith.addf %1045, %1047 : vector<8x128xf32>
    %cst_837 = arith.constant 0.000000e+00 : f32
    %1049 = vector.broadcast %cst_837 : f32 to vector<8x128xf32>
    %1050 = arith.maximumf %1048, %1049 : vector<8x128xf32>
    %c56_838 = arith.constant 56 : index
    %c0_839 = arith.constant 0 : index
    %1051 = vector.load %arg7[%c56_838, %c0_839] : memref<64x128xf32, #tpu.memory_space<vmem>>, vector<8x128xf32>
    tpu.vector_store %arg7[%c56_838, %c0_839], %1050 {strides = array<i32>} : memref<64x128xf32, #tpu.memory_space<vmem>>, vector<8x128xf32>,
    %c0_840 = arith.constant 0 : index
    %c0_841 = arith.constant 0 : index
    %1052 = vector.load %arg7[%c0_840, %c0_841] : memref<64x128xf32, #tpu.memory_space<vmem>>, vector<64x128xf32>
    %1053 = arith.truncf %1052 : vector<64x128xf32> to vector<64x128xbf16>
    %c0_842 = arith.constant 0 : index
    %c0_843 = arith.constant 0 : index
    %1054 = vector.load %arg4[%c0_842, %c0_843] : memref<128x256xbf16, #tpu.memory_space<vmem>>, vector<128x256xbf16>
    %cst_844 = arith.constant dense<0.000000e+00> : vector<64x256xf32>
    %1055 = tpu.matmul %1053, %1054, %cst_844 {dimension_numbers = #tpu.dot_dimension_numbers<[1], [0], [0], [1], [0, 0, 1, 1], [], []>} : vector<64x128xbf16>, vector<128x256xbf16>, vector<64x256xf32> -> vector<64x256xf32>
    %c0_845 = arith.constant 0 : index
    %c0_846 = arith.constant 0 : index
    %1056 = vector.load %arg5[%c0_845, %c0_846] : memref<1x256xf32, #tpu.memory_space<vmem>>, vector<1x256xf32>
    %1057 = vector.broadcast %1056 : vector<1x256xf32> to vector<64x256xf32>
    %1058 = arith.addf %1055, %1057 : vector<64x256xf32>
    %cst_847 = arith.constant 0.000000e+00 : f32
    %1059 = vector.broadcast %cst_847 : f32 to vector<64x256xf32>
    %1060 = arith.maximumf %1058, %1059 : vector<64x256xf32>
    %c0_848 = arith.constant 0 : index
    %c0_849 = arith.constant 0 : index
    %c0_850 = arith.constant 0 : index
    %1061 = vector.load %arg6[%c0_848, %c0_849, %c0_850] : memref<1x64x256xf32, #tpu.memory_space<vmem>>, vector<1x64x256xf32>
    %1062 = vector.shape_cast %1061 : vector<1x64x256xf32> to vector<64x256xf32>
    %1063 = vector.shape_cast %1060 : vector<64x256xf32> to vector<1x64x256xf32>
    tpu.vector_store %arg6[%c0_848, %c0_849, %c0_850], %1063 {strides = array<i32>} : memref<1x64x256xf32, #tpu.memory_space<vmem>>, vector<1x64x256xf32>,
    return
  }
  func.func @transform_0(%arg0: i32) -> (i32, i32, i32) {
    %c0_i32 = arith.constant 0 : i32
    %c0_i32_0 = arith.constant 0 : i32
    %c0_i32_1 = arith.constant 0 : i32
    return %arg0, %c0_i32, %c0_i32_0 : i32, i32, i32
  }
  func.func @transform_1(%arg0: i32) -> (i32, i32, i32) {
    %c0_i32 = arith.constant 0 : i32
    %c0_i32_0 = arith.constant 0 : i32
    %c0_i32_1 = arith.constant 0 : i32
    %c0_i32_2 = arith.constant 0 : i32
    return %c0_i32, %c0_i32_0, %c0_i32_1 : i32, i32, i32
  }
  func.func @transform_2(%arg0: i32) -> (i32, i32) {
    %c0_i32 = arith.constant 0 : i32
    %c0_i32_0 = arith.constant 0 : i32
    %c0_i32_1 = arith.constant 0 : i32
    return %c0_i32, %c0_i32_0 : i32, i32
  }
  func.func @transform_3(%arg0: i32) -> (i32, i32) {
    %c0_i32 = arith.constant 0 : i32
    %c0_i32_0 = arith.constant 0 : i32
    %c0_i32_1 = arith.constant 0 : i32
    return %c0_i32, %c0_i32_0 : i32, i32
  }
  func.func @transform_4(%arg0: i32) -> (i32, i32) {
    %c0_i32 = arith.constant 0 : i32
    %c0_i32_0 = arith.constant 0 : i32
    %c0_i32_1 = arith.constant 0 : i32
    return %c0_i32, %c0_i32_0 : i32, i32
  }
  func.func @transform_5(%arg0: i32) -> (i32, i32, i32) {
    %c0_i32 = arith.constant 0 : i32
    %c0_i32_0 = arith.constant 0 : i32
    %c0_i32_1 = arith.constant 0 : i32
    return %arg0, %c0_i32, %c0_i32_0 : i32, i32, i32
  }
}

</mosaic_0001>

<bundles_post_ra>
// kernel: tpu_custom_call.1
= control target key start
LH: loop header
LB: loop body
LE: loop exit
PB: predicated region body
PF: predicated region fallthrough
CT: control target
= control target key end

     0   :  { %10 = vsyncpa [#allocation4], 0  ;;  %s3119_s0 = inlined_call_operand.hbm [shape: f32[2,64,128], index: 0, kind: input, shape index: {}]   ;;  %s3120_s1 = inlined_call_operand.hbm [shape: f32[27,8,128], index: 1, kind: input, shape index: {}]   ;;  %s3121_s2 = inlined_call_operand.vmem [shape: f32[1,128], index: 2, kind: input, shape index: {}]   ;;  %s3122_s3 = inlined_call_operand.hbm [shape: bf16[128,256], index: 3, kind: input, shape index: {}]   ;;  %s3123_s4 = inlined_call_operand.vmem [shape: f32[1,256], index: 4, kind: input, shape index: {}]   ;;  %s3124_s5 = inlined_call_operand.hbm [shape: f32[2,64,256], index: 5, kind: output, shape index: {}]  }
   0x1   :  { %12 = vsyncpa [#allocation4 + $0x1], 0 }
   0x2   :  { %13 = vsyncpa [#allocation7], 0 }
   0x3   :  { %14 = vsyncpa [#allocation5], 0 }
   0x4   :  { %16 = vsyncpa [#allocation5 + $0x1], 0  ;;  %s1989_s18 = smov 0   ;;  %s1991_s19 = smov 0  }
   0x5   :  { %s1993_s20 = smov 0   ;;  %s1995_s21 = smov 0  }
   0x6 LB: > { %s2010_s22 = sadd.s32 4294967295, %s1946_s21   ;;  %s1626_s23 = sadd.s32 4294967294, %s1946_s21   ;;  %s1946_s21 = sphi %s1995_s21, %s3217_s21   ;;  %s1942_s20 = sphi %s1993_s20, %s3216_s20   ;;  %s1938_s19 = sphi %s1991_s19, %s3215_s19   ;;  %s1934_s18 = sphi %s1989_s18, %s3214_s18  }
   0x7   : > { %p42_p0 = scmp.ne.s32.totalorder %s1938_s19, %s1934_s18  ;;  %p3125_p1 = scmp.eq.s32.totalorder %s2010_s22, 0 }
   0x8   : > { %p156_p3 = scmp.eq.s32.totalorder %s1626_s23, 1  ;;  %p1627_p5 = scmp.ge.s32.totalorder %s1946_s21, 1 }
   0x9   : > { %p2019_p4 = por %p3125_p1, %p42_p0  ;;  %p163_p7 = scmp.lt.s32.totalorder %s1946_s21, 3 }
   0xa   : > { %p2024_p6 = por %p156_p3, %p42_p0  ;;  %s1948_s27 = smov [#allocation6]  }
   0xb   : > { %s3156_s24 = scalar_select %p2019_p4, 1, 0 }
   0xc   : > { %s3157_s25 = scalar_select %p2024_p6, 1, 0 }
   0xd   : > { %p2029_p8 = pnand %p1627_p5, %p163_p7  ;;  %s175_s28 = sshll.u32 %s1948_s27, 4  ;;  %s2033_s28 = int_to_ptr.vmem [resolvable:$true] %s175_s28 }
   0xe   : > { %s1949_s30 = smov [#allocation8]   ;;  %s1790_s9 = scalar_lea.hbm %s3120_s1, 3456 }
   0xf   : > { %p1698_p9 = pneg %p2029_p8  ;;  %s191_s6 = sshll.u32 %s1949_s30, 4  ;;  %s2044_s6 = int_to_ptr.vmem [resolvable:$true] %s191_s6 }
  0x10   : > { %p1791_p12 = scmp.ne.s32.totalorder %s3120_s1, %s1790_s9  ;;  %p1797_p5 = scmp.lt.u32.totalorder %s1790_s9, %s3120_s1 }
  0x11   : > { %p2040_p11 = pnand %p1698_p9, %p3125_p1 }
  0x13   : > { %p1792_p13 = pneg %p2040_p11 }
  0x15   : > { %p1793_p0 = pnand %p1792_p13, %p1791_p12 }
  0x17   : > { %p1794_p3 = pneg %p1793_p0 }
  0x19   : > { %p1799_p7 = pnand %p1797_p5, %p1794_p3 }
  0x1b   : > { %1802 = shalt.err (!%p1799_p7)
}
  0x1c   : > { %s1803_s14 = scalar_lea.vmem %s2033_s28, 3456  ;;  %p1811_p2 = scmp.lt.s32.totalorder %s2033_s28, %s2033_s28 }
  0x1d   : > { %p1804_p9 = scmp.ne.s32.totalorder %s2033_s28, %s1803_s14  ;;  %p1812_p12 = scmp.lt.s32.totalorder %s1803_s14, %s1803_s14 }
  0x1f   : > { %p1806_p10 = pnand %p1804_p9, %p1792_p13  ;;  %p1813_p0 = por %p1812_p12, %p1811_p2 }
  0x21   : > { %p1807_p1 = pneg %p1806_p10 }
  0x23   : > { %p1814_p6 = pnand %p1813_p0, %p1807_p1 }
  0x25   : > { %1817 = shalt.err (!%p1814_p6)
}
  0x26   : > { %s1950_s15 = smov 128   ;;  %s1951_s16 = smov 8  }
  0x27   : > { %1701 = dma.hbm_to_vmem [thread:$0]  (!%p2040_p11), %s3120_s1, 3456, %s2033_s28, [#allocation7], %s1950_s15, %s1950_s15, %s1951_s16  }
  0x28   : > { %s1818_s7 = scalar_lea.hbm %s3122_s3, 2048 }
  0x29   : > { %p1819_p1 = scmp.ne.s32.totalorder %s3122_s3, %s1818_s7  ;;  %p1825_p10 = scmp.lt.u32.totalorder %s1818_s7, %s3122_s3 }
  0x2b   : > { %p1821_p2 = pnand %p1819_p1, %p1792_p13 }
  0x2d   : > { %p1822_p6 = pneg %p1821_p2 }
  0x2f   : > { %p1827_p3 = pnand %p1825_p10, %p1822_p6 }
  0x31   : > { %1830 = shalt.err (!%p1827_p3)
}
  0x32   : > { %s1831_s28 = scalar_lea.vmem %s2044_s6, 2048  ;;  %p1839_p12 = scmp.lt.s32.totalorder %s2044_s6, %s2044_s6 }
  0x33   : > { %p1832_p5 = scmp.ne.s32.totalorder %s2044_s6, %s1831_s28  ;;  %p1840_p0 = scmp.lt.s32.totalorder %s1831_s28, %s1831_s28 }
  0x35   : > { %p1834_p7 = pnand %p1832_p5, %p1792_p13  ;;  %p1841_p1 = por %p1840_p0, %p1839_p12 }
  0x37   : > { %p1835_p9 = pneg %p1834_p7 }
  0x39   : > { %p1842_p2 = pnand %p1841_p1, %p1835_p9 }
  0x3b   : > { %1845 = shalt.err (!%p1842_p2)
}
  0x3c   : > { %1704 = dma.hbm_to_vmem [thread:$0]  (!%p2040_p11), %s3122_s3, 2048, %s2044_s6, [#allocation7], %s1950_s15, %s1950_s15, %s1951_s16  }
  0x3d   : > { %s2105_s29 = sadd.s32 1, %s1946_s21   ;;  %s29_s14 = sadd.s32 1, %s1942_s20 }
  0x3e   : > { %s26_s17 = ssub.s32 %s1946_s21, %s2105_s29  ;;  %p36_p13 = scmp.ne.s32.totalorder %s1942_s20, %s1938_s19 }
  0x3f   : > { %p27_p6 = scmp.eq.s32.totalorder %s26_s17, 0  ;;  %p37_p10 = scmp.eq.s32.totalorder %s1946_s21, 0 }
  0x40   : > { %p3160_p3 = scmp.eq.s32.totalorder %s2010_s22, 1  ;;  %p1715_p7 = scmp.lt.s32.totalorder %s1946_s21, 2 }
  0x41   : > { %s2121_s27 = scalar_select %p27_p6, %s1942_s20, %s29_s14  }
  0x42   : > { %p2115_p5 = por %p3160_p3, %p36_p13  ;;  %p38_p9 = por %p37_p10, %p36_p13 }
  0x43   : > { %s208_s30 = sand.u32 1, %s1942_s20   ;;  %s1668_s6 = sshll.u32 %s1946_s21, 10 }
  0x44   : > { %s3161_s23 = scalar_select %p2115_p5, 1, 0 }
  0x45   : > { %s1631_s7 = sshll.u32 %s208_s30, 6  ;;  %s2128_s10 = scalar_lea.hbm %s3119_s0, %s1668_s6 }
  0x46   : > { %s212_s11 = scalar_lea.vmem [#allocation3], %s1631_s7  ;;  %p2132_p11 = pnand %p1715_p7, %p38_p9 }
  0x47   : > { %s219_s28 = sshll.u32 %s212_s11, 4  ;;  %s2136_s13 = scalar_lea.sflag [#allocation4], %s208_s30  ;;  %s2130_s28 = int_to_ptr.vmem [resolvable:$true] %s219_s28 }
  0x48   : > { %s1846_s14 = scalar_lea.hbm %s2128_s10, 1024  ;;  %p1848_p0 = pneg %p2132_p11 }
  0x49   : > { %p1847_p12 = scmp.ne.s32.totalorder %s2128_s10, %s1846_s14  ;;  %s1851_s6 = scalar_lea.hbm %s3119_s0, 2048 }
  0x4a   : > { %p1852_p13 = scmp.lt.u32.totalorder %s2128_s10, %s3119_s0  ;;  %p1853_p6 = scmp.lt.u32.totalorder %s1851_s6, %s1846_s14 }
  0x4b   : > { %p1849_p1 = pnand %p1848_p0, %p1847_p12  ;;  %p1855_p3 = scmp.lt.u32.totalorder %s1846_s14, %s2128_s10 }
  0x4c   : > { %p1854_p10 = por %p1853_p6, %p1852_p13 }
  0x4d   : > { %p1850_p2 = pneg %p1849_p1 }
  0x4e   : > { %p1856_p7 = por %p1855_p3, %p1854_p10 }
  0x50   : > { %p1857_p9 = pnand %p1856_p7, %p1850_p2 }
  0x52   : > { %1860 = shalt.err (!%p1857_p9)
}
  0x53   : > { %s1861_s30 = scalar_lea.vmem %s2130_s28, 1024  ;;  %s1952_s11 = smov [#allocation3]  }
  0x54   : > { %p1862_p12 = scmp.ne.s32.totalorder %s2130_s28, %s1861_s30  ;;  %s1866_s17 = sshll.u32 %s1952_s11, 4  ;;  %s1867_s17 = int_to_ptr.vmem [resolvable:$false] %s1866_s17 }
  0x55   : > { %s1868_s7 = scalar_lea.vmem %s1867_s17, 2048  ;;  %p1869_p4 = scmp.lt.s32.totalorder %s2130_s28, %s1867_s17 }
  0x56   : > { %p1864_p1 = pnand %p1862_p12, %p1848_p0  ;;  %p1870_p13 = scmp.lt.s32.totalorder %s1868_s7, %s1861_s30 }
  0x58   : > { %p1865_p5 = pneg %p1864_p1  ;;  %p1871_p6 = por %p1870_p13, %p1869_p4 }
  0x5a   : > { %p1872_p10 = pnand %p1871_p6, %p1865_p5 }
  0x5c   : > { %1875 = shalt.err (!%p1872_p10)
}
  0x5d   : > { %1708 = dma.hbm_to_vmem [thread:$0]  (!%p2132_p11), %s2128_s10, 1024, %s2130_s28, %s2136_s13, %s1950_s15, %s1950_s15, %s1951_s16  }
  0x5e   : > { %231 = sbr.rel (%p2029_p8) target bundleno = 731 (0x2db), region = 40 }
  0x65   : > { %s2170_s14 = sand.u32 1, %s1938_s19   ;;  %p3163_p4 = scmp.ne.s32.totalorder %s3156_s24, 0 }
  0x66   : > { %s1635_s6 = sshll.u32 %s2170_s14, 6  ;;  %s234_s8 = scalar_lea.sflag [#allocation4], %s2170_s14 }
  0x67   : > { %s2174_s9 = scalar_lea.vmem [#allocation3], %s1635_s6 }
  0x68   : > { %1921 = dma.done.wait (%p3163_p4), %s234_s8, 1024  }
  0x69   : > { %1923 = vsyncadd (%p3163_p4), %s234_s8, 4294966272  ;;  %p3164_p5 = scmp.eq.s32.totalorder %s2010_s22, 0 }
  0x6b   : > { %1925 = dma.done.wait (%p3164_p5), [#allocation7], 5504   ;;  %p3165_p8 = pmov %p3164_p5 }
  0x6c   : > { %v2185_v0 = vld [vmem:[%s2174_s9 + $0x20] sm:$0xff]  ;;  %v2191_v2 = vld [vmem:[%s2174_s9 + $0x18] sm:$0xff]  ;;  %s1953_s24 = smov 8   ;;  %s1954_s26 = smov 120   ;;  %v2215_v6 = vld [vmem:[%s2174_s9 + $0x8] sm:$0xff] }
  0x6d   : > { %1927 = vsyncadd (%p3165_p8), [#allocation7], 4294961792  ;;  %3166 = vst [vmem:[#allocation13_spill] sm:$0xff] %v2185_v0  ;;  %v2188_v1 = vld [vmem:[%s2174_s9] sm:$0xff]  ;;  %v2194_v3 = vrot.slane %v2185_v0, 7  ;;  %v2204_v5 = vrot.slane %v2191_v2, 7 }
  0x6e   : > { %3167 = vst [vmem:[#allocation14_spill] sm:$0xff] %v2191_v2  ;;  %v2197_v4 = vrot.slane %v2188_v1, 7  ;;  %v2222_v7 = vrot.slane %v2215_v6, 7  ;;  %v2225_v8 = vld [vmem:[%s2174_s9 + $0x28] sm:$0xff]  ;;  %v2228_v9 = vld [vmem:[%s2174_s9 + $0x10] sm:$0xff]  ;;  %v2249_v12 = vrot.slane %v2188_v1, 1 }
  0x6f   : > { %937 = vrot.lane.b32.xlu1 %v2194_v3, %s1953_s24  ;;  %3168 = vst [vmem:[#allocation15_spill] sm:$0xff] %v2204_v5  ;;  %3170 = vst [vmem:[#allocation17_spill] sm:$0xff] %v2228_v9  ;;  %v2235_v10 = vrot.slane %v2225_v8, 7  ;;  %v2238_v11 = vrot.slane %v2228_v9, 7  ;;  %v2260_v13 = vrot.slane %v2185_v0, 1  ;;  %v2263_v14 = vrot.slane %v2191_v2, 1 }
  0x70   : > { %389 = vrot.lane.b32.xlu0 %v2197_v4, %s1953_s24  ;;  %3169 = vst [vmem:[#allocation16_spill] sm:$0xff] %v2222_v7  ;;  %3173 = vst [vmem:[#allocation20_spill] sm:$0xff] %v2249_v12  ;;  %v2298_v15 = vrot.slane %v2215_v6, 1  ;;  %v2301_v16 = vrot.slane %v2228_v9, 1  ;;  %v2308_v17 = vrot.slane %v2225_v8, 1  ;;  %v2343_v18 = vld [vmem:[%s2174_s9 + $0x30] sm:$0xff] }
  0x71   : > { %3171 = vst [vmem:[#allocation18_spill] sm:$0xff] %v2235_v10  ;;  %3172 = vst [vmem:[#allocation19_spill] sm:$0xff] %v2238_v11  ;;  %v2350_v19 = vrot.slane %v2343_v18, 7  ;;  %v2443_v42 = vrot.slane %v2343_v18, 1  ;;  %v2449_v45 = vld [vmem:[#allocation6] sm:$0xff]  ;;  %v2451_v46 = vld [vmem:[#allocation6 + $0x68] sm:$0xff] }
  0x72   : > { %3174 = vst [vmem:[#allocation21_spill] sm:$0xff] %v2260_v13  ;;  %3175 = vst [vmem:[#allocation22_spill] sm:$0xff] %v2263_v14  ;;  %v386_v47 = vmul.f32 %v2451_v46, %v2215_v6  ;;  %v2464_v51 = vld [vmem:[#allocation6 + $0x8] sm:$0xff]  ;;  %v799_v52 = vmul.f32 %v2185_v0, %v2451_v46  ;;  %v934_v54 = vmul.f32 %v2225_v8, %v2451_v46  ;;  %v2478_v58 = vld [vmem:[#allocation6 + $0x20] sm:$0xff]  ;;  %s1638_s12 = sshll.u32 %s2170_s14, 7  ;;  %s1669_s30 = sshll.u32 %s2010_s22, 11 }
  0x73   : > { %398 = vrot.lane.b32.xlu1 %v2197_v4, %s1954_s26  ;;  %3176 = vst [vmem:[#allocation23_spill] sm:$0xff] %v2308_v17  ;;  %3177 = vst [vmem:[#allocation24_spill] sm:$0xff] %v2350_v19  ;;  %v396_v57 = vmul.f32 %v2464_v51, %v2197_v4  ;;  %v2484_v61 = vld [vmem:[#allocation6 + $0x10] sm:$0xff]  ;;  %v808_v63 = vmul.f32 %v2204_v5, %v2464_v51  ;;  %s3050_s13 = scalar_lea.vmem [#allocation9], %s1638_s12  ;;  %s3070_s6 = scalar_lea.hbm %s3124_s5, %s1669_s30 }
  0x74   : > { %802 = vrot.lane.b32.xlu0 %v2204_v5, %s1953_s24  ;;  %3178 = vst [vmem:[#allocation25_spill] sm:$0xff] %v2449_v45  ;;  %3181 = vst [vmem:[#allocation28_spill] sm:$0xff] %v2464_v51  ;;  %s1534_s11 = sshll.u32 %s3050_s13, 4  ;;  %s1521_s22 = scalar_lea.sflag [#allocation5], %s2170_s14  ;;  %s3072_s11 = int_to_ptr.vmem [resolvable:$true] %s1534_s11 }
  0x75   : > { %3182 = vst [vmem:[#allocation29_spill] sm:$0xff] %v2478_v58  ;;  %s1876_s8 = scalar_lea.vmem %s3072_s11, 2048  ;;  %p3211_p0 = scmp.ne.s32.totalorder %s3161_s23, 0 }
  0x76   : > { %p1877_p11 = scmp.ne.s32.totalorder %s3072_s11, %s1876_s8 }
  0x77   : > { %945 = vrot.lane.b32.xlu1 %v2194_v3, %s1954_s26 }
  0x78   : > { %810 = vrot.lane.b32.xlu0 %v2204_v5, %s1954_s26  ;;  %p1878_p2 = pnand %p1877_p11, %p3211_p0 }
  0x7a   : > { %p1879_p3 = pneg %p1878_p2 }
  0x7b   : > { %815 = vrot.lane.b32.xlu1 %v2191_v2, %s1953_s24 }
  0x7c   : > { %404 = vrot.lane.b32.xlu0 %v2188_v1, %s1953_s24 }
  0x7f   : > { %532 = vrot.lane.b32.xlu1 %v2222_v7, %s1953_s24 }
  0x80   : > { %950 = vrot.lane.b32.xlu0 %v2185_v0, %s1953_s24 }
  0x83   : > { %1072 = vrot.lane.b32.xlu1 %v2235_v10, %s1953_s24 }
  0x84   : > { %667 = vrot.lane.b32.xlu0 %v2238_v11, %s1953_s24 }
  0x87   : > { %823 = vrot.lane.b32.xlu1 %v2191_v2, %s1954_s26 }
  0x88   : > { %414 = vrot.lane.b32.xlu0 %v2188_v1, %s1954_s26 }
  0x8b   : > { %421 = vrot.lane.b32.xlu1 %v2249_v12, %s1953_s24 }
  0x8c   : > { %958 = vrot.lane.b32.xlu0 %v2185_v0, %s1954_s26 }
  0x8f   : > { %675 = vrot.lane.b32.xlu1 %v2238_v11, %s1954_s26 }
  0x90   : > { %540 = vrot.lane.b32.xlu0 %v2222_v7, %s1954_s26 }
  0x93   : > { %964 = vrot.lane.b32.xlu1 %v2260_v13, %s1953_s24 }
  0x94   : > { %829 = vrot.lane.b32.xlu0 %v2263_v14, %s1953_s24 }
  0x97   : > { %545 = vrot.lane.b32.xlu1 %v2215_v6, %s1953_s24 }
  0x98   : > { %1080 = vrot.lane.b32.xlu0 %v2235_v10, %s1954_s26 }
  0x9b   : > { %1085 = vrot.lane.b32.xlu1 %v2225_v8, %s1953_s24 }
  0x9c   : > { %680 = vrot.lane.b32.xlu0 %v2228_v9, %s1953_s24 }
  0x9f   : > { %837 = vrot.lane.b32.xlu1 %v2263_v14, %s1954_s26 }
  0xa0   : > { %431 = vrot.lane.b32.xlu0 %v2249_v12, %s1954_s26 }
  0xa3   : > { %278 = vrot.lane.b32.xlu1 %v2197_v4, %s1953_s24 }
  0xa4   : > { %972 = vrot.lane.b32.xlu0 %v2260_v13, %s1954_s26 }
  0xa7   : > { %553 = vrot.lane.b32.xlu1 %v2215_v6, %s1954_s26 }
  0xa8   : > { %438 = vrot.lane.b32.xlu0 %v2222_v7, %s1953_s24 }
  0xab   : > { %843 = vrot.lane.b32.xlu1 %v2194_v3, %s1953_s24 }
  0xac   : > { %688 = vrot.lane.b32.xlu0 %v2228_v9, %s1954_s26 }
  0xaf   : > { %1093 = vrot.lane.b32.xlu1 %v2225_v8, %s1954_s26 }
  0xb0   : > { %978 = vrot.lane.b32.xlu0 %v2235_v10, %s1953_s24 }
  0xb3   : > { %694 = vrot.lane.b32.xlu1 %v2301_v16, %s1953_s24 }
  0xb4   : > { %559 = vrot.lane.b32.xlu0 %v2298_v15, %s1953_s24 }
  0xb7   : > { %288 = vrot.lane.b32.xlu1 %v2197_v4, %s1954_s26 }
  0xb8   : > { %1099 = vrot.lane.b32.xlu0 %v2308_v17, %s1953_s24 }
  0xbb   : > { %851 = vrot.lane.b32.xlu1 %v2194_v3, %s1954_s26 }
  0xbc   : > { %446 = vrot.lane.b32.xlu0 %v2222_v7, %s1954_s26 }
  0xbf   : > { %294 = vrot.lane.b32.xlu1 %v2188_v1, %s1953_s24 }
  0xc0   : > { %986 = vrot.lane.b32.xlu0 %v2235_v10, %s1954_s26 }
  0xc3   : > { %567 = vrot.lane.b32.xlu1 %v2298_v15, %s1954_s26 }
  0xc4   : > { %451 = vrot.lane.b32.xlu0 %v2215_v6, %s1953_s24 }
  0xc7   : > { %856 = vrot.lane.b32.xlu1 %v2185_v0, %s1953_s24 }
  0xc8   : > { %702 = vrot.lane.b32.xlu0 %v2301_v16, %s1954_s26 }
  0xcb   : > { %1107 = vrot.lane.b32.xlu1 %v2308_v17, %s1954_s26 }
  0xcc   : > { %991 = vrot.lane.b32.xlu0 %v2225_v8, %s1953_s24 }
  0xcf   : > { %456 = vrot.lane.b32.xlu1 %v2215_v6, %s1954_s26 }
  0xd0   : > { %300 = vrot.lane.b32.xlu0 %v2188_v1, %s1954_s26 }
  0xd3   : > { %708 = vrot.lane.b32.xlu1 %v2204_v5, %s1953_s24 }
  0xd4   : > { %573 = vrot.lane.b32.xlu0 %v2238_v11, %s1953_s24 }
  0xd7   : > { %996 = vrot.lane.b32.xlu1 %v2225_v8, %s1954_s26 }
  0xd8   : > { %861 = vrot.lane.b32.xlu0 %v2185_v0, %s1954_s26 }
  0xdb   : > { %1207 = vrot.lane.b32.xlu1 %v2350_v19, %s1953_s24 }
  0xdc   : > { %1113 = vrot.lane.b32.xlu0 %v2350_v19, %s1953_s24 }
  0xdf   : > { %462 = vrot.lane.b32.xlu1 %v2298_v15, %s1953_s24 }
  0xe0   : > { %307 = vrot.lane.b32.xlu0 %v2249_v12, %s1953_s24 }
  0xe1   : > { %v938_v20 = vpop.permute.xlu1 %937 }
  0xe2   : > { %v390_v21 = vpop.permute.xlu0 %389  ;;  %v940_v55 = vmul.f32 %v2449_v45, %v938_v20 }
  0xe3   : > { %1002 = vrot.lane.b32.xlu1 %v2308_v17, %s1953_s24  ;;  %v392_v48 = vmul.f32 %v2449_v45, %v390_v21  ;;  %v943_v21 = vmul.f32 %v2194_v3, %v2464_v51 }
  0xe4   : > { %867 = vrot.lane.b32.xlu0 %v2260_v13, %s1953_s24  ;;  %v941_v20 = vadd.f32 %v940_v55, %v934_v54  ;;  %v412_v54 = vmul.f32 %v2478_v58, %v2188_v1 }
  0xe5   : > { %v2364_v22 = vpop.permute.xlu1 %398  ;;  %v393_v56 = vadd.f32 %v392_v48, %v386_v47  ;;  %v529_v47 = vmul.f32 %v2451_v46, %v2228_v9  ;;  %v821_v48 = vmul.f32 %v2478_v58, %v2191_v2 }
  0xe6   : > { %v803_v23 = vpop.permute.xlu0 %802 }
  0xe7   : > { %716 = vrot.lane.b32.xlu1 %v2204_v5, %s1954_s26  ;;  %v805_v53 = vmul.f32 %v2449_v45, %v803_v23  ;;  %v2494_v23 = vld [vmem:[#allocation6 + $0x18] sm:$0xff] }
  0xe8   : > { %581 = vrot.lane.b32.xlu0 %v2238_v11, %s1954_s26  ;;  %3184 = vst [vmem:[#allocation31_spill] sm:$0xff] %v2494_v23 }
  0xe9   : > { %v2370_v24 = vpop.permute.xlu1 %945  ;;  %v806_v62 = vadd.f32 %v805_v53, %v799_v52  ;;  %v397_v52 = vadd.f32 %v396_v57, %v393_v56  ;;  %v402_v53 = vmul.f32 %v2484_v61, %v2364_v22  ;;  %v956_v22 = vmul.f32 %v2185_v0, %v2478_v58  ;;  %v2516_v57 = vld [vmem:[#allocation6 + $0x38] sm:$0xff] }
  0xea   : > { %v2372_v25 = vpop.permute.xlu0 %810 }
  0xeb   : > { %1215 = vrot.lane.b32.xlu1 %v2350_v19, %s1954_s26  ;;  %v809_v5 = vadd.f32 %v808_v63, %v806_v62  ;;  %v813_v56 = vmul.f32 %v2372_v25, %v2484_v61  ;;  %v403_v63 = vadd.f32 %v402_v53, %v397_v52  ;;  %v2548_v52 = vld [vmem:[#allocation6 + $0x28] sm:$0xff] }
  0xec   : > { %1121 = vrot.lane.b32.xlu0 %v2350_v19, %s1954_s26 }
  0xed   : > { %v2378_v26 = vpop.permute.xlu1 %815 }
  0xee   : > { %v2380_v27 = vpop.permute.xlu0 %404  ;;  %v818_v25 = vmul.f32 %v2494_v23, %v2378_v26 }
  0xef   : > { %470 = vrot.lane.b32.xlu1 %v2298_v15, %s1954_s26 }
  0xf0   : > { %317 = vrot.lane.b32.xlu0 %v2249_v12, %s1954_s26 }
  0xf1   : > { %v2386_v28 = vpop.permute.xlu1 %532 }
  0xf2   : > { %v2388_v29 = vpop.permute.xlu0 %950  ;;  %v535_v0 = vmul.f32 %v2449_v45, %v2386_v28  ;;  %v2552_v28 = vmul.f32 %v2516_v57, %v2263_v14 }
  0xf3   : > { %721 = vrot.lane.b32.xlu1 %v2191_v2, %s1953_s24  ;;  %v953_v62 = vmul.f32 %v2388_v29, %v2494_v23  ;;  %v814_v29 = vadd.f32 %v813_v56, %v809_v5  ;;  %v2566_v5 = vld [vmem:[#allocation6 + $0x50] sm:$0xff] }
  0xf4   : > { %586 = vrot.lane.b32.xlu0 %v2228_v9, %s1953_s24  ;;  %v2568_v56 = vld [vmem:[#allocation6 + $0x30] sm:$0xff] }
  0xf5   : > { %v2394_v30 = vpop.permute.xlu1 %1072 }
  0xf6   : > { %v2396_v31 = vpop.permute.xlu0 %667 }
  0xf7   : > { %1010 = vrot.lane.b32.xlu1 %v2308_v17, %s1954_s26  ;;  %v1069_v17 = vmul.f32 %v2343_v18, %v2451_v46 }
  0xf8   : > { %875 = vrot.lane.b32.xlu0 %v2260_v13, %s1954_s26 }
  0xf9   : > { %v2402_v32 = vpop.permute.xlu1 %823 }
  0xfa   : > { %v2404_v33 = vpop.permute.xlu0 %414 }
  0xfb   : > { %1220 = vrot.lane.b32.xlu1 %v2343_v18, %s1953_s24 }
  0xfc   : > { %1126 = vrot.lane.b32.xlu0 %v2343_v18, %s1953_s24 }
  0xfd   : > { %v2410_v34 = vpop.permute.xlu1 %421 }
  0xfe   : > { %v2412_v35 = vpop.permute.xlu0 %958 }
  0xff   : > { %477 = vrot.lane.b32.xlu1 %v2238_v11, %s1953_s24 }
 0x100   : > { %325 = vrot.lane.b32.xlu0 %v2222_v7, %s1953_s24 }
 0x101   : > { %v2418_v36 = vpop.permute.xlu1 %675 }
 0x102   : > { %v2420_v37 = vpop.permute.xlu0 %540 }
 0x103   : > { %726 = vrot.lane.b32.xlu1 %v2191_v2, %s1954_s26 }
 0x104   : > { %591 = vrot.lane.b32.xlu0 %v2228_v9, %s1954_s26 }
 0x105   : > { %v2426_v38 = vpop.permute.xlu1 %964 }
 0x106   : > { %v2428_v39 = vpop.permute.xlu0 %829 }
 0x107   : > { %1017 = vrot.lane.b32.xlu1 %v2350_v19, %s1953_s24 }
 0x108   : > { %882 = vrot.lane.b32.xlu0 %v2235_v10, %s1953_s24 }
 0x109   : > { %v2434_v40 = vpop.permute.xlu1 %545 }
 0x10a   : > { %v2436_v41 = vpop.permute.xlu0 %1080 }
 0x10b   : > { %597 = vrot.lane.b32.xlu1 %v2301_v16, %s1953_s24 }
 0x10c   : > { %1131 = vrot.lane.b32.xlu0 %v2343_v18, %s1954_s26 }
 0x10d   : > { %v2445_v43 = vpop.permute.xlu1 %1085 }
 0x10e   : > { %v2447_v44 = vpop.permute.xlu0 %680 }
 0x10f   : > { %1137 = vrot.lane.b32.xlu1 %v2443_v42, %s1953_s24 }
 0x110   : > { %732 = vrot.lane.b32.xlu0 %v2263_v14, %s1953_s24 }
 0x111   : > { %v2460_v49 = vpop.permute.xlu1 %837 }
 0x112   : > { %3179 = vst [vmem:[#allocation26_spill] sm:$0xff] %v2460_v49  ;;  %v2462_v50 = vpop.permute.xlu0 %431  ;;  %v948_v49 = vmul.f32 %v2370_v24, %v2484_v61  ;;  %v944_v24 = vadd.f32 %v943_v21, %v941_v20 }
 0x113   : > { %3180 = vst [vmem:[#allocation27_spill] sm:$0xff] %v2462_v50  ;;  %335 = vrot.lane.b32.xlu1 %v2222_v7, %s1954_s26  ;;  %v408_v50 = vmul.f32 %v2494_v23, %v2380_v27  ;;  %v673_v27 = vmul.f32 %v2238_v11, %v2464_v51 }
 0x114   : > { %1228 = vrot.lane.b32.xlu0 %v2343_v18, %s1954_s26  ;;  %v949_v21 = vadd.f32 %v948_v49, %v944_v24  ;;  %v2576_v24 = vmul.f32 %v2225_v8, %v2478_v58 }
 0x115   : > { %v2482_v60 = vpop.permute.xlu1 %278  ;;  %v409_v53 = vadd.f32 %v408_v50, %v403_v63  ;;  %v2572_v50 = vmul.f32 %v2478_v58, %v2228_v9  ;;  %v536_v63 = vadd.f32 %v535_v0, %v529_v47  ;;  %v2594_v0 = vmul.f32 %v2222_v7, %v2566_v5 }
 0x116   : > { %v2480_v59 = vpop.permute.xlu0 %972  ;;  %v954_v49 = vadd.f32 %v953_v62, %v949_v21  ;;  %v543_v47 = vmul.f32 %v2420_v37, %v2484_v61  ;;  %v548_v37 = vmul.f32 %v2494_v23, %v2434_v40  ;;  %v1083_v40 = vmul.f32 %v2436_v41, %v2484_v61 }
 0x117   : > { %3183 = vst [vmem:[#allocation30_spill] sm:$0xff] %v2480_v59  ;;  %890 = vrot.lane.b32.xlu1 %v2235_v10, %s1954_s26 }
 0x118   : > { %485 = vrot.lane.b32.xlu0 %v2238_v11, %s1954_s26  ;;  %v670_v11 = vmul.f32 %v2449_v45, %v2396_v31  ;;  %v819_v31 = vadd.f32 %v818_v25, %v814_v29  ;;  %v276_v25 = vmul.f32 %v2451_v46, %v2188_v1  ;;  %v425_v1 = vmul.f32 %v2568_v56, %v2410_v34 }
 0x119   : > { %v2508_v59 = vpop.permute.xlu1 %553 }
 0x11a   : > { %v2506_v55 = vpop.permute.xlu0 %438  ;;  %3186 = vst [vmem:[#allocation33_spill] sm:$0xff] %v2508_v59  ;;  %v538_v59 = vmul.f32 %v2222_v7, %v2464_v51 }
 0x11b   : > { %3185 = vst [vmem:[#allocation32_spill] sm:$0xff] %v2506_v55  ;;  %v664_v55 = vmul.f32 %v2451_v46, %v2191_v2  ;;  %1234 = vrot.lane.b32.xlu1 %v2443_v42, %s1953_s24  ;;  %v2540_v2 = vmul.f32 %v2516_v57, %v2249_v12  ;;  %v2556_v12 = vmul.f32 %v2260_v13, %v2516_v57 }
 0x11c   : > { %1025 = vrot.lane.b32.xlu0 %v2350_v19, %s1954_s26  ;;  %v1078_v19 = vmul.f32 %v2235_v10, %v2464_v51  ;;  %v2560_v51 = vmul.f32 %v2478_v58, %v2215_v6  ;;  %v1075_v13 = vmul.f32 %v2394_v30, %v2449_v45  ;;  %v418_v10 = vmul.f32 %v2548_v52, %v2404_v33  ;;  %v2616_v58 = vld [vmem:[#allocation6 + $0x48] sm:$0xff] }
 0x11d   : > { %v2544_v26 = vpop.permute.xlu1 %843  ;;  %v671_v29 = vadd.f32 %v670_v11, %v664_v55  ;;  %v2598_v30 = vmul.f32 %v2194_v3, %v2566_v5  ;;  %v413_v33 = vadd.f32 %v412_v54, %v409_v53  ;;  %v826_v11 = vmul.f32 %v2548_v52, %v2402_v32 }
 0x11e   : > { %v2542_v20 = vpop.permute.xlu0 %688  ;;  %v957_v55 = vadd.f32 %v956_v22, %v954_v49  ;;  %v2612_v54 = vmul.f32 %v2516_v57, %v2298_v15  ;;  %v1076_v53 = vadd.f32 %v1075_v13, %v1069_v17  ;;  %v539_v7 = vadd.f32 %v538_v59, %v536_v63  ;;  %v2626_v59 = vld [vmem:[#allocation6 + $0x40] sm:$0xff] }
 0x11f   : > { %490 = vrot.lane.b32.xlu1 %v2228_v9, %s1953_s24  ;;  %v2590_v9 = vmul.f32 %v2197_v4, %v2566_v5  ;;  %v822_v4 = vadd.f32 %v821_v48, %v819_v31  ;;  %v419_v34 = vadd.f32 %v418_v10, %v413_v33  ;;  %v961_v48 = vmul.f32 %v2412_v35, %v2548_v52 }
 0x120   : > { %341 = vrot.lane.b32.xlu0 %v2215_v6, %s1953_s24  ;;  %v674_v32 = vadd.f32 %v673_v27, %v671_v29  ;;  %v678_v22 = vmul.f32 %v2418_v36, %v2484_v61  ;;  %v832_v13 = vmul.f32 %v2428_v39, %v2568_v56  ;;  %v544_v17 = vadd.f32 %v543_v47, %v539_v7  ;;  %v2639_v27 = vld [vmem:[%s2174_s9 + $0x38] sm:$0xff] }
 0x121   : > { %v2586_v21 = vpop.permute.xlu1 %1093  ;;  %v426_v10 = vadd.f32 %v425_v1, %v419_v34  ;;  %v827_v35 = vadd.f32 %v826_v11, %v822_v4  ;;  %v967_v36 = vmul.f32 %v2426_v38, %v2568_v56  ;;  %v683_v39 = vmul.f32 %v2494_v23, %v2447_v44  ;;  %v3187_v44 = vld [vmem:[#allocation27_spill] sm:$0xff]  ;;  %v3188_v34 = vld [vmem:[#allocation33_spill] sm:$0xff] }
 0x122   : > { %v2584_v62 = vpop.permute.xlu0 %978  ;;  %v282_v7 = vmul.f32 %v2616_v58, %v2482_v60  ;;  %v549_v41 = vadd.f32 %v548_v37, %v544_v17  ;;  %v1079_v31 = vadd.f32 %v1078_v19, %v1076_v53  ;;  %v1088_v49 = vmul.f32 %v2445_v43, %v2494_v23  ;;  %v2652_v53 = vld [vmem:[#allocation6 + $0x58] sm:$0xff]  ;;  %v3189_v43 = vld [vmem:[#allocation15_spill] sm:$0xff] }
 0x123   : > { %740 = vrot.lane.b32.xlu1 %v2263_v14, %s1954_s26  ;;  %v2645_v33 = vmul.f32 %v2516_v57, %v2301_v16  ;;  %v962_v38 = vadd.f32 %v961_v48, %v957_v55  ;;  %v679_v1 = vadd.f32 %v678_v22, %v674_v32  ;;  %v833_v47 = vadd.f32 %v832_v13, %v827_v35  ;;  %v3190_v22 = vld [vmem:[#allocation32_spill] sm:$0xff] }
 0x124   : > { %605 = vrot.lane.b32.xlu0 %v2301_v16, %s1954_s26  ;;  %v435_v4 = vmul.f32 %v2626_v59, %v3187_v44  ;;  %v1084_v60 = vadd.f32 %v1083_v40, %v1079_v31  ;;  %v430_v11 = vadd.f32 %v2540_v2, %v426_v10  ;;  %v556_v19 = vmul.f32 %v2548_v52, %v3188_v34  ;;  %v3191_v10 = vld [vmem:[#allocation26_spill] sm:$0xff] }
 0x125   : > { %v695_v14 = vpop.permute.xlu1 %694  ;;  %v2659_v55 = vrot.slane %v2639_v27, 7  ;;  %v968_v37 = vadd.f32 %v967_v36, %v962_v38  ;;  %v684_v48 = vadd.f32 %v683_v39, %v679_v1  ;;  %v283_v32 = vadd.f32 %v282_v7, %v276_v25  ;;  %v3192_v36 = vld [vmem:[#allocation30_spill] sm:$0xff] }
 0x126   : > { %v560_v45 = vpop.permute.xlu0 %559  ;;  %v441_v2 = vmul.f32 %v3190_v22, %v2616_v58  ;;  %v1089_v13 = vadd.f32 %v1088_v49, %v1084_v60  ;;  %v840_v17 = vmul.f32 %v2626_v59, %v3191_v10  ;;  %v552_v40 = vadd.f32 %v2560_v51, %v549_v41 }
 0x127   : > { %1030 = vrot.lane.b32.xlu1 %v2343_v18, %s1953_s24  ;;  %v562_v35 = vmul.f32 %v560_v45, %v2568_v56  ;;  %v836_v34 = vadd.f32 %v2552_v28, %v833_v47  ;;  %v436_v23 = vadd.f32 %v435_v4, %v430_v11  ;;  %v975_v39 = vmul.f32 %v3192_v36, %v2626_v59  ;;  %v2679_v45 = vld [vmem:[#allocation6 + $0x60] sm:$0xff] }
 0x128   : > { %895 = vrot.lane.b32.xlu0 %v2225_v8, %s1953_s24  ;;  %v557_v7 = vadd.f32 %v556_v19, %v552_v40  ;;  %v691_v49 = vmul.f32 %v2548_v52, %v2542_v20  ;;  %v846_v38 = vmul.f32 %v2544_v26, %v2616_v58  ;;  %v971_v51 = vadd.f32 %v2556_v12, %v968_v37  ;;  %v1760_v12 = vld [vmem:[#allocation8 + $0x4] ss:$8 sps:$4 sm:$0xff]  }
 0x129   : > { %v289_v29 = vpop.permute.xlu1 %288  ;;  %v442_v28 = vadd.f32 %v441_v2, %v436_v23  ;;  %v687_v41 = vadd.f32 %v2572_v50, %v684_v48  ;;  %v841_v1 = vadd.f32 %v840_v17, %v836_v34  ;;  %v1092_v20 = vadd.f32 %v2576_v24, %v1089_v13  ;;  %1415 = vmatprep.subr.bf16.mxu0 %v1760_v12  ;;  %v3193_v36 = vld [vmem:[#allocation18_spill] sm:$0xff] }
 0x12a   : > { %v1100_v63 = vpop.permute.xlu0 %1099  ;;  %v292_v25 = vmul.f32 %v2652_v53, %v289_v29  ;;  %v287_v29 = vadd.f32 %v2590_v9, %v283_v32  ;;  %v563_v47 = vadd.f32 %v562_v35, %v557_v7  ;;  %v697_v26 = vmul.f32 %v695_v14, %v2568_v56  ;;  %v1762_v14 = vld [vmem:[#allocation8] ss:$8 sps:$4 sm:$0xff]   ;;  %1670 = vmatprep.subr.bf16.mxu1 %v1760_v12  ;;  %v1763_v35 = vld [vmem:[#allocation8 + $0x14] ss:$8 sps:$4 sm:$0xff]  }
 0x12b   : > { %612 = vrot.lane.b32.xlu1 %v3189_v43, %s1953_s24  ;;  %v976_v11 = vadd.f32 %v975_v39, %v971_v51  ;;  %v692_v23 = vadd.f32 %v691_v49, %v687_v41  ;;  %v847_v37 = vadd.f32 %v846_v38, %v841_v1  ;;  %v1096_v9 = vmul.f32 %v2586_v21, %v2548_v52  ;;  %v3194_v39 = vld [vmem:[#allocation17_spill] sm:$0xff] }
 0x12c   : > { %1145 = vrot.lane.b32.xlu0 %v2443_v42, %s1954_s26  ;;  %v293_v19 = vadd.f32 %v292_v25, %v287_v29  ;;  %v981_v50 = vmul.f32 %v2584_v62, %v2616_v58  ;;  %v445_v24 = vadd.f32 %v2594_v0, %v442_v28  ;;  %v1102_v2 = vmul.f32 %v1100_v63, %v2568_v56  ;;  %v3195_v28 = vld [vmem:[#allocation23_spill] sm:$0xff] }
 0x12d   : > { %v852_v44 = vpop.permute.xlu1 %851  ;;  %v698_v32 = vadd.f32 %v697_v26, %v692_v23  ;;  %v566_v13 = vadd.f32 %v2612_v54, %v563_v47  ;;  %1416 = vmatpush1.bf16.msra.mxu0 %v1762_v14  ;;  %1678 = vmatpush1.bf16.msra.mxu1 %v1762_v14  ;;  %v850_v34 = vadd.f32 %v2598_v30, %v847_v37  ;;  %v1765_v54 = vld [vmem:[#allocation8 + $0x10] ss:$8 sps:$4 sm:$0xff]   ;;  %v1766_v47 = vld [vmem:[#allocation8 + $0x24] ss:$8 sps:$4 sm:$0xff]   ;;  %v1769_v37 = vld [vmem:[#allocation8 + $0x34] ss:$8 sps:$4 sm:$0xff]  }
 0x12e   : > { %v447_v31 = vpop.permute.xlu0 %446  ;;  %v854_v40 = vmul.f32 %v852_v44, %v2652_v53  ;;  %v984_v63 = vmul.f32 %v3193_v36, %v2566_v5  ;;  %v982_v25 = vadd.f32 %v981_v50, %v976_v11  ;;  %1417 = vmatprep.subr.bf16.mxu0 %v1763_v35  ;;  %1671 = vmatprep.subr.bf16.mxu1 %v1763_v35  ;;  %v1771_v14 = vld [vmem:[#allocation8 + $0x30] ss:$8 sps:$4 sm:$0xff]  }
 0x12f   : > { %1152 = vrot.lane.b32.xlu1 %v2659_v55, %s1953_s24  ;;  %v449_v22 = vmul.f32 %v447_v31, %v2652_v53  ;;  %v1097_v31 = vadd.f32 %v1096_v9, %v1092_v20  ;;  %v701_v30 = vadd.f32 %v2645_v33, %v698_v32  ;;  %v1105_v41 = vmul.f32 %v3195_v28, %v2516_v57  ;;  %v1768_v33 = vld [vmem:[#allocation8 + $0x20] ss:$8 sps:$4 sm:$0xff]   ;;  %v2729_v9 = vld [vmem:[#allocation6 + $0x70] sm:$0xff] }
 0x130   : > { %747 = vrot.lane.b32.xlu0 %v2194_v3, %s1953_s24  ;;  %v855_v29 = vadd.f32 %v854_v40, %v850_v34  ;;  %v985_v26 = vadd.f32 %v984_v63, %v982_v25  ;;  %v1775_v63 = vld [vmem:[#allocation8 + $0x54] ss:$8 sps:$4 sm:$0xff]  }
 0x131   : > { %v295_v60 = vpop.permute.xlu1 %294  ;;  %v1103_v49 = vadd.f32 %v1102_v2, %v1097_v31  ;;  %1418 = vmatpush1.bf16.msra.mxu0 %v1765_v54  ;;  %1679 = vmatpush1.bf16.msra.mxu1 %v1765_v54 }
 0x132   : > { %v987_v4 = vpop.permute.xlu0 %986  ;;  %v298_v10 = vmul.f32 %v2679_v45, %v295_v60  ;;  %1419 = vmatprep.subr.bf16.mxu0 %v1766_v47  ;;  %1672 = vmatprep.subr.bf16.mxu1 %v1766_v47  ;;  %v1781_v47 = vld [vmem:[#allocation8 + $0x74] ss:$8 sps:$4 sm:$0xff]  }
 0x133   : > { %351 = vrot.lane.b32.xlu1 %v2215_v6, %s1954_s26  ;;  %v450_v6 = vadd.f32 %v449_v22, %v445_v24  ;;  %v1106_v12 = vadd.f32 %v1105_v41, %v1103_v49  ;;  %v1780_v41 = vld [vmem:[#allocation8 + $0x60] ss:$8 sps:$4 sm:$0xff]  }
 0x134   : > { %1242 = vrot.lane.b32.xlu0 %v2443_v42, %s1954_s26  ;;  %v2697_v48 = vadd.f32 %v298_v10, %v293_v19 }
 0x135   : > { %v568_v17 = vpop.permute.xlu1 %567  ;;  %1420 = vmatpush1.bf16.msra.mxu0 %v1768_v33  ;;  %1680 = vmatpush1.bf16.msra.mxu1 %v1768_v33  ;;  %v3197_v33 = vld [vmem:[#allocation13_spill] sm:$0xff] }
 0x136   : > { %v452_v21 = vpop.permute.xlu0 %451  ;;  %v570_v0 = vmul.f32 %v2626_v59, %v568_v17  ;;  %1421 = vmatprep.subr.bf16.mxu0 %v1769_v37  ;;  %1673 = vmatprep.subr.bf16.mxu1 %v1769_v37  ;;  %v1772_v17 = vld [vmem:[#allocation8 + $0x44] ss:$8 sps:$4 sm:$0xff]   ;;  %v3153_v37 = vmov 0  }
 0x137   : > { %v454_v62 = vmul.f32 %v452_v21, %v2679_v45  ;;  %903 = vrot.lane.b32.xlu1 %v2225_v8, %s1954_s26  ;;  %v989_v8 = vmul.f32 %v987_v4, %v2652_v53  ;;  %1447 = vmatprep.mubr.bf16.mxu0 %v3153_v37 }
 0x138   : > { %498 = vrot.lane.b32.xlu0 %v3194_v39, %s1954_s26  ;;  %v2711_v7 = vadd.f32 %v570_v0, %v566_v13  ;;  %v1777_v39 = vld [vmem:[#allocation8 + $0x50] ss:$8 sps:$4 sm:$0xff]   ;;  %1467 = vmatprep.mubr.bf16.mxu1 %v3153_v37 }
 0x139   : > { %v455_v44 = vadd.f32 %v454_v62, %v450_v6  ;;  %v857_v51 = vpop.permute.xlu1 %856  ;;  %v990_v4 = vadd.f32 %v989_v8, %v985_v26  ;;  %1422 = vmatpush1.bf16.msra.mxu0 %v1771_v14  ;;  %1681 = vmatpush1.bf16.msra.mxu1 %v1771_v14  ;;  %v1774_v6 = vld [vmem:[#allocation8 + $0x40] ss:$8 sps:$4 sm:$0xff]  }
 0x13a   : > { %v703_v38 = vpop.permute.xlu0 %702  ;;  %v859_v20 = vmul.f32 %v857_v51, %v2679_v45  ;;  %1423 = vmatprep.subr.bf16.mxu0 %v1772_v17  ;;  %1674 = vmatprep.subr.bf16.mxu1 %v1772_v17  ;;  %v3196_v51 = vld [vmem:[#allocation14_spill] sm:$0xff]  ;;  %v2756_v26 = vld [vmem:[#allocation6 + $0x78] sm:$0xff] }
 0x13b   : > { %v705_v1 = vmul.f32 %v2626_v59, %v703_v38  ;;  %1248 = vrot.lane.b32.xlu1 %v2659_v55, %s1953_s24  ;;  %3198 = vst [vmem:[#allocation27_spill] sm:$0xff] %v2756_v26 }
 0x13c   : > { %1038 = vrot.lane.b32.xlu0 %v2343_v18, %s1954_s26  ;;  %v860_v11 = vadd.f32 %v859_v20, %v855_v29 }
 0x13d   : > { %v706_v60 = vadd.f32 %v705_v1, %v701_v30  ;;  %v1108_v22 = vpop.permute.xlu1 %1107  ;;  %1424 = vmatpush1.bf16.msra.mxu0 %v1774_v6  ;;  %1682 = vmatpush1.bf16.msra.mxu1 %v1774_v6  ;;  %v1778_v30 = vld [vmem:[#allocation8 + $0x64] ss:$8 sps:$4 sm:$0xff]  }
 0x13e   : > { %v992_v19 = vpop.permute.xlu0 %991  ;;  %v1110_v23 = vmul.f32 %v1108_v22, %v2626_v59  ;;  %1425 = vmatprep.subr.bf16.mxu0 %v1775_v63  ;;  %1675 = vmatprep.subr.bf16.mxu1 %v1775_v63  ;;  %v3201_v63 = vld [vmem:[#allocation24_spill] sm:$0xff] }
 0x13f   : > { %v994_v10 = vmul.f32 %v992_v19, %v2679_v45  ;;  %504 = vrot.lane.b32.xlu1 %v2301_v16, %s1953_s24 }
 0x140   : > { %358 = vrot.lane.b32.xlu0 %v2298_v15, %s1953_s24  ;;  %v1111_v24 = vadd.f32 %v1110_v23, %v1106_v12 }
 0x141   : > { %v995_v50 = vadd.f32 %v994_v10, %v990_v4  ;;  %v457_v2 = vpop.permute.xlu1 %456  ;;  %1426 = vmatpush1.bf16.msra.mxu0 %v1777_v39  ;;  %1683 = vmatpush1.bf16.msra.mxu1 %v1777_v39  ;;  %v3202_v39 = vld [vmem:[#allocation28_spill] sm:$0xff] }
 0x142   : > { %v301_v32 = vpop.permute.xlu0 %300  ;;  %v459_v13 = vmul.f32 %v457_v2, %v2729_v9  ;;  %1427 = vmatprep.subr.bf16.mxu0 %v1778_v30  ;;  %1676 = vmatprep.subr.bf16.mxu1 %v1778_v30  ;;  %v714_v2 = vmul.f32 %v3189_v43, %v2566_v5 }
 0x143   : > { %v304_v21 = vmul.f32 %v2729_v9, %v301_v32  ;;  %755 = vrot.lane.b32.xlu1 %v2194_v3, %s1954_s26 }
 0x144   : > { %620 = vrot.lane.b32.xlu0 %v3189_v43, %s1954_s26  ;;  %v460_v62 = vadd.f32 %v459_v13, %v455_v44  ;;  %v3200_v13 = vld [vmem:[#allocation25_spill] sm:$0xff] }
 0x145   : > { %v305_v40 = vadd.f32 %v304_v21, %v2697_v48  ;;  %v709_v35 = vpop.permute.xlu1 %708  ;;  %1428 = vmatpush1.bf16.msra.mxu0 %v1780_v41  ;;  %1684 = vmatpush1.bf16.msra.mxu1 %v1780_v41  ;;  %v1204_v21 = vmul.f32 %v2639_v27, %v2451_v46  ;;  %v1119_v46 = vmul.f32 %v3201_v63, %v2566_v5  ;;  %v2785_v41 = vld [vmem:[#allocation6 + $0x80] sm:$0xff] }
 0x146   : > { %v574_v0 = vpop.permute.xlu0 %573  ;;  %v711_v34 = vmul.f32 %v709_v35, %v2616_v58  ;;  %1429 = vmatprep.subr.bf16.mxu0 %v1781_v47  ;;  %1677 = vmatprep.subr.bf16.mxu1 %v1781_v47 }
 0x147   : > { %v576_v31 = vmul.f32 %v574_v0, %v2616_v58  ;;  %1044 = vrot.lane.b32.xlu1 %v2443_v42, %s1953_s24 }
 0x148   : > { %909 = vrot.lane.b32.xlu0 %v3195_v28, %s1953_s24  ;;  %v712_v54 = vadd.f32 %v711_v34, %v706_v60  ;;  %v1783_v60 = vld [vmem:[#allocation8 + $0x70] ss:$8 sps:$4 sm:$0xff]  }
 0x149   : > { %v577_v48 = vadd.f32 %v576_v31, %v2711_v7  ;;  %v997_v44 = vpop.permute.xlu1 %996  ;;  %1430 = vmatpush1.bf16.msra.mxu0 %v1783_v60  ;;  %1685 = vmatpush1.bf16.msra.mxu1 %v1783_v60 }
 0x14a   : > { %v862_v25 = vpop.permute.xlu0 %861  ;;  %v999_v38 = vmul.f32 %v997_v44, %v2729_v9 }
 0x14b   : > { %v864_v49 = vmul.f32 %v862_v25, %v2729_v9  ;;  %625 = vrot.lane.b32.xlu1 %v3196_v51, %s1953_s24  ;;  %v1213_v25 = vmul.f32 %v3201_v63, %v3202_v39 }
 0x14c   : > { %1160 = vrot.lane.b32.xlu0 %v2659_v55, %s1954_s26  ;;  %v1000_v29 = vadd.f32 %v999_v38, %v995_v50  ;;  %v715_v38 = vadd.f32 %v714_v2, %v712_v54  ;;  %v468_v54 = vmul.f32 %v2298_v15, %v2785_v41 }
 0x14d   : > { %v865_v7 = vadd.f32 %v864_v49, %v860_v11  ;;  %v1208_v1 = vpop.permute.xlu1 %1207 }
 0x14e   : > { %v1114_v8 = vpop.permute.xlu0 %1113  ;;  %v1210_v17 = vmul.f32 %v1208_v1, %v3200_v13  ;;  %v3203_v1 = vld [vmem:[#allocation20_spill] sm:$0xff] }
 0x14f   : > { %v1116_v20 = vmul.f32 %v1114_v8, %v2616_v58  ;;  %1165 = vrot.lane.b32.xlu1 %v2639_v27, %s1953_s24 }
 0x150   : > { %760 = vrot.lane.b32.xlu0 %v3197_v33, %s1953_s24  ;;  %v1211_v44 = vadd.f32 %v1210_v17, %v1204_v21 }
 0x151   : > { %v1117_v11 = vadd.f32 %v1116_v20, %v1111_v24  ;;  %v463_v22 = vpop.permute.xlu1 %462  ;;  %v3199_v24 = vld [vmem:[#allocation19_spill] sm:$0xff]  ;;  %v315_v20 = vmul.f32 %v3203_v1, %v2785_v41 }
 0x152   : > { %v308_v19 = vpop.permute.xlu0 %307  ;;  %v465_v10 = vmul.f32 %v463_v22, %v2756_v26  ;;  %v579_v32 = vmul.f32 %v3199_v24, %v2566_v5 }
 0x153   : > { %v311_v4 = vmul.f32 %v2756_v26, %v308_v19  ;;  %368 = vrot.lane.b32.xlu1 %v2298_v15, %s1954_s26  ;;  %v1120_v47 = vadd.f32 %v1119_v46, %v1117_v11  ;;  %v1214_v19 = vadd.f32 %v1213_v25, %v1211_v44 }
 0x154   : > { %1256 = vrot.lane.b32.xlu0 %v2659_v55, %s1954_s26  ;;  %v466_v23 = vadd.f32 %v465_v10, %v460_v62  ;;  %v580_v31 = vadd.f32 %v579_v32, %v577_v48 }
 0x155   : > { %v312_v12 = vadd.f32 %v311_v4, %v305_v40  ;;  %v1003_v50 = vpop.permute.xlu1 %1002  ;;  %v2801_v4 = vld [vmem:[#allocation6 + $0x88] sm:$0xff] }
 0x156   : > { %v868_v14 = vpop.permute.xlu0 %867  ;;  %v1005_v40 = vmul.f32 %v1003_v50, %v2756_v26  ;;  %v469_v21 = vadd.f32 %v468_v54, %v466_v23  ;;  %v1008_v23 = vmul.f32 %v3195_v28, %v2785_v41 }
 0x157   : > { %v870_v6 = vmul.f32 %v868_v14, %v2756_v26  ;;  %917 = vrot.lane.b32.xlu1 %v3195_v28, %s1954_s26  ;;  %v316_v2 = vadd.f32 %v315_v20, %v312_v12  ;;  %v3204_v12 = vld [vmem:[#allocation21_spill] sm:$0xff] }
 0x158   : > { %512 = vrot.lane.b32.xlu0 %v2301_v16, %s1954_s26  ;;  %v1006_v0 = vadd.f32 %v1005_v40, %v1000_v29 }
 0x159   : > { %v871_v62 = vadd.f32 %v870_v6, %v865_v7  ;;  %v717_v34 = vpop.permute.xlu1 %716 }
 0x15a   : > { %v582_v35 = vpop.permute.xlu0 %581  ;;  %v719_v30 = vmul.f32 %v717_v34, %v2652_v53  ;;  %v2820_v34 = vrot.slane %v2639_v27, 1 }
 0x15b   : > { %v584_v49 = vmul.f32 %v582_v35, %v2652_v53  ;;  %1261 = vrot.lane.b32.xlu1 %v2639_v27, %s1953_s24  ;;  %v873_v35 = vmul.f32 %v3204_v12, %v2785_v41 }
 0x15c   : > { %1052 = vrot.lane.b32.xlu0 %v2443_v42, %s1954_s26  ;;  %v720_v7 = vadd.f32 %v719_v30, %v715_v38  ;;  %v1009_v30 = vadd.f32 %v1008_v23, %v1006_v0 }
 0x15d   : > { %v585_v48 = vadd.f32 %v584_v49, %v580_v31  ;;  %v1216_v8 = vpop.permute.xlu1 %1215  ;;  %v3205_v31 = vld [vmem:[#allocation22_spill] sm:$0xff]  ;;  %v874_v49 = vadd.f32 %v873_v35, %v871_v62  ;;  %v2834_v62 = vld [vmem:[#allocation6 + $0x90] sm:$0xff] }
 0x15e   : > { %v1122_v29 = vpop.permute.xlu0 %1121  ;;  %v1218_v22 = vmul.f32 %v1216_v8, %v2484_v61 }
 0x15f   : > { %v1124_v60 = vmul.f32 %v1122_v29, %v2652_v53  ;;  %768 = vrot.lane.b32.xlu1 %v3197_v33, %s1954_s26 }
 0x160   : > { %633 = vrot.lane.b32.xlu0 %v3196_v51, %s1954_s26  ;;  %v1219_v14 = vadd.f32 %v1218_v22, %v1214_v19 }
 0x161   : > { %v1125_v10 = vadd.f32 %v1124_v60, %v1120_v47  ;;  %v471_v32 = vpop.permute.xlu1 %470 }
 0x162   : > { %v318_v50 = vpop.permute.xlu0 %317  ;;  %v473_v13 = vmul.f32 %v471_v32, %v2801_v4 }
 0x163   : > { %v321_v11 = vmul.f32 %v2801_v4, %v318_v50  ;;  %1266 = vrot.lane.b32.xlu1 %v2639_v27, %s1954_s26 }
 0x164   : > { %1173 = vrot.lane.b32.xlu0 %v2639_v27, %s1954_s26  ;;  %v474_v51 = vadd.f32 %v473_v13, %v469_v21 }
 0x165   : > { %v322_v61 = vadd.f32 %v321_v11, %v316_v2  ;;  %v722_v17 = vpop.permute.xlu1 %721 }
 0x166   : > { %v587_v33 = vpop.permute.xlu0 %586  ;;  %v724_v40 = vmul.f32 %v722_v17, %v2679_v45 }
 0x167   : > { %v589_v6 = vmul.f32 %v587_v33, %v2679_v45  ;;  %774 = vrot.lane.b32.xlu1 %v3204_v12, %s1953_s24 }
 0x168   : > { %639 = vrot.lane.b32.xlu0 %v3205_v31, %s1953_s24  ;;  %v725_v39 = vadd.f32 %v724_v40, %v720_v7  ;;  %v3206_v7 = vld [vmem:[#allocation31_spill] sm:$0xff] }
 0x169   : > { %v590_v46 = vadd.f32 %v589_v6, %v585_v48  ;;  %v1011_v44 = vpop.permute.xlu1 %1010 }
 0x16a   : > { %v876_v25 = vpop.permute.xlu0 %875  ;;  %v1013_v29 = vmul.f32 %v1011_v44, %v2801_v4 }
 0x16b   : > { %v878_v38 = vmul.f32 %v876_v25, %v2801_v4  ;;  %1272 = vrot.lane.b32.xlu1 %v2820_v34, %s1953_s24 }
 0x16c   : > { %1179 = vrot.lane.b32.xlu0 %v2820_v34, %s1953_s24  ;;  %v1014_v1 = vadd.f32 %v1013_v29, %v1009_v30 }
 0x16d   : > { %v879_v8 = vadd.f32 %v878_v38, %v874_v49  ;;  %v1221_v54 = vpop.permute.xlu1 %1220 }
 0x16e   : > { %v1127_v20 = vpop.permute.xlu0 %1126  ;;  %v1223_v47 = vmul.f32 %v1221_v54, %v3206_v7  ;;  %v3207_v54 = vld [vmem:[#allocation29_spill] sm:$0xff] }
 0x16f   : > { %v1129_v48 = vmul.f32 %v1127_v20, %v2679_v45  ;;  %782 = vrot.lane.b32.xlu1 %v3204_v12, %s1954_s26 }
 0x170   : > { %647 = vrot.lane.b32.xlu0 %v3205_v31, %s1954_s26  ;;  %v1224_v60 = vadd.f32 %v1223_v47, %v1219_v14 }
 0x171   : > { %v1130_v0 = vadd.f32 %v1129_v48, %v1125_v10  ;;  %v478_v22 = vpop.permute.xlu1 %477 }
 0x172   : > { %v326_v19 = vpop.permute.xlu0 %325  ;;  %v480_v32 = vmul.f32 %v478_v22, %v2834_v62 }
 0x173   : > { %v329_v50 = vmul.f32 %v2834_v62, %v326_v19  ;;  %1280 = vrot.lane.b32.xlu1 %v2820_v34, %s1954_s26 }
 0x174   : > { %1187 = vrot.lane.b32.xlu0 %v2820_v34, %s1954_s26  ;;  %v2844_v2 = vadd.f32 %v480_v32, %v474_v51 }
 0x175   : > { %v2842_v45 = vadd.f32 %v329_v50, %v322_v61  ;;  %v727_v21 = vpop.permute.xlu1 %726 }
 0x176   : > { %v592_v11 = vpop.permute.xlu0 %591  ;;  %v729_v14 = vmul.f32 %v727_v21, %v2729_v9 }
 0x177   : > { %v594_v10 = vmul.f32 %v592_v11, %v2729_v9 }
 0x178   : > { %v730_v33 = vadd.f32 %v729_v14, %v725_v39 }
 0x179   : > { %v595_v13 = vadd.f32 %v594_v10, %v590_v46  ;;  %v1018_v6 = vpop.permute.xlu1 %1017 }
 0x17a   : > { %v883_v17 = vpop.permute.xlu0 %882  ;;  %v1020_v35 = vmul.f32 %v1018_v6, %v2834_v62 }
 0x17b   : > { %v885_v40 = vmul.f32 %v883_v17, %v2834_v62 }
 0x17c   : > { %v2852_v61 = vadd.f32 %v1020_v35, %v1014_v1 }
 0x17d   : > { %v2850_v23 = vadd.f32 %v885_v40, %v879_v8  ;;  %v598_v25 = vpop.permute.xlu1 %597  ;;  %v1226_v8 = vmul.f32 %v2343_v18, %v3207_v54 }
 0x17e   : > { %v1132_v51 = vpop.permute.xlu0 %1131  ;;  %v600_v49 = vmul.f32 %v598_v25, %v2756_v26 }
 0x17f   : > { %v1134_v44 = vmul.f32 %v1132_v51, %v2729_v9  ;;  %v1227_v19 = vadd.f32 %v1226_v8, %v1224_v60 }
 0x180   : > { %v2856_v30 = vadd.f32 %v600_v49, %v595_v13 }
 0x181   : > { %v1135_v38 = vadd.f32 %v1134_v44, %v1130_v0  ;;  %v1138_v39 = vpop.permute.xlu1 %1137  ;;  %v2877_v44 = vld [vmem:[#allocation6 + $0x98] sm:$0xff] }
 0x182   : > { %v733_v46 = vpop.permute.xlu0 %732  ;;  %v1140_v20 = vmul.f32 %v1138_v39, %v2756_v26  ;;  %v1158_v39 = vmul.f32 %v2659_v55, %v2877_v44 }
 0x183   : > { %v735_v29 = vmul.f32 %v733_v46, %v2756_v26 }
 0x184   : > { %v1141_v48 = vadd.f32 %v1140_v20, %v1135_v38 }
 0x185   : > { %v2862_v1 = vadd.f32 %v735_v29, %v730_v33  ;;  %v336_v47 = vpop.permute.xlu1 %335 }
 0x186   : > { %v1229_v7 = vpop.permute.xlu0 %1228 }
 0x187   : > { %v1231_v22 = vmul.f32 %v1229_v7, %v2548_v52  ;;  %v1143_v52 = vmul.f32 %v2443_v42, %v2785_v41  ;;  %v1240_v7 = vmul.f32 %v2443_v42, %v2516_v57  ;;  %v3208_v57 = vld [vmem:[#allocation16_spill] sm:$0xff] }
 0x189   : > { %v1232_v0 = vadd.f32 %v1231_v22, %v1227_v19  ;;  %v891_v32 = vpop.permute.xlu1 %890  ;;  %v1144_v25 = vadd.f32 %v1143_v52, %v1141_v48 }
 0x18a   : > { %v486_v50 = vpop.permute.xlu0 %485 }
 0x18d   : > { %v1235_v21 = vpop.permute.xlu1 %1234 }
 0x18e   : > { %v2865_v11 = vpop.permute.xlu0 %1025  ;;  %v1237_v10 = vmul.f32 %v1235_v21, %v2568_v56 }
 0x190   : > { %v1238_v14 = vadd.f32 %v1237_v10, %v1232_v0 }
 0x191   : > { %v491_v17 = vpop.permute.xlu1 %490 }
 0x192   : > { %v342_v13 = vpop.permute.xlu0 %341  ;;  %v1241_v0 = vadd.f32 %v1240_v7, %v1238_v14  ;;  %v888_v7 = vmul.f32 %v3193_v36, %v2877_v44 }
 0x195   : > { %v2870_v33 = vpop.permute.xlu1 %740 }
 0x196   : > { %v2868_v18 = vpop.permute.xlu0 %605 }
 0x199   : > { %v1031_v40 = vpop.permute.xlu1 %1030 }
 0x19a   : > { %v896_v6 = vpop.permute.xlu0 %895 }
 0x19d   : > { %v2874_v35 = vpop.permute.xlu1 %612 }
 0x19e   : > { %v1146_v60 = vpop.permute.xlu0 %1145 }
 0x19f   : > { %v1148_v51 = vmul.f32 %v1146_v60, %v2801_v4 }
 0x1a1   : > { %v1153_v49 = vpop.permute.xlu1 %1152  ;;  %v1149_v38 = vadd.f32 %v1148_v51, %v1144_v25  ;;  %v1254_v51 = vmul.f32 %v2659_v55, %v2566_v5 }
 0x1a2   : > { %v2879_v56 = vpop.permute.xlu0 %747  ;;  %v1155_v46 = vmul.f32 %v1153_v49, %v2834_v62  ;;  %v2894_v49 = vld [vmem:[#allocation6 + $0xa0] sm:$0xff] }
 0x1a3   : > { %v339_v14 = vmul.f32 %v2894_v49, %v336_v47 }
 0x1a4   : > { %v1156_v29 = vadd.f32 %v1155_v46, %v1149_v38 }
 0x1a5   : > { %v352_v54 = vpop.permute.xlu1 %351 }
 0x1a6   : > { %v1243_v20 = vpop.permute.xlu0 %1242  ;;  %v2884_v8 = vadd.f32 %v1158_v39, %v1156_v29  ;;  %v333_v39 = vmul.f32 %v3208_v57, %v2877_v44 }
 0x1a7   : > { %v1245_v22 = vmul.f32 %v1243_v20, %v2626_v59  ;;  %v2900_v59 = vld [vmem:[#allocation6 + $0xa8] sm:$0xff] }
 0x1a8   : > { %v334_v55 = vadd.f32 %v333_v39, %v2842_v45  ;;  %v493_v45 = vmul.f32 %v491_v17, %v2900_v59  ;;  %v898_v57 = vmul.f32 %v896_v6, %v2900_v59  ;;  %v1784_v39 = vld [vmem:[%s2174_s9 + $0x8] sm:$0xff] }
 0x1a9   : > { %v904_v19 = vpop.permute.xlu1 %903  ;;  %v1246_v52 = vadd.f32 %v1245_v22, %v1241_v0  ;;  %v345_v22 = vmul.f32 %v2900_v59, %v342_v13  ;;  %v488_v0 = vmul.f32 %v486_v50, %v2894_v49  ;;  %v889_v13 = vadd.f32 %v888_v7, %v2850_v23  ;;  %v1785_v7 = vld [vmem:[%s2174_s9 + $0x10] sm:$0xff] }
 0x1aa   : > { %v499_v48 = vpop.permute.xlu0 %498  ;;  %v340_v47 = vadd.f32 %v339_v14, %v334_v55  ;;  %v2929_v14 = vld [vmem:[#allocation6 + $0xc0] sm:$0xff]  ;;  %v1033_v23 = vmul.f32 %v1031_v40, %v2900_v59 }
 0x1ac   : > { %v346_v50 = vadd.f32 %v345_v22, %v340_v47 }
 0x1ad   : > { %v1249_v10 = vpop.permute.xlu1 %1248 }
 0x1ae   : > { %v2889_v21 = vpop.permute.xlu0 %1038  ;;  %v1251_v60 = vmul.f32 %v1249_v10, %v2616_v58  ;;  %v483_v58 = vmul.f32 %v3199_v24, %v2877_v44  ;;  %v2914_v10 = vld [vmem:[#allocation6 + $0xb0] sm:$0xff] }
 0x1af   : > { %v496_v6 = vmul.f32 %v1785_v7, %v2914_v10  ;;  %v1787_v7 = vld [vmem:[%s2174_s9 + $0x30] sm:$0xff] }
 0x1b0   : > { %v1252_v25 = vadd.f32 %v1251_v60, %v1246_v52  ;;  %v893_v52 = vmul.f32 %v891_v32, %v2894_v49  ;;  %v484_v24 = vadd.f32 %v483_v58, %v2844_v2  ;;  %v1023_v60 = vmul.f32 %v3201_v63, %v2877_v44 }
 0x1b1   : > { %v505_v46 = vpop.permute.xlu1 %504  ;;  %v349_v32 = vmul.f32 %v1784_v39, %v2914_v10  ;;  %v1028_v63 = vmul.f32 %v2865_v11, %v2894_v49  ;;  %v1036_v26 = vmul.f32 %v1787_v7, %v2914_v10 }
 0x1b2   : > { %v359_v38 = vpop.permute.xlu0 %358  ;;  %v2898_v29 = vadd.f32 %v1254_v51, %v1252_v25  ;;  %v2921_v51 = vld [vmem:[#allocation6 + $0xb8] sm:$0xff]  ;;  %v489_v2 = vadd.f32 %v488_v0, %v484_v24  ;;  %v894_v17 = vadd.f32 %v893_v52, %v889_v13  ;;  %v1024_v55 = vadd.f32 %v1023_v60, %v2852_v61  ;;  %v1786_v24 = vld [vmem:[%s2174_s9 + $0x28] sm:$0xff] }
 0x1b3   : > { %v355_v58 = vmul.f32 %v2921_v51, %v352_v54  ;;  %v350_v11 = vadd.f32 %v349_v32, %v346_v50  ;;  %v901_v52 = vmul.f32 %v1786_v24, %v2914_v10  ;;  %v362_v54 = vmul.f32 %v2929_v14, %v359_v38  ;;  %v2944_v60 = vld [vmem:[#allocation6 + $0xc8] sm:$0xff] }
 0x1b4   : > { %v494_v37 = vadd.f32 %v493_v45, %v489_v2  ;;  %v899_v47 = vadd.f32 %v898_v57, %v894_v17  ;;  %v1029_v13 = vadd.f32 %v1028_v63, %v1024_v55  ;;  %v501_v61 = vmul.f32 %v499_v48, %v2921_v51  ;;  %v2959_v55 = vld [vmem:[#allocation6 + $0xd0] sm:$0xff] }
 0x1b5   : > { %v2907_v5 = vpop.permute.xlu1 %755  ;;  %v356_v40 = vadd.f32 %v355_v58, %v350_v11  ;;  %v906_v45 = vmul.f32 %v904_v19, %v2921_v51  ;;  %v507_v50 = vmul.f32 %v505_v46, %v2929_v14  ;;  %v366_v48 = vmul.f32 %v2298_v15, %v2944_v60 }
 0x1b6   : > { %v2905_v20 = vpop.permute.xlu0 %620  ;;  %v1034_v39 = vadd.f32 %v1033_v23, %v1029_v13  ;;  %v497_v2 = vadd.f32 %v496_v6, %v494_v37  ;;  %v902_v17 = vadd.f32 %v901_v52, %v899_v47  ;;  %v603_v19 = vmul.f32 %v2301_v16, %v2785_v41 }
 0x1b7   : > { %v363_v38 = vadd.f32 %v362_v54, %v356_v40  ;;  %v738_v37 = vmul.f32 %v3205_v31, %v2785_v41  ;;  %v1041_v23 = vmul.f32 %v2889_v21, %v2921_v51  ;;  %v510_v6 = vmul.f32 %v2301_v16, %v2944_v60 }
 0x1b8   : > { %v502_v58 = vadd.f32 %v501_v61, %v497_v2  ;;  %v907_v46 = vadd.f32 %v906_v45, %v902_v17  ;;  %v608_v15 = vmul.f32 %v2868_v18, %v2801_v4  ;;  %v743_v47 = vmul.f32 %v2870_v33, %v2801_v4 }
 0x1b9   : > { %v1045_v25 = vpop.permute.xlu1 %1044  ;;  %v1037_v11 = vadd.f32 %v1036_v26, %v1034_v39  ;;  %v367_v61 = vadd.f32 %v366_v48, %v363_v38  ;;  %v604_v40 = vadd.f32 %v603_v19, %v2856_v30  ;;  %v615_v18 = vmul.f32 %v2874_v35, %v2834_v62 }
 0x1ba   : > { %v910_v36 = vpop.permute.xlu0 %909  ;;  %v508_v24 = vadd.f32 %v507_v50, %v502_v58  ;;  %v1047_v21 = vmul.f32 %v1045_v25, %v2929_v14  ;;  %v750_v26 = vmul.f32 %v2879_v56, %v2834_v62  ;;  %v2984_v25 = vld [vmem:[%s3121_s2] ss:$0 sm:$0xff]  ;;  %v618_v48 = vmul.f32 %v3189_v43, %v2877_v44 }
 0x1bb   : > { %v912_v63 = vmul.f32 %v910_v36, %v2929_v14  ;;  %v915_v36 = vmul.f32 %v3195_v28, %v2944_v60  ;;  %v739_v28 = vadd.f32 %v738_v37, %v2862_v1  ;;  %v1042_v33 = vadd.f32 %v1041_v23, %v1037_v11 }
 0x1bc   : > { %v609_v39 = vadd.f32 %v608_v15, %v604_v40  ;;  %v511_v50 = vadd.f32 %v510_v6, %v508_v24  ;;  %v1050_v1 = vmul.f32 %v2443_v42, %v2944_v60  ;;  %v753_v19 = vmul.f32 %v2194_v3, %v2877_v44 }
 0x1bd   : > { %v2938_v0 = vpop.permute.xlu1 %625  ;;  %v913_v13 = vadd.f32 %v912_v63, %v907_v46  ;;  %v744_v2 = vadd.f32 %v743_v47, %v739_v28  ;;  %v1048_v17 = vadd.f32 %v1047_v21, %v1042_v33  ;;  %v623_v42 = vmul.f32 %v2905_v20, %v2894_v49  ;;  %v1788_v33 = vld [vmem:[%s2174_s9 + $0x18] sm:$0xff] }
 0x1be   : > { %v2936_v22 = vpop.permute.xlu0 %1160  ;;  %v616_v56 = vadd.f32 %v615_v18, %v609_v39  ;;  %v628_v44 = vmul.f32 %v2938_v0, %v2900_v59 }
 0x1bf   : > { %v916_v38 = vadd.f32 %v915_v36, %v913_v13  ;;  %v751_v63 = vadd.f32 %v750_v26, %v744_v2  ;;  %v758_v36 = vmul.f32 %v2907_v5, %v2894_v49  ;;  %v1051_v47 = vadd.f32 %v1050_v1, %v1048_v17 }
 0x1c0   : > { %v619_v11 = vadd.f32 %v618_v48, %v616_v56  ;;  %v1163_v5 = vmul.f32 %v2936_v22, %v2894_v49  ;;  %v1263_v22 = vld [vmem:[#allocation6 + $0x60] sm:$0xff]  ;;  %v1171_v48 = vmul.f32 %v2639_v27, %v2914_v10 }
 0x1c1   : > { %v2950_v32 = vpop.permute.xlu1 %1165  ;;  %v754_v3 = vadd.f32 %v753_v19, %v751_v63 }
 0x1c2   : > { %v761_v57 = vpop.permute.xlu0 %760  ;;  %v624_v40 = vadd.f32 %v623_v42, %v619_v11  ;;  %v1168_v0 = vmul.f32 %v2950_v32, %v2900_v59 }
 0x1c3   : > { %v763_v24 = vmul.f32 %v761_v57, %v2900_v59  ;;  %v759_v28 = vadd.f32 %v758_v36, %v754_v3  ;;  %v631_v57 = vmul.f32 %v1788_v33, %v2914_v10  ;;  %v3209_v59 = vmov 0  }
 0x1c4   : > { %v629_v2 = vadd.f32 %v628_v44, %v624_v40  ;;  %v1185_v3 = vmul.f32 %v2820_v34, %v2944_v60 }
 0x1c5   : > { %v369_v54 = vpop.permute.xlu1 %368 }
 0x1c6   : > { %v2971_v52 = vpop.permute.xlu0 %1256  ;;  %v372_v16 = vmul.f32 %v2959_v55, %v369_v54  ;;  %v632_v19 = vadd.f32 %v631_v57, %v629_v2 }
 0x1c7   : > { %v1259_v1 = vmul.f32 %v2971_v52, %v2652_v53  ;;  %v645_v53 = vmul.f32 %v3205_v31, %v2944_v60 }
 0x1c8   : > { %v373_v45 = vadd.f32 %v372_v16, %v367_v61 }
 0x1c9   : > { %v918_v30 = vpop.permute.xlu1 %917 }
 0x1ca   : > { %v513_v7 = vpop.permute.xlu0 %512  ;;  %v920_v62 = vmul.f32 %v918_v30, %v2959_v55  ;;  %v381_v37 = vadd.f32 %v2984_v25, %v373_v45  ;;  %v1789_v45 = vld [vmem:[%s2174_s9 + $0x20] sm:$0xff]  ;;  %v1164_v30 = vadd.f32 %v1163_v5, %v2884_v8  ;;  %v1260_v8 = vadd.f32 %v1259_v1, %v2898_v29  ;;  %s1956_s9 = smov [#allocation9]  }
 0x1cb   : > { %v515_v35 = vmul.f32 %v513_v7, %v2959_v55  ;;  %v766_v39 = vmul.f32 %v1789_v45, %v2914_v10  ;;  %v764_v7 = vadd.f32 %v763_v24, %v759_v28  ;;  %v3210_v24 = vld [vmem:[#allocation27_spill] sm:$0xff]  ;;  %s1880_s24 = sshll.u32 %s1956_s9, 4  ;;  %s1881_s24 = int_to_ptr.vmem [resolvable:$false] %s1880_s24 }
 0x1cc   : > { %v921_v46 = vadd.f32 %v920_v62, %v916_v38  ;;  %v382_v20 = vmax.f32 %v381_v37, 0.0  ;;  %v1169_v56 = vadd.f32 %v1168_v0, %v1164_v30  ;;  %s1882_s26 = scalar_lea.vmem %s1881_s24, 4096  ;;  %p1883_p7 = scmp.lt.s32.totalorder %s3072_s11, %s1881_s24 }
 0x1cd   : > { %v516_v58 = vadd.f32 %v515_v35, %v511_v50  ;;  %v1262_v6 = vpop.permute.xlu1 %1261  ;;  %v767_v37 = vadd.f32 %v766_v39, %v764_v7  ;;  %p1884_p9 = scmp.lt.s32.totalorder %s1882_s26, %s1876_s8 }
 0x1ce   : > { %v1053_v23 = vpop.permute.xlu0 %1052  ;;  %v929_v13 = vadd.f32 %v2984_v25, %v921_v46  ;;  %v1264_v63 = vmul.f32 %v1263_v22, %v1262_v6 }
 0x1cf   : > { %v524_v15 = vadd.f32 %v2984_v25, %v516_v58  ;;  %v1055_v43 = vmul.f32 %v1053_v23, %v2959_v55  ;;  %v780_v23 = vmul.f32 %v3204_v12, %v2944_v60  ;;  %v1278_v12 = vmul.f32 %v2820_v34, %v2785_v41  ;;  %p1885_p12 = por %p1884_p9, %p1883_p7 }
 0x1d0   : > { %v930_v50 = vmax.f32 %v929_v13, 0.0  ;;  %v1265_v31 = vadd.f32 %v1264_v63, %v1260_v8 }
 0x1d1   : > { %v525_v54 = vmax.f32 %v524_v15, 0.0  ;;  %v1056_v21 = vadd.f32 %v1055_v43, %v1051_v47  ;;  %v769_v16 = vpop.permute.xlu1 %768  ;;  %v1172_v15 = vadd.f32 %v1171_v48, %v1169_v56  ;;  %p1886_p1 = pnand %p1885_p12, %p1879_p3 }
 0x1d2   : > { %v634_v61 = vpop.permute.xlu0 %633  ;;  %v771_v38 = vmul.f32 %v769_v16, %v2921_v51 }
 0x1d3   : > { %v1064_v18 = vadd.f32 %v2984_v25, %v1056_v21  ;;  %v1303_v26 = vpack.c.bf16 %v525_v54, %v382_v20  ;;  %v636_v32 = vmul.f32 %v634_v61, %v2921_v51 }
 0x1d4   : > { %v772_v10 = vadd.f32 %v771_v38, %v767_v37 }
 0x1d5   : > { %v1065_v49 = vmax.f32 %v1064_v18, 0.0  ;;  %1448 = vmatmul.mubr.bf16.vlgmr.msra.gmra.mrb[0].mxu0 %v1303_v26  ;;  %v1267_v35 = vpop.permute.xlu1 %1266  ;;  %v637_v27 = vadd.f32 %v636_v32, %v632_v19 }
 0x1d6   : > { %v1174_v17 = vpop.permute.xlu0 %1173  ;;  %1457 = vmatprep.mubr.bf16.mxu0 %v3209_v59  ;;  %v1269_v58 = vmul.f32 %v1267_v35, %v2729_v9 }
 0x1d7   : > { %v1305_v62 = vpack.c.bf16 %v1065_v49, %v930_v50  ;;  %v1176_v52 = vmul.f32 %v1174_v17, %v2921_v51 }
 0x1d8   : > { %v1270_v43 = vadd.f32 %v1269_v58, %v1265_v31 }
 0x1d9   : > { %1468 = vmatmul.mubr.bf16.vlgmr.msra.gmra.mrb[0].mxu1 %v1305_v62  ;;  %v775_v42 = vpop.permute.xlu1 %774  ;;  %v1177_v51 = vadd.f32 %v1176_v52, %v1172_v15 }
 0x1da   : > { %v640_v46 = vpop.permute.xlu0 %639  ;;  %1477 = vmatprep.mubr.bf16.mxu1 %v3209_v59  ;;  %v777_v36 = vmul.f32 %v775_v42, %v2929_v14  ;;  %v1325_v59 = vlaneseq }
 0x1db   : > { %v642_v6 = vmul.f32 %v640_v46, %v2929_v14 }
 0x1dc   : > { %v778_v47 = vadd.f32 %v777_v36, %v772_v10  ;;  %v1326_v32 = vshrl.u32 %v1325_v59, 7 }
 0x1dd   : > { %v643_v29 = vadd.f32 %v642_v6, %v637_v27  ;;  %v1273_v11 = vpop.permute.xlu1 %1272 }
 0x1de   : > { %v1180_v9 = vpop.permute.xlu0 %1179  ;;  %v1275_v20 = vmul.f32 %v1273_v11, %v3210_v24  ;;  %v781_v13 = vadd.f32 %v780_v23, %v778_v47  ;;  %v1331_v38 = vsub.s32 1, %v1326_v32 }
 0x1df   : > { %v1182_v44 = vmul.f32 %v1180_v9, %v2929_v14  ;;  %v646_v54 = vadd.f32 %v645_v53, %v643_v29 }
 0x1e0   : > { %v1276_v5 = vadd.f32 %v1275_v20, %v1270_v43 }
 0x1e1   : > { %v1183_v21 = vadd.f32 %v1182_v44, %v1177_v51  ;;  %v783_v16 = vpop.permute.xlu1 %782 }
 0x1e2   : > { %v648_v61 = vpop.permute.xlu0 %647  ;;  %v785_v28 = vmul.f32 %v783_v16, %v2959_v55  ;;  %v1279_v26 = vadd.f32 %v1278_v12, %v1276_v5 }
 0x1e3   : > { %v650_v40 = vmul.f32 %v648_v61, %v2959_v55  ;;  %v1186_v18 = vadd.f32 %v1185_v3, %v1183_v21 }
 0x1e4   : > { %v786_v0 = vadd.f32 %v785_v28, %v781_v13 }
 0x1e5   : > { %v651_v60 = vadd.f32 %v650_v40, %v646_v54  ;;  %v1281_v41 = vpop.permute.xlu1 %1280 }
 0x1e6   : > { %v1188_v33 = vpop.permute.xlu0 %1187  ;;  %v794_v14 = vadd.f32 %v2984_v25, %v786_v0  ;;  %v1283_v45 = vmul.f32 %v1281_v41, %v2801_v4  ;;  %v1323_v4 = vld [vmem:[%s3123_s4] sm:$0x3] }
 0x1e7   : > { %v659_v34 = vadd.f32 %v2984_v25, %v651_v60  ;;  %v1190_v57 = vmul.f32 %v1188_v33, %v2959_v55  ;;  %v1327_v55 = vsub.s32 0, %v1326_v32  ;;  %v1332_v56 = vrot.slane %v1323_v4, %v1331_v38 }
 0x1e8   : > { %v795_v2 = vmax.f32 %v794_v14, 0.0  ;;  %v1284_v50 = vadd.f32 %v1283_v45, %v1279_v26 }
 0x1e9   : > { %v660_v39 = vmax.f32 %v659_v34, 0.0  ;;  %v1191_v7 = vadd.f32 %v1190_v57, %v1186_v18  ;;  %v1328_v62 = vrot.slane %v1323_v4, %v1327_v55 }
 0x1ea   : > { %v1292_v22 = vadd.f32 %v2984_v25, %v1284_v50 }
 0x1eb   : > { %v1199_v49 = vadd.f32 %v2984_v25, %v1191_v7  ;;  %v1304_v30 = vpack.c.bf16 %v795_v2, %v660_v39 }
 0x1ec   : > { %v1293_v17 = vmax.f32 %v1292_v22, 0.0 }
 0x1ed   : > { %v1200_v1 = vmax.f32 %v1199_v49, 0.0  ;;  %1458 = vmatmul.mubr.bf16.gmra.mrb[4].mxu0 %v1304_v30 }
 0x1ef   : > { %v1306_v35 = vpack.c.bf16 %v1293_v17, %v1200_v1 }
 0x1f1   : > { %1478 = vmatmul.mubr.bf16.gmra.mrb[4].mxu1 %v1306_v35 }
 0x2a8   : > { %v1449_v63 = vpop.f32.mrb[0].mxu0 }
 0x2a9   : > { %v1450_v48 = vadd.f32 %v1449_v63, %v1328_v62  ;;  %v1451_v25 = vpop.f32.mrb[1].mxu0 }
 0x2aa   : > { %v1452_v19 = vadd.f32 %v1451_v25, %v1332_v56  ;;  %v1453_v37 = vpop.f32.mrb[2].mxu0 }
 0x2ab   : > { %v1488_v53 = vmax.f32 %v1450_v48, 0.0  ;;  %v1454_v8 = vadd.f32 %v1453_v37, %v1328_v62  ;;  %v1455_v52 = vpop.f32.mrb[3].mxu0 }
 0x2ac   : > { %v1489_v58 = vmax.f32 %v1452_v19, 0.0  ;;  %v1456_v46 = vadd.f32 %v1455_v52, %v1332_v56  ;;  %v1469_v42 = vpop.f32.mrb[0].mxu1 }
 0x2ad   : > { %1504 = vst [vmem:[%s3050_s13] sm:$0xff] %v1488_v53  ;;  %v1490_v23 = vmax.f32 %v1454_v8, 0.0  ;;  %v1470_v27 = vadd.f32 %v1469_v42, %v1328_v62  ;;  %v1471_v10 = vpop.f32.mrb[1].mxu1 }
 0x2ae   : > { %1505 = vst [vmem:[%s3050_s13 + $0x8] sm:$0xff] %v1489_v58  ;;  %v1491_v6 = vmax.f32 %v1456_v46, 0.0  ;;  %v1472_v36 = vadd.f32 %v1471_v10, %v1332_v56  ;;  %v1473_v31 = vpop.f32.mrb[2].mxu1 }
 0x2af   : > { %1506 = vst [vmem:[%s3050_s13 + $0x10] sm:$0xff] %v1490_v23  ;;  %v1496_v15 = vmax.f32 %v1470_v27, 0.0  ;;  %v1474_v29 = vadd.f32 %v1473_v31, %v1328_v62  ;;  %v1475_v47 = vpop.f32.mrb[3].mxu1 }
 0x2b0   : > { %1507 = vst [vmem:[%s3050_s13 + $0x18] sm:$0xff] %v1491_v6  ;;  %v1497_v51 = vmax.f32 %v1472_v36, 0.0  ;;  %v1476_v43 = vadd.f32 %v1475_v47, %v1332_v56 }
 0x2b1   : > { %1512 = vst [vmem:[%s3050_s13 + $0x40] sm:$0xff] %v1496_v15  ;;  %v1498_v9 = vmax.f32 %v1474_v29, 0.0 }
 0x2b2   : > { %1513 = vst [vmem:[%s3050_s13 + $0x48] sm:$0xff] %v1497_v51  ;;  %v1499_v11 = vmax.f32 %v1476_v43, 0.0 }
 0x2b3   : > { %1514 = vst [vmem:[%s3050_s13 + $0x50] sm:$0xff] %v1498_v9 }
 0x2b4   : > { %1515 = vst [vmem:[%s3050_s13 + $0x58] sm:$0xff] %v1499_v11 }
 0x2c0   : > { %v1459_v3 = vpop.f32.mrb[4].mxu0 }
 0x2c1   : > { %v1460_v12 = vadd.f32 %v1459_v3, %v1328_v62  ;;  %v1461_v44 = vpop.f32.mrb[5].mxu0 }
 0x2c2   : > { %v1462_v24 = vadd.f32 %v1461_v44, %v1332_v56  ;;  %v1463_v20 = vpop.f32.mrb[6].mxu0 }
 0x2c3   : > { %v1492_v54 = vmax.f32 %v1460_v12, 0.0  ;;  %v1464_v13 = vadd.f32 %v1463_v20, %v1328_v62  ;;  %v1465_v21 = vpop.f32.mrb[7].mxu0 }
 0x2c4   : > { %v1493_v5 = vmax.f32 %v1462_v24, 0.0  ;;  %v1466_v61 = vadd.f32 %v1465_v21, %v1332_v56  ;;  %v1479_v16 = vpop.f32.mrb[4].mxu1 }
 0x2c5   : > { %1508 = vst [vmem:[%s3050_s13 + $0x20] sm:$0xff] %v1492_v54  ;;  %v1494_v40 = vmax.f32 %v1464_v13, 0.0  ;;  %v1480_v28 = vadd.f32 %v1479_v16, %v1328_v62  ;;  %v1481_v18 = vpop.f32.mrb[5].mxu1 }
 0x2c6   : > { %1509 = vst [vmem:[%s3050_s13 + $0x28] sm:$0xff] %v1493_v5  ;;  %v1495_v26 = vmax.f32 %v1466_v61, 0.0  ;;  %v1482_v60 = vadd.f32 %v1481_v18, %v1332_v56  ;;  %v1483_v0 = vpop.f32.mrb[6].mxu1 }
 0x2c7   : > { %1510 = vst [vmem:[%s3050_s13 + $0x30] sm:$0xff] %v1494_v40  ;;  %v1500_v33 = vmax.f32 %v1480_v28, 0.0  ;;  %v1484_v41 = vadd.f32 %v1483_v0, %v1328_v62  ;;  %v1485_v34 = vpop.f32.mrb[7].mxu1 }
 0x2c8   : > { %1511 = vst [vmem:[%s3050_s13 + $0x38] sm:$0xff] %v1495_v26  ;;  %v1501_v14 = vmax.f32 %v1482_v60, 0.0  ;;  %v1486_v57 = vadd.f32 %v1485_v34, %v1332_v56 }
 0x2c9   : > { %1516 = vst [vmem:[%s3050_s13 + $0x60] sm:$0xff] %v1500_v33  ;;  %v1502_v45 = vmax.f32 %v1484_v41, 0.0 }
 0x2ca   : > { %1517 = vst [vmem:[%s3050_s13 + $0x68] sm:$0xff] %v1501_v14  ;;  %v1503_v39 = vmax.f32 %v1486_v57, 0.0 }
 0x2cb   : > { %1518 = vst [vmem:[%s3050_s13 + $0x70] sm:$0xff] %v1502_v45 }
 0x2cc   : > { %1519 = vst [vmem:[%s3050_s13 + $0x78] sm:$0xff] %v1503_v39 }
 0x2cd   : > { %1889 = shalt.err (!%p1886_p1)
}
 0x2ce   : > { %s1890_s15 = scalar_lea.hbm %s3070_s6, 2048  ;;  %s1894_s28 = scalar_lea.hbm %s3124_s5, 4096 }
 0x2cf   : > { %p1891_p13 = scmp.ne.s32.totalorder %s3070_s6, %s1890_s15  ;;  %p1895_p4 = scmp.lt.u32.totalorder %s3070_s6, %s3124_s5 }
 0x2d0   : > { %p1896_p5 = scmp.lt.u32.totalorder %s1894_s28, %s1890_s15  ;;  %p1898_p11 = scmp.lt.u32.totalorder %s1890_s15, %s3070_s6 }
 0x2d1   : > { %p1892_p6 = pnand %p1891_p13, %p3211_p0 }
 0x2d2   : > { %p1897_p8 = por %p1896_p5, %p1895_p4 }
 0x2d3   : > { %p1893_p10 = pneg %p1892_p6 }
 0x2d4   : > { %p1899_p2 = por %p1898_p11, %p1897_p8 }
 0x2d6   : > { %p1900_p3 = pnand %p1899_p2, %p1893_p10 }
 0x2d8   : > { %1903 = shalt.err (!%p1900_p3)
}
 0x2d9   : > { %s1957_s30 = smov 256   ;;  %s1958_s17 = smov 16  }
 0x2da   : > { %1696 = dma.vmem_to_hbm [thread:$0]  (%p3211_p0), %s3072_s11, 2048, %s3070_s6, %s1521_s22, %s1957_s30, %s1957_s30, %s1958_s17  }
 0x2db PF: > { %s1549_s7 = sand.u32 1, %s1934_s18   ;;  %p3212_p7 = scmp.ne.s32.totalorder %s3157_s25, 0 }
 0x2dc   : > { %p3213_p9 = scmp.ge.s32.totalorder %s1946_s21, 2  ;;  %s1550_s8 = scalar_lea.sflag [#allocation5], %s1549_s7 }
 0x2de   : > { %p1710_p12 = pnand %p3213_p9, %p3212_p7 }
 0x2e0   : > { %1929 = dma.done.wait (!%p1710_p12), %s1550_s8, 2048  }
 0x2e1   : > { %1931 = vsyncadd (!%p1710_p12), %s1550_s8, 4294965248  ;;  %p19_p1 = scmp.ge.s32.totalorder %s2105_s29, 4   ;;  %s3214_s18 = smov %s1938_s19 }
 0x2e2   : > { %s3215_s19 = smov %s1942_s20  ;;  %s3216_s20 = smov %s2121_s27 }
 0x2e3   : > { %s3217_s21 = smov %s2105_s29  ;;  %21 = sbr.rel (!%p19_p1) target bundleno = 6 (0x6), region = 119 }
 0x2ea   :  { %1555 = vsyncpa [#allocation4], 1 }
 0x2eb   :  { %1557 = vsyncpa [#allocation4 + $0x1], 1 }
 0x2ec   :  { %1558 = vsyncpa [#allocation7], 1 }
 0x2ed   :  { %1559 = vsyncpa [#allocation5], 1 }
 0x2ee   :  { %1561 = vsyncpa [#allocation5 + $0x1], 1 }

</bundles_post_ra>
